<compile_context>
chip_gen: v6e
topology: v6e:2x2x1
jax: 0.10.0
libtpu: 0.0.40
codegen_flags: <defaults>
</compile_context>

<pallas_src>
import functools

import jax
import jax.numpy as jnp
import numpy as np
from jax.experimental import pallas as pl
from jax.experimental.pallas import tpu as pltpu


# ---------------- kernel 1: fused input-projection + bidirectional recurrence --------- #

def gru_fused_kernel(xf_ref, xb_ref, wih_ref, bgi_ref, whh_ref, bhn_ref,
                     outf_ref, outb_ref,
                     h_scr, gfr, gfz, gfn, gbr, gbz, gbn,
                     *, t_chunk, batch, d_model, unroll):
    """One time-chunk per grid step; forward & backward GRU chains interleaved.

    xf_ref / xb_ref : (Tc*B, D)  x rows for the forward chunk c / backward chunk nc-1-c
    wih_ref, whh_ref: (2, 3, D, D)   per-direction, per-gate W^T (resident)
    bgi_ref         : (2, 3, 1, D)   folded input-projection bias (b_ih + b_hh for r/z)
    bhn_ref         : (2, 1, D)      hidden n-gate bias (scaled by r, applied per step)
    outf_ref/outb_ref: (Tc*B, D)     per-direction hidden states for this chunk
    h_scr           : (2, B, D)      hidden-state carry across chunks (fwd, bwd)
    g??             : (Tc*B, D)      per-gate hoisted input projections (VMEM scratch)
    """
    f32 = jnp.float32

    @pl.when(pl.program_id(0) == 0)
    def _init():
        h_scr[...] = jnp.zeros_like(h_scr)

    # ---- chunk prologue: hoisted input projection (big MXU matmuls, off the serial
    #      critical path), one lane-aligned (Tc*B, D) tile per gate per direction ----
    xf = xf_ref[...]
    xb = xb_ref[...]
    gfr[...] = jnp.dot(xf, wih_ref[0, 0], preferred_element_type=f32) + bgi_ref[0, 0]
    gfz[...] = jnp.dot(xf, wih_ref[0, 1], preferred_element_type=f32) + bgi_ref[0, 1]
    gfn[...] = jnp.dot(xf, wih_ref[0, 2], preferred_element_type=f32) + bgi_ref[0, 2]
    gbr[...] = jnp.dot(xb, wih_ref[1, 0], preferred_element_type=f32) + bgi_ref[1, 0]
    gbz[...] = jnp.dot(xb, wih_ref[1, 1], preferred_element_type=f32) + bgi_ref[1, 1]
    gbn[...] = jnp.dot(xb, wih_ref[1, 2], preferred_element_type=f32) + bgi_ref[1, 2]

    # Resident per-gate hidden weights; hoist the bias broadcasts out of the time loop.
    w_fr = whh_ref[0, 0]; w_fz = whh_ref[0, 1]; w_fn = whh_ref[0, 2]
    w_br = whh_ref[1, 0]; w_bz = whh_ref[1, 1]; w_bn = whh_ref[1, 2]
    bn_f = jnp.broadcast_to(bhn_ref[0], (batch, d_model))
    bn_b = jnp.broadcast_to(bhn_ref[1], (batch, d_model))

    def step(t, carry):
        hf, hb = carry
        row_f = pl.multiple_of(t * batch, batch)                    # chunk time t
        row_b = pl.multiple_of((t_chunk - 1 - t) * batch, batch)    # reversed within chunk

        # Two independent recurrences interleaved: each direction's MXU pushes and
        # sigmoid/tanh EUP work hide the other's latency on a single TensorCore.
        ghr_f = jnp.dot(hf, w_fr, preferred_element_type=f32)
        ghz_f = jnp.dot(hf, w_fz, preferred_element_type=f32)
        ghn_f = jnp.dot(hf, w_fn, preferred_element_type=f32)
        ghr_b = jnp.dot(hb, w_br, preferred_element_type=f32)
        ghz_b = jnp.dot(hb, w_bz, preferred_element_type=f32)
        ghn_b = jnp.dot(hb, w_bn, preferred_element_type=f32)

        r_f = jax.nn.sigmoid(gfr[pl.ds(row_f, batch), :] + ghr_f)
        z_f = jax.nn.sigmoid(gfz[pl.ds(row_f, batch), :] + ghz_f)
        n_f = jnp.tanh(gfn[pl.ds(row_f, batch), :] + r_f * (ghn_f + bn_f))
        hf_new = (1.0 - z_f) * n_f + z_f * hf

        r_b = jax.nn.sigmoid(gbr[pl.ds(row_b, batch), :] + ghr_b)
        z_b = jax.nn.sigmoid(gbz[pl.ds(row_b, batch), :] + ghz_b)
        n_b = jnp.tanh(gbn[pl.ds(row_b, batch), :] + r_b * (ghn_b + bn_b))
        hb_new = (1.0 - z_b) * n_b + z_b * hb

        outf_ref[pl.ds(row_f, batch), :] = hf_new
        outb_ref[pl.ds(row_b, batch), :] = hb_new
        return hf_new, hb_new

    hf_fin, hb_fin = jax.lax.fori_loop(0, t_chunk, step, (h_scr[0], h_scr[1]),
                                       unroll=unroll)
    h_scr[0] = hf_fin
    h_scr[1] = hb_fin


# --------------------------- kernel 2: MLP + residual mix ----------------------------- #

def mlp_res_kernel(hf_ref, hb_ref, res_ref, w1f_ref, w1b_ref, b1_ref,
                   w2_ref, b2_ref, out_ref):
    """y = 0.7 * (relu([hf|hb] @ W1^T + b1) @ W2^T + b2) + 0.3 * res  for one row tile.

    The hidden-state concat is avoided by splitting W1^T into its fwd/bwd halves.
    """
    y = (jnp.dot(hf_ref[...], w1f_ref[...], preferred_element_type=jnp.float32)
         + jnp.dot(hb_ref[...], w1b_ref[...], preferred_element_type=jnp.float32)
         + b1_ref[...])
    y = jnp.maximum(y, 0.0)
    y = jnp.dot(y, w2_ref[...], preferred_element_type=jnp.float32) + b2_ref[...]
    # TODO(synk): for D < 128 (e.g. 32) this store is a masked vst; a lane-dense
    # (rows, k*128) packed store + wrapper reshape would speed the epilogue on v5e.
    out_ref[...] = 0.7 * y + 0.3 * res_ref[...]


# ----------------------------------- tiling helpers ------------------------------------ #

def _pick_time_chunk(seq_len, batch, d_model, budget_bytes=2 * 1024 * 1024):
    """Largest time-chunk such that per-chunk VMEM stays well under the v7x 64 MiB/TC
    budget (x + out chunks double-buffered by Pallas + 6 gi scratch buffers), the chunk
    divides T (clean reversed-chunk mapping for the backward direction), and the flat
    row count Tc*B is sublane-aligned (or the full extent)."""
    per_t = (4 * 2 + 6) * batch * d_model * 4
    cap = max(1, budget_bytes // per_t)
    for tc in range(min(seq_len, cap), 0, -1):
        if seq_len % tc == 0 and (tc * batch) % 8 == 0:
            return tc
    return seq_len


def _pick_row_tile(n_rows, cap=512):
    """Row tile for the MLP kernel: full extent when small, else a multiple of 8 sized so
    the (tile, 4D) f32 ReLU intermediate plus double-buffered blocks fit VMEM easily."""
    if n_rows <= cap:
        return n_rows
    return (cap // 8) * 8


# -------------------------------------- wrapper ---------------------------------------- #

def residual_gru_forward(x, params):
    T, B, D = x.shape
    TB = T * B
    f32 = jnp.float32
    x2 = x.reshape(TB, D)                           # flat rows, time-major (row = t*B + b)

    # Per-direction, per-gate transposed weight stacks: lane-aligned gates in-kernel.
    def gate_stack_t(w):                            # (3D, D) -> (3, D, D), each W_gate^T
        return jnp.stack([w[:D].T, w[D:2 * D].T, w[2 * D:].T])

    wih = jnp.stack([gate_stack_t(params["w_ih_f"]), gate_stack_t(params["w_ih_b"])])
    whh = jnp.stack([gate_stack_t(params["w_hh_f"]), gate_stack_t(params["w_hh_b"])])

    # Fold b_ih + b_hh into the hoisted projection for the r/z gates; the n gate keeps
    # only b_in there (b_hn is scaled by r and applied per step).
    def gi_bias(b_ih, b_hh):                        # -> (3, 1, D)
        return jnp.stack([(b_ih[:D] + b_hh[:D])[None, :],
                          (b_ih[D:2 * D] + b_hh[D:2 * D])[None, :],
                          b_ih[2 * D:][None, :]])

    bgi = jnp.stack([gi_bias(params["b_ih_f"], params["b_hh_f"]),
                     gi_bias(params["b_ih_b"], params["b_hh_b"])])       # (2, 3, 1, D)
    bhn = jnp.stack([params["b_hh_f"][2 * D:][None, :],
                     params["b_hh_b"][2 * D:][None, :]])                 # (2, 1, D)

    t_chunk = _pick_time_chunk(T, B, D)
    n_chunks = T // t_chunk
    rows_c = t_chunk * B

    # --- kernel 1: fused projection + bidirectional recurrence, time-chunked ---
    hf, hb = pl.pallas_call(
        functools.partial(gru_fused_kernel, t_chunk=t_chunk, batch=B, d_model=D,
                          unroll=max(1, min(8, t_chunk))),
        out_shape=(jax.ShapeDtypeStruct((TB, D), f32),
                   jax.ShapeDtypeStruct((TB, D), f32)),
        grid=(n_chunks,),
        in_specs=[
            pl.BlockSpec((rows_c, D), lambda c: (c, 0)),                   # x, fwd chunk
            pl.BlockSpec((rows_c, D), lambda c: (n_chunks - 1 - c, 0)),    # x, bwd chunk
            pl.BlockSpec((2, 3, D, D), lambda c: (0, 0, 0, 0)),            # W_ih^T (resident)
            pl.BlockSpec((2, 3, 1, D), lambda c: (0, 0, 0, 0)),            # folded gi bias
            pl.BlockSpec((2, 3, D, D), lambda c: (0, 0, 0, 0)),            # W_hh^T (resident)
            pl.BlockSpec((2, 1, D), lambda c: (0, 0, 0)),                  # b_hn
        ],
        out_specs=(
            pl.BlockSpec((rows_c, D), lambda c: (c, 0)),                   # fwd hidden
            pl.BlockSpec((rows_c, D), lambda c: (n_chunks - 1 - c, 0)),    # bwd hidden
        ),
        scratch_shapes=[pltpu.VMEM((2, B, D), f32)]                        # h carry
                       + [pltpu.VMEM((rows_c, D), f32) for _ in range(6)], # per-gate gi
        compiler_params=pltpu.CompilerParams(
            dimension_semantics=("arbitrary",)),    # h carried chunk -> chunk
    )(x2, x2, wih, bgi, whh, bhn)

    # --- kernel 2: MLP + residual, row-tiled ("parallel"), weights resident ---
    tile_m = _pick_row_tile(TB)
    w1_t = params["w1"].T                                                  # (2D, 4D)
    out2 = pl.pallas_call(
        mlp_res_kernel,
        out_shape=jax.ShapeDtypeStruct((TB, D), f32),
        grid=(pl.cdiv(TB, tile_m),),
        in_specs=[
            pl.BlockSpec((tile_m, D), lambda i: (i, 0)),                   # fwd hidden rows
            pl.BlockSpec((tile_m, D), lambda i: (i, 0)),                   # bwd hidden rows
            pl.BlockSpec((tile_m, D), lambda i: (i, 0)),                   # residual rows
            pl.BlockSpec((D, 4 * D), lambda i: (0, 0)),                    # W1^T fwd half
            pl.BlockSpec((D, 4 * D), lambda i: (0, 0)),                    # W1^T bwd half
            pl.BlockSpec((1, 4 * D), lambda i: (0, 0)),                    # b1
            pl.BlockSpec((4 * D, D), lambda i: (0, 0)),                    # W2^T
            pl.BlockSpec((1, D), lambda i: (0, 0)),                        # b2
        ],
        out_specs=pl.BlockSpec((tile_m, D), lambda i: (i, 0)),
        compiler_params=pltpu.CompilerParams(
            dimension_semantics=("parallel",)),     # v7x: both TCs share the row tiles
    )(hf, hb, x2, w1_t[:D], w1_t[D:], params["b1"][None, :],
      params["w2"].T, params["b2"][None, :])

    return out2.reshape(T, B, D)


# ------------------------------- pure-JAX reference ------------------------------------ #

def _gru_dir_ref(x, w_ih, w_hh, b_ih, b_hh):
    D = w_hh.shape[1]

    def step(h, xt):
        gi = xt @ w_ih.T + b_ih
        gh = h @ w_hh.T + b_hh
        r = jax.nn.sigmoid(gi[:, :D] + gh[:, :D])
        z = jax.nn.sigmoid(gi[:, D:2 * D] + gh[:, D:2 * D])
        n = jnp.tanh(gi[:, 2 * D:] + r * gh[:, 2 * D:])
        h_new = (1.0 - z) * n + z * h
        return h_new, h_new

    h0 = jnp.zeros((x.shape[1], D), jnp.float32)
    _, hs = jax.lax.scan(step, h0, x)
    return hs


def residual_gru_ref(x, p):
    out_f = _gru_dir_ref(x, p["w_ih_f"], p["w_hh_f"], p["b_ih_f"], p["b_hh_f"])
    out_b = _gru_dir_ref(x[::-1], p["w_ih_b"], p["w_hh_b"], p["b_ih_b"], p["b_hh_b"])[::-1]
    h = jnp.concatenate([out_f, out_b], axis=-1)
    y = jnp.maximum(h @ p["w1"].T + p["b1"], 0.0)
    y = y @ p["w2"].T + p["b2"]
    return 0.7 * y + 0.3 * x


# --------------------------------------- main ------------------------------------------- #

def make_params(key, d_model):
    k = 1.0 / np.sqrt(d_model)
    keys = jax.random.split(key, 12)
    u = lambda kk, shape: jax.random.uniform(kk, shape, jnp.float32, -k, k)
    return {
        # GRU forward / backward directions (PyTorch shapes: (3H, In), (3H, H), (3H,))
        "w_ih_f": u(keys[0], (3 * d_model, d_model)),
        "w_hh_f": u(keys[1], (3 * d_model, d_model)),
        "b_ih_f": u(keys[2], (3 * d_model,)),
        "b_hh_f": u(keys[3], (3 * d_model,)),
        "w_ih_b": u(keys[4], (3 * d_model, d_model)),
        "w_hh_b": u(keys[5], (3 * d_model, d_model)),
        "b_ih_b": u(keys[6], (3 * d_model,)),
        "b_hh_b": u(keys[7], (3 * d_model,)),
        # linear1: (4D, 2D), linear2: (D, 4D)
        "w1": u(keys[8], (4 * d_model, 2 * d_model)),
        "b1": u(keys[9], (4 * d_model,)),
        "w2": u(keys[10], (d_model, 4 * d_model)),
        "b2": u(keys[11], (d_model,)),
    }


if __name__ == "__main__":
    T, B, D = 8, 2, 32   # (seq, batch, d_model)
    key = jax.random.PRNGKey(0)
    k_x, k_p = jax.random.split(key)
    x = jax.random.normal(k_x, (T, B, D), jnp.float32)
    params = make_params(k_p, D)

    out = jax.block_until_ready(residual_gru_forward(x, params))
    ref = jax.block_until_ready(residual_gru_ref(x, params))
    np.testing.assert_allclose(np.asarray(out), np.asarray(ref), rtol=1e-3, atol=1e-4)

    print("KERNEL_OK")
</pallas_src>

<mosaic_0001>
module attributes {stable_mosaic.version = 11 : i64} {
  func.func @gru_fused_kernel(%arg0: i32, %arg1: memref<16x32xf32, #tpu.memory_space<vmem>>, %arg2: memref<16x32xf32, #tpu.memory_space<vmem>>, %arg3: memref<2x3x32x32xf32, #tpu.memory_space<vmem>>, %arg4: memref<2x3x1x32xf32, #tpu.memory_space<vmem>>, %arg5: memref<2x3x32x32xf32, #tpu.memory_space<vmem>>, %arg6: memref<2x1x32xf32, #tpu.memory_space<vmem>>, %arg7: memref<16x32xf32, #tpu.memory_space<vmem>>, %arg8: memref<16x32xf32, #tpu.memory_space<vmem>>, %arg9: memref<2x2x32xf32, #tpu.memory_space<vmem>>, %arg10: memref<16x32xf32, #tpu.memory_space<vmem>>, %arg11: memref<16x32xf32, #tpu.memory_space<vmem>>, %arg12: memref<16x32xf32, #tpu.memory_space<vmem>>, %arg13: memref<16x32xf32, #tpu.memory_space<vmem>>, %arg14: memref<16x32xf32, #tpu.memory_space<vmem>>, %arg15: memref<16x32xf32, #tpu.memory_space<vmem>>) attributes {dimension_semantics = [#tpu.dimension_semantics<arbitrary>], iteration_bounds = array<i64: 1>, scalar_prefetch = 0 : i64, scratch_operands = 7 : i64, tpu.core_type = #tpu.core_type<tc>, window_params = [{transform_indices = @transform_0, window_bounds = array<i64: 16, 32>}, {transform_indices = @transform_1, window_bounds = array<i64: 16, 32>}, {pipeline_mode = #tpu.pipeline_mode<synchronous>, transform_indices = @transform_2, window_bounds = array<i64: 2, 3, 32, 32>}, {pipeline_mode = #tpu.pipeline_mode<synchronous>, transform_indices = @transform_3, window_bounds = array<i64: 2, 3, 1, 32>}, {pipeline_mode = #tpu.pipeline_mode<synchronous>, transform_indices = @transform_4, window_bounds = array<i64: 2, 3, 32, 32>}, {pipeline_mode = #tpu.pipeline_mode<synchronous>, transform_indices = @transform_5, window_bounds = array<i64: 2, 1, 32>}, {transform_indices = @transform_6, window_bounds = array<i64: 16, 32>}, {transform_indices = @transform_7, window_bounds = array<i64: 16, 32>}]} {
    %c0_i32 = arith.constant 0 : i32
    %0 = arith.cmpi eq, %arg0, %c0_i32 : i32
    %1 = arith.extui %0 : i1 to i32
    %c0_i32_0 = arith.constant 0 : i32
    %2 = arith.cmpi ne, %1, %c0_i32_0 : i32
    scf.if %2 {
      %cst_294 = arith.constant 0.000000e+00 : f32
      %635 = vector.broadcast %cst_294 : f32 to vector<2x2x32xf32>
      %c0_295 = arith.constant 0 : index
      %c0_296 = arith.constant 0 : index
      %c0_297 = arith.constant 0 : index
      %636 = vector.load %arg9[%c0_295, %c0_296, %c0_297] : memref<2x2x32xf32, #tpu.memory_space<vmem>>, vector<2x2x32xf32>
      tpu.vector_store %arg9[%c0_295, %c0_296, %c0_297], %635 {strides = array<i32>} : memref<2x2x32xf32, #tpu.memory_space<vmem>>, vector<2x2x32xf32>,
    } else {
    }
    %c0 = arith.constant 0 : index
    %c0_1 = arith.constant 0 : index
    %3 = vector.load %arg1[%c0, %c0_1] : memref<16x32xf32, #tpu.memory_space<vmem>>, vector<16x32xf32>
    %c0_2 = arith.constant 0 : index
    %c0_3 = arith.constant 0 : index
    %4 = vector.load %arg2[%c0_2, %c0_3] : memref<16x32xf32, #tpu.memory_space<vmem>>, vector<16x32xf32>
    %c0_4 = arith.constant 0 : index
    %c0_5 = arith.constant 0 : index
    %c0_6 = arith.constant 0 : index
    %c0_7 = arith.constant 0 : index
    %5 = vector.load %arg3[%c0_4, %c0_5, %c0_6, %c0_7] : memref<2x3x32x32xf32, #tpu.memory_space<vmem>>, vector<1x1x32x32xf32>
    %6 = vector.shape_cast %5 : vector<1x1x32x32xf32> to vector<32x32xf32>
    %cst = arith.constant dense<0.000000e+00> : vector<16x32xf32>
    %7 = tpu.matmul %3, %6, %cst {dimension_numbers = #tpu.dot_dimension_numbers<[1], [0], [0], [1], [0, 0, 1, 1], [], []>} : vector<16x32xf32>, vector<32x32xf32>, vector<16x32xf32> -> vector<16x32xf32>
    %c0_8 = arith.constant 0 : index
    %c0_9 = arith.constant 0 : index
    %c0_10 = arith.constant 0 : index
    %c0_11 = arith.constant 0 : index
    %8 = vector.load %arg4[%c0_8, %c0_9, %c0_10, %c0_11] : memref<2x3x1x32xf32, #tpu.memory_space<vmem>>, vector<1x1x1x32xf32>
    %9 = vector.shape_cast %8 : vector<1x1x1x32xf32> to vector<1x32xf32>
    %10 = vector.broadcast %9 : vector<1x32xf32> to vector<16x32xf32>
    %11 = arith.addf %7, %10 : vector<16x32xf32>
    %c0_12 = arith.constant 0 : index
    %c0_13 = arith.constant 0 : index
    %12 = vector.load %arg10[%c0_12, %c0_13] : memref<16x32xf32, #tpu.memory_space<vmem>>, vector<16x32xf32>
    tpu.vector_store %arg10[%c0_12, %c0_13], %11 {strides = array<i32>} : memref<16x32xf32, #tpu.memory_space<vmem>>, vector<16x32xf32>,
    %c0_14 = arith.constant 0 : index
    %c1 = arith.constant 1 : index
    %c0_15 = arith.constant 0 : index
    %c0_16 = arith.constant 0 : index
    %13 = vector.load %arg3[%c0_14, %c1, %c0_15, %c0_16] : memref<2x3x32x32xf32, #tpu.memory_space<vmem>>, vector<1x1x32x32xf32>
    %14 = vector.shape_cast %13 : vector<1x1x32x32xf32> to vector<32x32xf32>
    %cst_17 = arith.constant dense<0.000000e+00> : vector<16x32xf32>
    %15 = tpu.matmul %3, %14, %cst_17 {dimension_numbers = #tpu.dot_dimension_numbers<[1], [0], [0], [1], [0, 0, 1, 1], [], []>} : vector<16x32xf32>, vector<32x32xf32>, vector<16x32xf32> -> vector<16x32xf32>
    %c0_18 = arith.constant 0 : index
    %c1_19 = arith.constant 1 : index
    %c0_20 = arith.constant 0 : index
    %c0_21 = arith.constant 0 : index
    %16 = vector.load %arg4[%c0_18, %c1_19, %c0_20, %c0_21] : memref<2x3x1x32xf32, #tpu.memory_space<vmem>>, vector<1x1x1x32xf32>
    %17 = vector.shape_cast %16 : vector<1x1x1x32xf32> to vector<1x32xf32>
    %18 = vector.broadcast %17 : vector<1x32xf32> to vector<16x32xf32>
    %19 = arith.addf %15, %18 : vector<16x32xf32>
    %c0_22 = arith.constant 0 : index
    %c0_23 = arith.constant 0 : index
    %20 = vector.load %arg11[%c0_22, %c0_23] : memref<16x32xf32, #tpu.memory_space<vmem>>, vector<16x32xf32>
    tpu.vector_store %arg11[%c0_22, %c0_23], %19 {strides = array<i32>} : memref<16x32xf32, #tpu.memory_space<vmem>>, vector<16x32xf32>,
    %c0_24 = arith.constant 0 : index
    %c2 = arith.constant 2 : index
    %c0_25 = arith.constant 0 : index
    %c0_26 = arith.constant 0 : index
    %21 = vector.load %arg3[%c0_24, %c2, %c0_25, %c0_26] : memref<2x3x32x32xf32, #tpu.memory_space<vmem>>, vector<1x1x32x32xf32>
    %22 = vector.shape_cast %21 : vector<1x1x32x32xf32> to vector<32x32xf32>
    %cst_27 = arith.constant dense<0.000000e+00> : vector<16x32xf32>
    %23 = tpu.matmul %3, %22, %cst_27 {dimension_numbers = #tpu.dot_dimension_numbers<[1], [0], [0], [1], [0, 0, 1, 1], [], []>} : vector<16x32xf32>, vector<32x32xf32>, vector<16x32xf32> -> vector<16x32xf32>
    %c0_28 = arith.constant 0 : index
    %c2_29 = arith.constant 2 : index
    %c0_30 = arith.constant 0 : index
    %c0_31 = arith.constant 0 : index
    %24 = vector.load %arg4[%c0_28, %c2_29, %c0_30, %c0_31] : memref<2x3x1x32xf32, #tpu.memory_space<vmem>>, vector<1x1x1x32xf32>
    %25 = vector.shape_cast %24 : vector<1x1x1x32xf32> to vector<1x32xf32>
    %26 = vector.broadcast %25 : vector<1x32xf32> to vector<16x32xf32>
    %27 = arith.addf %23, %26 : vector<16x32xf32>
    %c0_32 = arith.constant 0 : index
    %c0_33 = arith.constant 0 : index
    %28 = vector.load %arg12[%c0_32, %c0_33] : memref<16x32xf32, #tpu.memory_space<vmem>>, vector<16x32xf32>
    tpu.vector_store %arg12[%c0_32, %c0_33], %27 {strides = array<i32>} : memref<16x32xf32, #tpu.memory_space<vmem>>, vector<16x32xf32>,
    %c1_34 = arith.constant 1 : index
    %c0_35 = arith.constant 0 : index
    %c0_36 = arith.constant 0 : index
    %c0_37 = arith.constant 0 : index
    %29 = vector.load %arg3[%c1_34, %c0_35, %c0_36, %c0_37] : memref<2x3x32x32xf32, #tpu.memory_space<vmem>>, vector<1x1x32x32xf32>
    %30 = vector.shape_cast %29 : vector<1x1x32x32xf32> to vector<32x32xf32>
    %cst_38 = arith.constant dense<0.000000e+00> : vector<16x32xf32>
    %31 = tpu.matmul %4, %30, %cst_38 {dimension_numbers = #tpu.dot_dimension_numbers<[1], [0], [0], [1], [0, 0, 1, 1], [], []>} : vector<16x32xf32>, vector<32x32xf32>, vector<16x32xf32> -> vector<16x32xf32>
    %c1_39 = arith.constant 1 : index
    %c0_40 = arith.constant 0 : index
    %c0_41 = arith.constant 0 : index
    %c0_42 = arith.constant 0 : index
    %32 = vector.load %arg4[%c1_39, %c0_40, %c0_41, %c0_42] : memref<2x3x1x32xf32, #tpu.memory_space<vmem>>, vector<1x1x1x32xf32>
    %33 = vector.shape_cast %32 : vector<1x1x1x32xf32> to vector<1x32xf32>
    %34 = vector.broadcast %33 : vector<1x32xf32> to vector<16x32xf32>
    %35 = arith.addf %31, %34 : vector<16x32xf32>
    %c0_43 = arith.constant 0 : index
    %c0_44 = arith.constant 0 : index
    %36 = vector.load %arg13[%c0_43, %c0_44] : memref<16x32xf32, #tpu.memory_space<vmem>>, vector<16x32xf32>
    tpu.vector_store %arg13[%c0_43, %c0_44], %35 {strides = array<i32>} : memref<16x32xf32, #tpu.memory_space<vmem>>, vector<16x32xf32>,
    %c1_45 = arith.constant 1 : index
    %c1_46 = arith.constant 1 : index
    %c0_47 = arith.constant 0 : index
    %c0_48 = arith.constant 0 : index
    %37 = vector.load %arg3[%c1_45, %c1_46, %c0_47, %c0_48] : memref<2x3x32x32xf32, #tpu.memory_space<vmem>>, vector<1x1x32x32xf32>
    %38 = vector.shape_cast %37 : vector<1x1x32x32xf32> to vector<32x32xf32>
    %cst_49 = arith.constant dense<0.000000e+00> : vector<16x32xf32>
    %39 = tpu.matmul %4, %38, %cst_49 {dimension_numbers = #tpu.dot_dimension_numbers<[1], [0], [0], [1], [0, 0, 1, 1], [], []>} : vector<16x32xf32>, vector<32x32xf32>, vector<16x32xf32> -> vector<16x32xf32>
    %c1_50 = arith.constant 1 : index
    %c1_51 = arith.constant 1 : index
    %c0_52 = arith.constant 0 : index
    %c0_53 = arith.constant 0 : index
    %40 = vector.load %arg4[%c1_50, %c1_51, %c0_52, %c0_53] : memref<2x3x1x32xf32, #tpu.memory_space<vmem>>, vector<1x1x1x32xf32>
    %41 = vector.shape_cast %40 : vector<1x1x1x32xf32> to vector<1x32xf32>
    %42 = vector.broadcast %41 : vector<1x32xf32> to vector<16x32xf32>
    %43 = arith.addf %39, %42 : vector<16x32xf32>
    %c0_54 = arith.constant 0 : index
    %c0_55 = arith.constant 0 : index
    %44 = vector.load %arg14[%c0_54, %c0_55] : memref<16x32xf32, #tpu.memory_space<vmem>>, vector<16x32xf32>
    tpu.vector_store %arg14[%c0_54, %c0_55], %43 {strides = array<i32>} : memref<16x32xf32, #tpu.memory_space<vmem>>, vector<16x32xf32>,
    %c1_56 = arith.constant 1 : index
    %c2_57 = arith.constant 2 : index
    %c0_58 = arith.constant 0 : index
    %c0_59 = arith.constant 0 : index
    %45 = vector.load %arg3[%c1_56, %c2_57, %c0_58, %c0_59] : memref<2x3x32x32xf32, #tpu.memory_space<vmem>>, vector<1x1x32x32xf32>
    %46 = vector.shape_cast %45 : vector<1x1x32x32xf32> to vector<32x32xf32>
    %cst_60 = arith.constant dense<0.000000e+00> : vector<16x32xf32>
    %47 = tpu.matmul %4, %46, %cst_60 {dimension_numbers = #tpu.dot_dimension_numbers<[1], [0], [0], [1], [0, 0, 1, 1], [], []>} : vector<16x32xf32>, vector<32x32xf32>, vector<16x32xf32> -> vector<16x32xf32>
    %c1_61 = arith.constant 1 : index
    %c2_62 = arith.constant 2 : index
    %c0_63 = arith.constant 0 : index
    %c0_64 = arith.constant 0 : index
    %48 = vector.load %arg4[%c1_61, %c2_62, %c0_63, %c0_64] : memref<2x3x1x32xf32, #tpu.memory_space<vmem>>, vector<1x1x1x32xf32>
    %49 = vector.shape_cast %48 : vector<1x1x1x32xf32> to vector<1x32xf32>
    %50 = vector.broadcast %49 : vector<1x32xf32> to vector<16x32xf32>
    %51 = arith.addf %47, %50 : vector<16x32xf32>
    %c0_65 = arith.constant 0 : index
    %c0_66 = arith.constant 0 : index
    %52 = vector.load %arg15[%c0_65, %c0_66] : memref<16x32xf32, #tpu.memory_space<vmem>>, vector<16x32xf32>
    tpu.vector_store %arg15[%c0_65, %c0_66], %51 {strides = array<i32>} : memref<16x32xf32, #tpu.memory_space<vmem>>, vector<16x32xf32>,
    %c0_67 = arith.constant 0 : index
    %c0_68 = arith.constant 0 : index
    %c0_69 = arith.constant 0 : index
    %c0_70 = arith.constant 0 : index
    %53 = vector.load %arg5[%c0_67, %c0_68, %c0_69, %c0_70] : memref<2x3x32x32xf32, #tpu.memory_space<vmem>>, vector<1x1x32x32xf32>
    %54 = vector.shape_cast %53 : vector<1x1x32x32xf32> to vector<32x32xf32>
    %c0_71 = arith.constant 0 : index
    %c1_72 = arith.constant 1 : index
    %c0_73 = arith.constant 0 : index
    %c0_74 = arith.constant 0 : index
    %55 = vector.load %arg5[%c0_71, %c1_72, %c0_73, %c0_74] : memref<2x3x32x32xf32, #tpu.memory_space<vmem>>, vector<1x1x32x32xf32>
    %56 = vector.shape_cast %55 : vector<1x1x32x32xf32> to vector<32x32xf32>
    %c0_75 = arith.constant 0 : index
    %c2_76 = arith.constant 2 : index
    %c0_77 = arith.constant 0 : index
    %c0_78 = arith.constant 0 : index
    %57 = vector.load %arg5[%c0_75, %c2_76, %c0_77, %c0_78] : memref<2x3x32x32xf32, #tpu.memory_space<vmem>>, vector<1x1x32x32xf32>
    %58 = vector.shape_cast %57 : vector<1x1x32x32xf32> to vector<32x32xf32>
    %c1_79 = arith.constant 1 : index
    %c0_80 = arith.constant 0 : index
    %c0_81 = arith.constant 0 : index
    %c0_82 = arith.constant 0 : index
    %59 = vector.load %arg5[%c1_79, %c0_80, %c0_81, %c0_82] : memref<2x3x32x32xf32, #tpu.memory_space<vmem>>, vector<1x1x32x32xf32>
    %60 = vector.shape_cast %59 : vector<1x1x32x32xf32> to vector<32x32xf32>
    %c1_83 = arith.constant 1 : index
    %c1_84 = arith.constant 1 : index
    %c0_85 = arith.constant 0 : index
    %c0_86 = arith.constant 0 : index
    %61 = vector.load %arg5[%c1_83, %c1_84, %c0_85, %c0_86] : memref<2x3x32x32xf32, #tpu.memory_space<vmem>>, vector<1x1x32x32xf32>
    %62 = vector.shape_cast %61 : vector<1x1x32x32xf32> to vector<32x32xf32>
    %c1_87 = arith.constant 1 : index
    %c2_88 = arith.constant 2 : index
    %c0_89 = arith.constant 0 : index
    %c0_90 = arith.constant 0 : index
    %63 = vector.load %arg5[%c1_87, %c2_88, %c0_89, %c0_90] : memref<2x3x32x32xf32, #tpu.memory_space<vmem>>, vector<1x1x32x32xf32>
    %64 = vector.shape_cast %63 : vector<1x1x32x32xf32> to vector<32x32xf32>
    %c0_91 = arith.constant 0 : index
    %c0_92 = arith.constant 0 : index
    %c0_93 = arith.constant 0 : index
    %65 = vector.load %arg6[%c0_91, %c0_92, %c0_93] : memref<2x1x32xf32, #tpu.memory_space<vmem>>, vector<1x1x32xf32>
    %66 = vector.shape_cast %65 : vector<1x1x32xf32> to vector<1x32xf32>
    %67 = vector.shape_cast %66 : vector<1x32xf32> to vector<1x32xf32>
    %68 = vector.broadcast %67 : vector<1x32xf32> to vector<2x32xf32>
    %c1_94 = arith.constant 1 : index
    %c0_95 = arith.constant 0 : index
    %c0_96 = arith.constant 0 : index
    %69 = vector.load %arg6[%c1_94, %c0_95, %c0_96] : memref<2x1x32xf32, #tpu.memory_space<vmem>>, vector<1x1x32xf32>
    %70 = vector.shape_cast %69 : vector<1x1x32xf32> to vector<1x32xf32>
    %71 = vector.shape_cast %70 : vector<1x32xf32> to vector<1x32xf32>
    %72 = vector.broadcast %71 : vector<1x32xf32> to vector<2x32xf32>
    %c0_97 = arith.constant 0 : index
    %c0_98 = arith.constant 0 : index
    %c0_99 = arith.constant 0 : index
    %73 = vector.load %arg9[%c0_97, %c0_98, %c0_99] : memref<2x2x32xf32, #tpu.memory_space<vmem>>, vector<1x2x32xf32>
    %74 = vector.shape_cast %73 : vector<1x2x32xf32> to vector<2x32xf32>
    %c1_100 = arith.constant 1 : index
    %c0_101 = arith.constant 0 : index
    %c0_102 = arith.constant 0 : index
    %75 = vector.load %arg9[%c1_100, %c0_101, %c0_102] : memref<2x2x32xf32, #tpu.memory_space<vmem>>, vector<1x2x32xf32>
    %76 = vector.shape_cast %75 : vector<1x2x32xf32> to vector<2x32xf32>
    %c0_i32_103 = arith.constant 0 : i32
    %c2_i32 = arith.constant 2 : i32
    %77 = arith.muli %c0_i32_103, %c2_i32 : i32
    %78 = tpu.assume_multiple %77, 2 : i32
    %c7_i32 = arith.constant 7 : i32
    %79 = arith.subi %c7_i32, %c0_i32_103 : i32
    %c2_i32_104 = arith.constant 2 : i32
    %80 = arith.muli %79, %c2_i32_104 : i32
    %81 = tpu.assume_multiple %80, 2 : i32
    %cst_105 = arith.constant dense<0.000000e+00> : vector<2x32xf32>
    %82 = tpu.matmul %74, %54, %cst_105 {dimension_numbers = #tpu.dot_dimension_numbers<[1], [0], [0], [1], [0, 0, 1, 1], [], []>} : vector<2x32xf32>, vector<32x32xf32>, vector<2x32xf32> -> vector<2x32xf32>
    %cst_106 = arith.constant dense<0.000000e+00> : vector<2x32xf32>
    %83 = tpu.matmul %74, %56, %cst_106 {dimension_numbers = #tpu.dot_dimension_numbers<[1], [0], [0], [1], [0, 0, 1, 1], [], []>} : vector<2x32xf32>, vector<32x32xf32>, vector<2x32xf32> -> vector<2x32xf32>
    %cst_107 = arith.constant dense<0.000000e+00> : vector<2x32xf32>
    %84 = tpu.matmul %74, %58, %cst_107 {dimension_numbers = #tpu.dot_dimension_numbers<[1], [0], [0], [1], [0, 0, 1, 1], [], []>} : vector<2x32xf32>, vector<32x32xf32>, vector<2x32xf32> -> vector<2x32xf32>
    %cst_108 = arith.constant dense<0.000000e+00> : vector<2x32xf32>
    %85 = tpu.matmul %76, %60, %cst_108 {dimension_numbers = #tpu.dot_dimension_numbers<[1], [0], [0], [1], [0, 0, 1, 1], [], []>} : vector<2x32xf32>, vector<32x32xf32>, vector<2x32xf32> -> vector<2x32xf32>
    %cst_109 = arith.constant dense<0.000000e+00> : vector<2x32xf32>
    %86 = tpu.matmul %76, %62, %cst_109 {dimension_numbers = #tpu.dot_dimension_numbers<[1], [0], [0], [1], [0, 0, 1, 1], [], []>} : vector<2x32xf32>, vector<32x32xf32>, vector<2x32xf32> -> vector<2x32xf32>
    %cst_110 = arith.constant dense<0.000000e+00> : vector<2x32xf32>
    %87 = tpu.matmul %76, %64, %cst_110 {dimension_numbers = #tpu.dot_dimension_numbers<[1], [0], [0], [1], [0, 0, 1, 1], [], []>} : vector<2x32xf32>, vector<32x32xf32>, vector<2x32xf32> -> vector<2x32xf32>
    %88 = arith.index_cast %78 : i32 to index
    %c0_111 = arith.constant 0 : index
    %89 = vector.load %arg10[%88, %c0_111] : memref<16x32xf32, #tpu.memory_space<vmem>>, vector<2x32xf32>
    %90 = arith.addf %89, %82 : vector<2x32xf32>
    %91 = arith.negf %90 : vector<2x32xf32>
    %92 = math.exp %91 : vector<2x32xf32>
    %cst_112 = arith.constant 1.000000e+00 : f32
    %93 = vector.broadcast %cst_112 : f32 to vector<2x32xf32>
    %94 = arith.addf %93, %92 : vector<2x32xf32>
    %95 = arith.divf %93, %94 : vector<2x32xf32>
    %96 = arith.index_cast %78 : i32 to index
    %c0_113 = arith.constant 0 : index
    %97 = vector.load %arg11[%96, %c0_113] : memref<16x32xf32, #tpu.memory_space<vmem>>, vector<2x32xf32>
    %98 = arith.addf %97, %83 : vector<2x32xf32>
    %99 = arith.negf %98 : vector<2x32xf32>
    %100 = math.exp %99 : vector<2x32xf32>
    %cst_114 = arith.constant 1.000000e+00 : f32
    %101 = vector.broadcast %cst_114 : f32 to vector<2x32xf32>
    %102 = arith.addf %101, %100 : vector<2x32xf32>
    %103 = arith.divf %101, %102 : vector<2x32xf32>
    %104 = arith.index_cast %78 : i32 to index
    %c0_115 = arith.constant 0 : index
    %105 = vector.load %arg12[%104, %c0_115] : memref<16x32xf32, #tpu.memory_space<vmem>>, vector<2x32xf32>
    %106 = arith.addf %84, %68 : vector<2x32xf32>
    %107 = arith.mulf %95, %106 : vector<2x32xf32>
    %108 = arith.addf %105, %107 : vector<2x32xf32>
    %109 = math.tanh %108 : vector<2x32xf32>
    %cst_116 = arith.constant 1.000000e+00 : f32
    %110 = vector.broadcast %cst_116 : f32 to vector<2x32xf32>
    %111 = arith.subf %110, %103 : vector<2x32xf32>
    %112 = arith.mulf %111, %109 : vector<2x32xf32>
    %113 = arith.mulf %103, %74 : vector<2x32xf32>
    %114 = arith.addf %112, %113 : vector<2x32xf32>
    %115 = arith.index_cast %81 : i32 to index
    %c0_117 = arith.constant 0 : index
    %116 = vector.load %arg13[%115, %c0_117] : memref<16x32xf32, #tpu.memory_space<vmem>>, vector<2x32xf32>
    %117 = arith.addf %116, %85 : vector<2x32xf32>
    %118 = arith.negf %117 : vector<2x32xf32>
    %119 = math.exp %118 : vector<2x32xf32>
    %cst_118 = arith.constant 1.000000e+00 : f32
    %120 = vector.broadcast %cst_118 : f32 to vector<2x32xf32>
    %121 = arith.addf %120, %119 : vector<2x32xf32>
    %122 = arith.divf %120, %121 : vector<2x32xf32>
    %123 = arith.index_cast %81 : i32 to index
    %c0_119 = arith.constant 0 : index
    %124 = vector.load %arg14[%123, %c0_119] : memref<16x32xf32, #tpu.memory_space<vmem>>, vector<2x32xf32>
    %125 = arith.addf %124, %86 : vector<2x32xf32>
    %126 = arith.negf %125 : vector<2x32xf32>
    %127 = math.exp %126 : vector<2x32xf32>
    %cst_120 = arith.constant 1.000000e+00 : f32
    %128 = vector.broadcast %cst_120 : f32 to vector<2x32xf32>
    %129 = arith.addf %128, %127 : vector<2x32xf32>
    %130 = arith.divf %128, %129 : vector<2x32xf32>
    %131 = arith.index_cast %81 : i32 to index
    %c0_121 = arith.constant 0 : index
    %132 = vector.load %arg15[%131, %c0_121] : memref<16x32xf32, #tpu.memory_space<vmem>>, vector<2x32xf32>
    %133 = arith.addf %87, %72 : vector<2x32xf32>
    %134 = arith.mulf %122, %133 : vector<2x32xf32>
    %135 = arith.addf %132, %134 : vector<2x32xf32>
    %136 = math.tanh %135 : vector<2x32xf32>
    %cst_122 = arith.constant 1.000000e+00 : f32
    %137 = vector.broadcast %cst_122 : f32 to vector<2x32xf32>
    %138 = arith.subf %137, %130 : vector<2x32xf32>
    %139 = arith.mulf %138, %136 : vector<2x32xf32>
    %140 = arith.mulf %130, %76 : vector<2x32xf32>
    %141 = arith.addf %139, %140 : vector<2x32xf32>
    %142 = arith.index_cast %78 : i32 to index
    %c0_123 = arith.constant 0 : index
    %143 = vector.load %arg7[%142, %c0_123] : memref<16x32xf32, #tpu.memory_space<vmem>>, vector<2x32xf32>
    tpu.vector_store %arg7[%142, %c0_123], %114 {strides = array<i32>} : memref<16x32xf32, #tpu.memory_space<vmem>>, vector<2x32xf32>,
    %144 = arith.index_cast %81 : i32 to index
    %c0_124 = arith.constant 0 : index
    %145 = vector.load %arg8[%144, %c0_124] : memref<16x32xf32, #tpu.memory_space<vmem>>, vector<2x32xf32>
    tpu.vector_store %arg8[%144, %c0_124], %141 {strides = array<i32>} : memref<16x32xf32, #tpu.memory_space<vmem>>, vector<2x32xf32>,
    %c1_i32 = arith.constant 1 : i32
    %c2_i32_125 = arith.constant 2 : i32
    %146 = arith.muli %c1_i32, %c2_i32_125 : i32
    %147 = tpu.assume_multiple %146, 2 : i32
    %c7_i32_126 = arith.constant 7 : i32
    %148 = arith.subi %c7_i32_126, %c1_i32 : i32
    %c2_i32_127 = arith.constant 2 : i32
    %149 = arith.muli %148, %c2_i32_127 : i32
    %150 = tpu.assume_multiple %149, 2 : i32
    %cst_128 = arith.constant dense<0.000000e+00> : vector<2x32xf32>
    %151 = tpu.matmul %114, %54, %cst_128 {dimension_numbers = #tpu.dot_dimension_numbers<[1], [0], [0], [1], [0, 0, 1, 1], [], []>} : vector<2x32xf32>, vector<32x32xf32>, vector<2x32xf32> -> vector<2x32xf32>
    %cst_129 = arith.constant dense<0.000000e+00> : vector<2x32xf32>
    %152 = tpu.matmul %114, %56, %cst_129 {dimension_numbers = #tpu.dot_dimension_numbers<[1], [0], [0], [1], [0, 0, 1, 1], [], []>} : vector<2x32xf32>, vector<32x32xf32>, vector<2x32xf32> -> vector<2x32xf32>
    %cst_130 = arith.constant dense<0.000000e+00> : vector<2x32xf32>
    %153 = tpu.matmul %114, %58, %cst_130 {dimension_numbers = #tpu.dot_dimension_numbers<[1], [0], [0], [1], [0, 0, 1, 1], [], []>} : vector<2x32xf32>, vector<32x32xf32>, vector<2x32xf32> -> vector<2x32xf32>
    %cst_131 = arith.constant dense<0.000000e+00> : vector<2x32xf32>
    %154 = tpu.matmul %141, %60, %cst_131 {dimension_numbers = #tpu.dot_dimension_numbers<[1], [0], [0], [1], [0, 0, 1, 1], [], []>} : vector<2x32xf32>, vector<32x32xf32>, vector<2x32xf32> -> vector<2x32xf32>
    %cst_132 = arith.constant dense<0.000000e+00> : vector<2x32xf32>
    %155 = tpu.matmul %141, %62, %cst_132 {dimension_numbers = #tpu.dot_dimension_numbers<[1], [0], [0], [1], [0, 0, 1, 1], [], []>} : vector<2x32xf32>, vector<32x32xf32>, vector<2x32xf32> -> vector<2x32xf32>
    %cst_133 = arith.constant dense<0.000000e+00> : vector<2x32xf32>
    %156 = tpu.matmul %141, %64, %cst_133 {dimension_numbers = #tpu.dot_dimension_numbers<[1], [0], [0], [1], [0, 0, 1, 1], [], []>} : vector<2x32xf32>, vector<32x32xf32>, vector<2x32xf32> -> vector<2x32xf32>
    %157 = arith.index_cast %147 : i32 to index
    %c0_134 = arith.constant 0 : index
    %158 = vector.load %arg10[%157, %c0_134] : memref<16x32xf32, #tpu.memory_space<vmem>>, vector<2x32xf32>
    %159 = arith.addf %158, %151 : vector<2x32xf32>
    %160 = arith.negf %159 : vector<2x32xf32>
    %161 = math.exp %160 : vector<2x32xf32>
    %cst_135 = arith.constant 1.000000e+00 : f32
    %162 = vector.broadcast %cst_135 : f32 to vector<2x32xf32>
    %163 = arith.addf %162, %161 : vector<2x32xf32>
    %164 = arith.divf %162, %163 : vector<2x32xf32>
    %165 = arith.index_cast %147 : i32 to index
    %c0_136 = arith.constant 0 : index
    %166 = vector.load %arg11[%165, %c0_136] : memref<16x32xf32, #tpu.memory_space<vmem>>, vector<2x32xf32>
    %167 = arith.addf %166, %152 : vector<2x32xf32>
    %168 = arith.negf %167 : vector<2x32xf32>
    %169 = math.exp %168 : vector<2x32xf32>
    %cst_137 = arith.constant 1.000000e+00 : f32
    %170 = vector.broadcast %cst_137 : f32 to vector<2x32xf32>
    %171 = arith.addf %170, %169 : vector<2x32xf32>
    %172 = arith.divf %170, %171 : vector<2x32xf32>
    %173 = arith.index_cast %147 : i32 to index
    %c0_138 = arith.constant 0 : index
    %174 = vector.load %arg12[%173, %c0_138] : memref<16x32xf32, #tpu.memory_space<vmem>>, vector<2x32xf32>
    %175 = arith.addf %153, %68 : vector<2x32xf32>
    %176 = arith.mulf %164, %175 : vector<2x32xf32>
    %177 = arith.addf %174, %176 : vector<2x32xf32>
    %178 = math.tanh %177 : vector<2x32xf32>
    %cst_139 = arith.constant 1.000000e+00 : f32
    %179 = vector.broadcast %cst_139 : f32 to vector<2x32xf32>
    %180 = arith.subf %179, %172 : vector<2x32xf32>
    %181 = arith.mulf %180, %178 : vector<2x32xf32>
    %182 = arith.mulf %172, %114 : vector<2x32xf32>
    %183 = arith.addf %181, %182 : vector<2x32xf32>
    %184 = arith.index_cast %150 : i32 to index
    %c0_140 = arith.constant 0 : index
    %185 = vector.load %arg13[%184, %c0_140] : memref<16x32xf32, #tpu.memory_space<vmem>>, vector<2x32xf32>
    %186 = arith.addf %185, %154 : vector<2x32xf32>
    %187 = arith.negf %186 : vector<2x32xf32>
    %188 = math.exp %187 : vector<2x32xf32>
    %cst_141 = arith.constant 1.000000e+00 : f32
    %189 = vector.broadcast %cst_141 : f32 to vector<2x32xf32>
    %190 = arith.addf %189, %188 : vector<2x32xf32>
    %191 = arith.divf %189, %190 : vector<2x32xf32>
    %192 = arith.index_cast %150 : i32 to index
    %c0_142 = arith.constant 0 : index
    %193 = vector.load %arg14[%192, %c0_142] : memref<16x32xf32, #tpu.memory_space<vmem>>, vector<2x32xf32>
    %194 = arith.addf %193, %155 : vector<2x32xf32>
    %195 = arith.negf %194 : vector<2x32xf32>
    %196 = math.exp %195 : vector<2x32xf32>
    %cst_143 = arith.constant 1.000000e+00 : f32
    %197 = vector.broadcast %cst_143 : f32 to vector<2x32xf32>
    %198 = arith.addf %197, %196 : vector<2x32xf32>
    %199 = arith.divf %197, %198 : vector<2x32xf32>
    %200 = arith.index_cast %150 : i32 to index
    %c0_144 = arith.constant 0 : index
    %201 = vector.load %arg15[%200, %c0_144] : memref<16x32xf32, #tpu.memory_space<vmem>>, vector<2x32xf32>
    %202 = arith.addf %156, %72 : vector<2x32xf32>
    %203 = arith.mulf %191, %202 : vector<2x32xf32>
    %204 = arith.addf %201, %203 : vector<2x32xf32>
    %205 = math.tanh %204 : vector<2x32xf32>
    %cst_145 = arith.constant 1.000000e+00 : f32
    %206 = vector.broadcast %cst_145 : f32 to vector<2x32xf32>
    %207 = arith.subf %206, %199 : vector<2x32xf32>
    %208 = arith.mulf %207, %205 : vector<2x32xf32>
    %209 = arith.mulf %199, %141 : vector<2x32xf32>
    %210 = arith.addf %208, %209 : vector<2x32xf32>
    %211 = arith.index_cast %147 : i32 to index
    %c0_146 = arith.constant 0 : index
    %212 = vector.load %arg7[%211, %c0_146] : memref<16x32xf32, #tpu.memory_space<vmem>>, vector<2x32xf32>
    tpu.vector_store %arg7[%211, %c0_146], %183 {strides = array<i32>} : memref<16x32xf32, #tpu.memory_space<vmem>>, vector<2x32xf32>,
    %213 = arith.index_cast %150 : i32 to index
    %c0_147 = arith.constant 0 : index
    %214 = vector.load %arg8[%213, %c0_147] : memref<16x32xf32, #tpu.memory_space<vmem>>, vector<2x32xf32>
    tpu.vector_store %arg8[%213, %c0_147], %210 {strides = array<i32>} : memref<16x32xf32, #tpu.memory_space<vmem>>, vector<2x32xf32>,
    %c2_i32_148 = arith.constant 2 : i32
    %c2_i32_149 = arith.constant 2 : i32
    %215 = arith.muli %c2_i32_148, %c2_i32_149 : i32
    %216 = tpu.assume_multiple %215, 2 : i32
    %c7_i32_150 = arith.constant 7 : i32
    %217 = arith.subi %c7_i32_150, %c2_i32_148 : i32
    %c2_i32_151 = arith.constant 2 : i32
    %218 = arith.muli %217, %c2_i32_151 : i32
    %219 = tpu.assume_multiple %218, 2 : i32
    %cst_152 = arith.constant dense<0.000000e+00> : vector<2x32xf32>
    %220 = tpu.matmul %183, %54, %cst_152 {dimension_numbers = #tpu.dot_dimension_numbers<[1], [0], [0], [1], [0, 0, 1, 1], [], []>} : vector<2x32xf32>, vector<32x32xf32>, vector<2x32xf32> -> vector<2x32xf32>
    %cst_153 = arith.constant dense<0.000000e+00> : vector<2x32xf32>
    %221 = tpu.matmul %183, %56, %cst_153 {dimension_numbers = #tpu.dot_dimension_numbers<[1], [0], [0], [1], [0, 0, 1, 1], [], []>} : vector<2x32xf32>, vector<32x32xf32>, vector<2x32xf32> -> vector<2x32xf32>
    %cst_154 = arith.constant dense<0.000000e+00> : vector<2x32xf32>
    %222 = tpu.matmul %183, %58, %cst_154 {dimension_numbers = #tpu.dot_dimension_numbers<[1], [0], [0], [1], [0, 0, 1, 1], [], []>} : vector<2x32xf32>, vector<32x32xf32>, vector<2x32xf32> -> vector<2x32xf32>
    %cst_155 = arith.constant dense<0.000000e+00> : vector<2x32xf32>
    %223 = tpu.matmul %210, %60, %cst_155 {dimension_numbers = #tpu.dot_dimension_numbers<[1], [0], [0], [1], [0, 0, 1, 1], [], []>} : vector<2x32xf32>, vector<32x32xf32>, vector<2x32xf32> -> vector<2x32xf32>
    %cst_156 = arith.constant dense<0.000000e+00> : vector<2x32xf32>
    %224 = tpu.matmul %210, %62, %cst_156 {dimension_numbers = #tpu.dot_dimension_numbers<[1], [0], [0], [1], [0, 0, 1, 1], [], []>} : vector<2x32xf32>, vector<32x32xf32>, vector<2x32xf32> -> vector<2x32xf32>
    %cst_157 = arith.constant dense<0.000000e+00> : vector<2x32xf32>
    %225 = tpu.matmul %210, %64, %cst_157 {dimension_numbers = #tpu.dot_dimension_numbers<[1], [0], [0], [1], [0, 0, 1, 1], [], []>} : vector<2x32xf32>, vector<32x32xf32>, vector<2x32xf32> -> vector<2x32xf32>
    %226 = arith.index_cast %216 : i32 to index
    %c0_158 = arith.constant 0 : index
    %227 = vector.load %arg10[%226, %c0_158] : memref<16x32xf32, #tpu.memory_space<vmem>>, vector<2x32xf32>
    %228 = arith.addf %227, %220 : vector<2x32xf32>
    %229 = arith.negf %228 : vector<2x32xf32>
    %230 = math.exp %229 : vector<2x32xf32>
    %cst_159 = arith.constant 1.000000e+00 : f32
    %231 = vector.broadcast %cst_159 : f32 to vector<2x32xf32>
    %232 = arith.addf %231, %230 : vector<2x32xf32>
    %233 = arith.divf %231, %232 : vector<2x32xf32>
    %234 = arith.index_cast %216 : i32 to index
    %c0_160 = arith.constant 0 : index
    %235 = vector.load %arg11[%234, %c0_160] : memref<16x32xf32, #tpu.memory_space<vmem>>, vector<2x32xf32>
    %236 = arith.addf %235, %221 : vector<2x32xf32>
    %237 = arith.negf %236 : vector<2x32xf32>
    %238 = math.exp %237 : vector<2x32xf32>
    %cst_161 = arith.constant 1.000000e+00 : f32
    %239 = vector.broadcast %cst_161 : f32 to vector<2x32xf32>
    %240 = arith.addf %239, %238 : vector<2x32xf32>
    %241 = arith.divf %239, %240 : vector<2x32xf32>
    %242 = arith.index_cast %216 : i32 to index
    %c0_162 = arith.constant 0 : index
    %243 = vector.load %arg12[%242, %c0_162] : memref<16x32xf32, #tpu.memory_space<vmem>>, vector<2x32xf32>
    %244 = arith.addf %222, %68 : vector<2x32xf32>
    %245 = arith.mulf %233, %244 : vector<2x32xf32>
    %246 = arith.addf %243, %245 : vector<2x32xf32>
    %247 = math.tanh %246 : vector<2x32xf32>
    %cst_163 = arith.constant 1.000000e+00 : f32
    %248 = vector.broadcast %cst_163 : f32 to vector<2x32xf32>
    %249 = arith.subf %248, %241 : vector<2x32xf32>
    %250 = arith.mulf %249, %247 : vector<2x32xf32>
    %251 = arith.mulf %241, %183 : vector<2x32xf32>
    %252 = arith.addf %250, %251 : vector<2x32xf32>
    %253 = arith.index_cast %219 : i32 to index
    %c0_164 = arith.constant 0 : index
    %254 = vector.load %arg13[%253, %c0_164] : memref<16x32xf32, #tpu.memory_space<vmem>>, vector<2x32xf32>
    %255 = arith.addf %254, %223 : vector<2x32xf32>
    %256 = arith.negf %255 : vector<2x32xf32>
    %257 = math.exp %256 : vector<2x32xf32>
    %cst_165 = arith.constant 1.000000e+00 : f32
    %258 = vector.broadcast %cst_165 : f32 to vector<2x32xf32>
    %259 = arith.addf %258, %257 : vector<2x32xf32>
    %260 = arith.divf %258, %259 : vector<2x32xf32>
    %261 = arith.index_cast %219 : i32 to index
    %c0_166 = arith.constant 0 : index
    %262 = vector.load %arg14[%261, %c0_166] : memref<16x32xf32, #tpu.memory_space<vmem>>, vector<2x32xf32>
    %263 = arith.addf %262, %224 : vector<2x32xf32>
    %264 = arith.negf %263 : vector<2x32xf32>
    %265 = math.exp %264 : vector<2x32xf32>
    %cst_167 = arith.constant 1.000000e+00 : f32
    %266 = vector.broadcast %cst_167 : f32 to vector<2x32xf32>
    %267 = arith.addf %266, %265 : vector<2x32xf32>
    %268 = arith.divf %266, %267 : vector<2x32xf32>
    %269 = arith.index_cast %219 : i32 to index
    %c0_168 = arith.constant 0 : index
    %270 = vector.load %arg15[%269, %c0_168] : memref<16x32xf32, #tpu.memory_space<vmem>>, vector<2x32xf32>
    %271 = arith.addf %225, %72 : vector<2x32xf32>
    %272 = arith.mulf %260, %271 : vector<2x32xf32>
    %273 = arith.addf %270, %272 : vector<2x32xf32>
    %274 = math.tanh %273 : vector<2x32xf32>
    %cst_169 = arith.constant 1.000000e+00 : f32
    %275 = vector.broadcast %cst_169 : f32 to vector<2x32xf32>
    %276 = arith.subf %275, %268 : vector<2x32xf32>
    %277 = arith.mulf %276, %274 : vector<2x32xf32>
    %278 = arith.mulf %268, %210 : vector<2x32xf32>
    %279 = arith.addf %277, %278 : vector<2x32xf32>
    %280 = arith.index_cast %216 : i32 to index
    %c0_170 = arith.constant 0 : index
    %281 = vector.load %arg7[%280, %c0_170] : memref<16x32xf32, #tpu.memory_space<vmem>>, vector<2x32xf32>
    tpu.vector_store %arg7[%280, %c0_170], %252 {strides = array<i32>} : memref<16x32xf32, #tpu.memory_space<vmem>>, vector<2x32xf32>,
    %282 = arith.index_cast %219 : i32 to index
    %c0_171 = arith.constant 0 : index
    %283 = vector.load %arg8[%282, %c0_171] : memref<16x32xf32, #tpu.memory_space<vmem>>, vector<2x32xf32>
    tpu.vector_store %arg8[%282, %c0_171], %279 {strides = array<i32>} : memref<16x32xf32, #tpu.memory_space<vmem>>, vector<2x32xf32>,
    %c3_i32 = arith.constant 3 : i32
    %c2_i32_172 = arith.constant 2 : i32
    %284 = arith.muli %c3_i32, %c2_i32_172 : i32
    %285 = tpu.assume_multiple %284, 2 : i32
    %c7_i32_173 = arith.constant 7 : i32
    %286 = arith.subi %c7_i32_173, %c3_i32 : i32
    %c2_i32_174 = arith.constant 2 : i32
    %287 = arith.muli %286, %c2_i32_174 : i32
    %288 = tpu.assume_multiple %287, 2 : i32
    %cst_175 = arith.constant dense<0.000000e+00> : vector<2x32xf32>
    %289 = tpu.matmul %252, %54, %cst_175 {dimension_numbers = #tpu.dot_dimension_numbers<[1], [0], [0], [1], [0, 0, 1, 1], [], []>} : vector<2x32xf32>, vector<32x32xf32>, vector<2x32xf32> -> vector<2x32xf32>
    %cst_176 = arith.constant dense<0.000000e+00> : vector<2x32xf32>
    %290 = tpu.matmul %252, %56, %cst_176 {dimension_numbers = #tpu.dot_dimension_numbers<[1], [0], [0], [1], [0, 0, 1, 1], [], []>} : vector<2x32xf32>, vector<32x32xf32>, vector<2x32xf32> -> vector<2x32xf32>
    %cst_177 = arith.constant dense<0.000000e+00> : vector<2x32xf32>
    %291 = tpu.matmul %252, %58, %cst_177 {dimension_numbers = #tpu.dot_dimension_numbers<[1], [0], [0], [1], [0, 0, 1, 1], [], []>} : vector<2x32xf32>, vector<32x32xf32>, vector<2x32xf32> -> vector<2x32xf32>
    %cst_178 = arith.constant dense<0.000000e+00> : vector<2x32xf32>
    %292 = tpu.matmul %279, %60, %cst_178 {dimension_numbers = #tpu.dot_dimension_numbers<[1], [0], [0], [1], [0, 0, 1, 1], [], []>} : vector<2x32xf32>, vector<32x32xf32>, vector<2x32xf32> -> vector<2x32xf32>
    %cst_179 = arith.constant dense<0.000000e+00> : vector<2x32xf32>
    %293 = tpu.matmul %279, %62, %cst_179 {dimension_numbers = #tpu.dot_dimension_numbers<[1], [0], [0], [1], [0, 0, 1, 1], [], []>} : vector<2x32xf32>, vector<32x32xf32>, vector<2x32xf32> -> vector<2x32xf32>
    %cst_180 = arith.constant dense<0.000000e+00> : vector<2x32xf32>
    %294 = tpu.matmul %279, %64, %cst_180 {dimension_numbers = #tpu.dot_dimension_numbers<[1], [0], [0], [1], [0, 0, 1, 1], [], []>} : vector<2x32xf32>, vector<32x32xf32>, vector<2x32xf32> -> vector<2x32xf32>
    %295 = arith.index_cast %285 : i32 to index
    %c0_181 = arith.constant 0 : index
    %296 = vector.load %arg10[%295, %c0_181] : memref<16x32xf32, #tpu.memory_space<vmem>>, vector<2x32xf32>
    %297 = arith.addf %296, %289 : vector<2x32xf32>
    %298 = arith.negf %297 : vector<2x32xf32>
    %299 = math.exp %298 : vector<2x32xf32>
    %cst_182 = arith.constant 1.000000e+00 : f32
    %300 = vector.broadcast %cst_182 : f32 to vector<2x32xf32>
    %301 = arith.addf %300, %299 : vector<2x32xf32>
    %302 = arith.divf %300, %301 : vector<2x32xf32>
    %303 = arith.index_cast %285 : i32 to index
    %c0_183 = arith.constant 0 : index
    %304 = vector.load %arg11[%303, %c0_183] : memref<16x32xf32, #tpu.memory_space<vmem>>, vector<2x32xf32>
    %305 = arith.addf %304, %290 : vector<2x32xf32>
    %306 = arith.negf %305 : vector<2x32xf32>
    %307 = math.exp %306 : vector<2x32xf32>
    %cst_184 = arith.constant 1.000000e+00 : f32
    %308 = vector.broadcast %cst_184 : f32 to vector<2x32xf32>
    %309 = arith.addf %308, %307 : vector<2x32xf32>
    %310 = arith.divf %308, %309 : vector<2x32xf32>
    %311 = arith.index_cast %285 : i32 to index
    %c0_185 = arith.constant 0 : index
    %312 = vector.load %arg12[%311, %c0_185] : memref<16x32xf32, #tpu.memory_space<vmem>>, vector<2x32xf32>
    %313 = arith.addf %291, %68 : vector<2x32xf32>
    %314 = arith.mulf %302, %313 : vector<2x32xf32>
    %315 = arith.addf %312, %314 : vector<2x32xf32>
    %316 = math.tanh %315 : vector<2x32xf32>
    %cst_186 = arith.constant 1.000000e+00 : f32
    %317 = vector.broadcast %cst_186 : f32 to vector<2x32xf32>
    %318 = arith.subf %317, %310 : vector<2x32xf32>
    %319 = arith.mulf %318, %316 : vector<2x32xf32>
    %320 = arith.mulf %310, %252 : vector<2x32xf32>
    %321 = arith.addf %319, %320 : vector<2x32xf32>
    %322 = arith.index_cast %288 : i32 to index
    %c0_187 = arith.constant 0 : index
    %323 = vector.load %arg13[%322, %c0_187] : memref<16x32xf32, #tpu.memory_space<vmem>>, vector<2x32xf32>
    %324 = arith.addf %323, %292 : vector<2x32xf32>
    %325 = arith.negf %324 : vector<2x32xf32>
    %326 = math.exp %325 : vector<2x32xf32>
    %cst_188 = arith.constant 1.000000e+00 : f32
    %327 = vector.broadcast %cst_188 : f32 to vector<2x32xf32>
    %328 = arith.addf %327, %326 : vector<2x32xf32>
    %329 = arith.divf %327, %328 : vector<2x32xf32>
    %330 = arith.index_cast %288 : i32 to index
    %c0_189 = arith.constant 0 : index
    %331 = vector.load %arg14[%330, %c0_189] : memref<16x32xf32, #tpu.memory_space<vmem>>, vector<2x32xf32>
    %332 = arith.addf %331, %293 : vector<2x32xf32>
    %333 = arith.negf %332 : vector<2x32xf32>
    %334 = math.exp %333 : vector<2x32xf32>
    %cst_190 = arith.constant 1.000000e+00 : f32
    %335 = vector.broadcast %cst_190 : f32 to vector<2x32xf32>
    %336 = arith.addf %335, %334 : vector<2x32xf32>
    %337 = arith.divf %335, %336 : vector<2x32xf32>
    %338 = arith.index_cast %288 : i32 to index
    %c0_191 = arith.constant 0 : index
    %339 = vector.load %arg15[%338, %c0_191] : memref<16x32xf32, #tpu.memory_space<vmem>>, vector<2x32xf32>
    %340 = arith.addf %294, %72 : vector<2x32xf32>
    %341 = arith.mulf %329, %340 : vector<2x32xf32>
    %342 = arith.addf %339, %341 : vector<2x32xf32>
    %343 = math.tanh %342 : vector<2x32xf32>
    %cst_192 = arith.constant 1.000000e+00 : f32
    %344 = vector.broadcast %cst_192 : f32 to vector<2x32xf32>
    %345 = arith.subf %344, %337 : vector<2x32xf32>
    %346 = arith.mulf %345, %343 : vector<2x32xf32>
    %347 = arith.mulf %337, %279 : vector<2x32xf32>
    %348 = arith.addf %346, %347 : vector<2x32xf32>
    %349 = arith.index_cast %285 : i32 to index
    %c0_193 = arith.constant 0 : index
    %350 = vector.load %arg7[%349, %c0_193] : memref<16x32xf32, #tpu.memory_space<vmem>>, vector<2x32xf32>
    tpu.vector_store %arg7[%349, %c0_193], %321 {strides = array<i32>} : memref<16x32xf32, #tpu.memory_space<vmem>>, vector<2x32xf32>,
    %351 = arith.index_cast %288 : i32 to index
    %c0_194 = arith.constant 0 : index
    %352 = vector.load %arg8[%351, %c0_194] : memref<16x32xf32, #tpu.memory_space<vmem>>, vector<2x32xf32>
    tpu.vector_store %arg8[%351, %c0_194], %348 {strides = array<i32>} : memref<16x32xf32, #tpu.memory_space<vmem>>, vector<2x32xf32>,
    %c4_i32 = arith.constant 4 : i32
    %c2_i32_195 = arith.constant 2 : i32
    %353 = arith.muli %c4_i32, %c2_i32_195 : i32
    %354 = tpu.assume_multiple %353, 2 : i32
    %c7_i32_196 = arith.constant 7 : i32
    %355 = arith.subi %c7_i32_196, %c4_i32 : i32
    %c2_i32_197 = arith.constant 2 : i32
    %356 = arith.muli %355, %c2_i32_197 : i32
    %357 = tpu.assume_multiple %356, 2 : i32
    %cst_198 = arith.constant dense<0.000000e+00> : vector<2x32xf32>
    %358 = tpu.matmul %321, %54, %cst_198 {dimension_numbers = #tpu.dot_dimension_numbers<[1], [0], [0], [1], [0, 0, 1, 1], [], []>} : vector<2x32xf32>, vector<32x32xf32>, vector<2x32xf32> -> vector<2x32xf32>
    %cst_199 = arith.constant dense<0.000000e+00> : vector<2x32xf32>
    %359 = tpu.matmul %321, %56, %cst_199 {dimension_numbers = #tpu.dot_dimension_numbers<[1], [0], [0], [1], [0, 0, 1, 1], [], []>} : vector<2x32xf32>, vector<32x32xf32>, vector<2x32xf32> -> vector<2x32xf32>
    %cst_200 = arith.constant dense<0.000000e+00> : vector<2x32xf32>
    %360 = tpu.matmul %321, %58, %cst_200 {dimension_numbers = #tpu.dot_dimension_numbers<[1], [0], [0], [1], [0, 0, 1, 1], [], []>} : vector<2x32xf32>, vector<32x32xf32>, vector<2x32xf32> -> vector<2x32xf32>
    %cst_201 = arith.constant dense<0.000000e+00> : vector<2x32xf32>
    %361 = tpu.matmul %348, %60, %cst_201 {dimension_numbers = #tpu.dot_dimension_numbers<[1], [0], [0], [1], [0, 0, 1, 1], [], []>} : vector<2x32xf32>, vector<32x32xf32>, vector<2x32xf32> -> vector<2x32xf32>
    %cst_202 = arith.constant dense<0.000000e+00> : vector<2x32xf32>
    %362 = tpu.matmul %348, %62, %cst_202 {dimension_numbers = #tpu.dot_dimension_numbers<[1], [0], [0], [1], [0, 0, 1, 1], [], []>} : vector<2x32xf32>, vector<32x32xf32>, vector<2x32xf32> -> vector<2x32xf32>
    %cst_203 = arith.constant dense<0.000000e+00> : vector<2x32xf32>
    %363 = tpu.matmul %348, %64, %cst_203 {dimension_numbers = #tpu.dot_dimension_numbers<[1], [0], [0], [1], [0, 0, 1, 1], [], []>} : vector<2x32xf32>, vector<32x32xf32>, vector<2x32xf32> -> vector<2x32xf32>
    %364 = arith.index_cast %354 : i32 to index
    %c0_204 = arith.constant 0 : index
    %365 = vector.load %arg10[%364, %c0_204] : memref<16x32xf32, #tpu.memory_space<vmem>>, vector<2x32xf32>
    %366 = arith.addf %365, %358 : vector<2x32xf32>
    %367 = arith.negf %366 : vector<2x32xf32>
    %368 = math.exp %367 : vector<2x32xf32>
    %cst_205 = arith.constant 1.000000e+00 : f32
    %369 = vector.broadcast %cst_205 : f32 to vector<2x32xf32>
    %370 = arith.addf %369, %368 : vector<2x32xf32>
    %371 = arith.divf %369, %370 : vector<2x32xf32>
    %372 = arith.index_cast %354 : i32 to index
    %c0_206 = arith.constant 0 : index
    %373 = vector.load %arg11[%372, %c0_206] : memref<16x32xf32, #tpu.memory_space<vmem>>, vector<2x32xf32>
    %374 = arith.addf %373, %359 : vector<2x32xf32>
    %375 = arith.negf %374 : vector<2x32xf32>
    %376 = math.exp %375 : vector<2x32xf32>
    %cst_207 = arith.constant 1.000000e+00 : f32
    %377 = vector.broadcast %cst_207 : f32 to vector<2x32xf32>
    %378 = arith.addf %377, %376 : vector<2x32xf32>
    %379 = arith.divf %377, %378 : vector<2x32xf32>
    %380 = arith.index_cast %354 : i32 to index
    %c0_208 = arith.constant 0 : index
    %381 = vector.load %arg12[%380, %c0_208] : memref<16x32xf32, #tpu.memory_space<vmem>>, vector<2x32xf32>
    %382 = arith.addf %360, %68 : vector<2x32xf32>
    %383 = arith.mulf %371, %382 : vector<2x32xf32>
    %384 = arith.addf %381, %383 : vector<2x32xf32>
    %385 = math.tanh %384 : vector<2x32xf32>
    %cst_209 = arith.constant 1.000000e+00 : f32
    %386 = vector.broadcast %cst_209 : f32 to vector<2x32xf32>
    %387 = arith.subf %386, %379 : vector<2x32xf32>
    %388 = arith.mulf %387, %385 : vector<2x32xf32>
    %389 = arith.mulf %379, %321 : vector<2x32xf32>
    %390 = arith.addf %388, %389 : vector<2x32xf32>
    %391 = arith.index_cast %357 : i32 to index
    %c0_210 = arith.constant 0 : index
    %392 = vector.load %arg13[%391, %c0_210] : memref<16x32xf32, #tpu.memory_space<vmem>>, vector<2x32xf32>
    %393 = arith.addf %392, %361 : vector<2x32xf32>
    %394 = arith.negf %393 : vector<2x32xf32>
    %395 = math.exp %394 : vector<2x32xf32>
    %cst_211 = arith.constant 1.000000e+00 : f32
    %396 = vector.broadcast %cst_211 : f32 to vector<2x32xf32>
    %397 = arith.addf %396, %395 : vector<2x32xf32>
    %398 = arith.divf %396, %397 : vector<2x32xf32>
    %399 = arith.index_cast %357 : i32 to index
    %c0_212 = arith.constant 0 : index
    %400 = vector.load %arg14[%399, %c0_212] : memref<16x32xf32, #tpu.memory_space<vmem>>, vector<2x32xf32>
    %401 = arith.addf %400, %362 : vector<2x32xf32>
    %402 = arith.negf %401 : vector<2x32xf32>
    %403 = math.exp %402 : vector<2x32xf32>
    %cst_213 = arith.constant 1.000000e+00 : f32
    %404 = vector.broadcast %cst_213 : f32 to vector<2x32xf32>
    %405 = arith.addf %404, %403 : vector<2x32xf32>
    %406 = arith.divf %404, %405 : vector<2x32xf32>
    %407 = arith.index_cast %357 : i32 to index
    %c0_214 = arith.constant 0 : index
    %408 = vector.load %arg15[%407, %c0_214] : memref<16x32xf32, #tpu.memory_space<vmem>>, vector<2x32xf32>
    %409 = arith.addf %363, %72 : vector<2x32xf32>
    %410 = arith.mulf %398, %409 : vector<2x32xf32>
    %411 = arith.addf %408, %410 : vector<2x32xf32>
    %412 = math.tanh %411 : vector<2x32xf32>
    %cst_215 = arith.constant 1.000000e+00 : f32
    %413 = vector.broadcast %cst_215 : f32 to vector<2x32xf32>
    %414 = arith.subf %413, %406 : vector<2x32xf32>
    %415 = arith.mulf %414, %412 : vector<2x32xf32>
    %416 = arith.mulf %406, %348 : vector<2x32xf32>
    %417 = arith.addf %415, %416 : vector<2x32xf32>
    %418 = arith.index_cast %354 : i32 to index
    %c0_216 = arith.constant 0 : index
    %419 = vector.load %arg7[%418, %c0_216] : memref<16x32xf32, #tpu.memory_space<vmem>>, vector<2x32xf32>
    tpu.vector_store %arg7[%418, %c0_216], %390 {strides = array<i32>} : memref<16x32xf32, #tpu.memory_space<vmem>>, vector<2x32xf32>,
    %420 = arith.index_cast %357 : i32 to index
    %c0_217 = arith.constant 0 : index
    %421 = vector.load %arg8[%420, %c0_217] : memref<16x32xf32, #tpu.memory_space<vmem>>, vector<2x32xf32>
    tpu.vector_store %arg8[%420, %c0_217], %417 {strides = array<i32>} : memref<16x32xf32, #tpu.memory_space<vmem>>, vector<2x32xf32>,
    %c5_i32 = arith.constant 5 : i32
    %c2_i32_218 = arith.constant 2 : i32
    %422 = arith.muli %c5_i32, %c2_i32_218 : i32
    %423 = tpu.assume_multiple %422, 2 : i32
    %c7_i32_219 = arith.constant 7 : i32
    %424 = arith.subi %c7_i32_219, %c5_i32 : i32
    %c2_i32_220 = arith.constant 2 : i32
    %425 = arith.muli %424, %c2_i32_220 : i32
    %426 = tpu.assume_multiple %425, 2 : i32
    %cst_221 = arith.constant dense<0.000000e+00> : vector<2x32xf32>
    %427 = tpu.matmul %390, %54, %cst_221 {dimension_numbers = #tpu.dot_dimension_numbers<[1], [0], [0], [1], [0, 0, 1, 1], [], []>} : vector<2x32xf32>, vector<32x32xf32>, vector<2x32xf32> -> vector<2x32xf32>
    %cst_222 = arith.constant dense<0.000000e+00> : vector<2x32xf32>
    %428 = tpu.matmul %390, %56, %cst_222 {dimension_numbers = #tpu.dot_dimension_numbers<[1], [0], [0], [1], [0, 0, 1, 1], [], []>} : vector<2x32xf32>, vector<32x32xf32>, vector<2x32xf32> -> vector<2x32xf32>
    %cst_223 = arith.constant dense<0.000000e+00> : vector<2x32xf32>
    %429 = tpu.matmul %390, %58, %cst_223 {dimension_numbers = #tpu.dot_dimension_numbers<[1], [0], [0], [1], [0, 0, 1, 1], [], []>} : vector<2x32xf32>, vector<32x32xf32>, vector<2x32xf32> -> vector<2x32xf32>
    %cst_224 = arith.constant dense<0.000000e+00> : vector<2x32xf32>
    %430 = tpu.matmul %417, %60, %cst_224 {dimension_numbers = #tpu.dot_dimension_numbers<[1], [0], [0], [1], [0, 0, 1, 1], [], []>} : vector<2x32xf32>, vector<32x32xf32>, vector<2x32xf32> -> vector<2x32xf32>
    %cst_225 = arith.constant dense<0.000000e+00> : vector<2x32xf32>
    %431 = tpu.matmul %417, %62, %cst_225 {dimension_numbers = #tpu.dot_dimension_numbers<[1], [0], [0], [1], [0, 0, 1, 1], [], []>} : vector<2x32xf32>, vector<32x32xf32>, vector<2x32xf32> -> vector<2x32xf32>
    %cst_226 = arith.constant dense<0.000000e+00> : vector<2x32xf32>
    %432 = tpu.matmul %417, %64, %cst_226 {dimension_numbers = #tpu.dot_dimension_numbers<[1], [0], [0], [1], [0, 0, 1, 1], [], []>} : vector<2x32xf32>, vector<32x32xf32>, vector<2x32xf32> -> vector<2x32xf32>
    %433 = arith.index_cast %423 : i32 to index
    %c0_227 = arith.constant 0 : index
    %434 = vector.load %arg10[%433, %c0_227] : memref<16x32xf32, #tpu.memory_space<vmem>>, vector<2x32xf32>
    %435 = arith.addf %434, %427 : vector<2x32xf32>
    %436 = arith.negf %435 : vector<2x32xf32>
    %437 = math.exp %436 : vector<2x32xf32>
    %cst_228 = arith.constant 1.000000e+00 : f32
    %438 = vector.broadcast %cst_228 : f32 to vector<2x32xf32>
    %439 = arith.addf %438, %437 : vector<2x32xf32>
    %440 = arith.divf %438, %439 : vector<2x32xf32>
    %441 = arith.index_cast %423 : i32 to index
    %c0_229 = arith.constant 0 : index
    %442 = vector.load %arg11[%441, %c0_229] : memref<16x32xf32, #tpu.memory_space<vmem>>, vector<2x32xf32>
    %443 = arith.addf %442, %428 : vector<2x32xf32>
    %444 = arith.negf %443 : vector<2x32xf32>
    %445 = math.exp %444 : vector<2x32xf32>
    %cst_230 = arith.constant 1.000000e+00 : f32
    %446 = vector.broadcast %cst_230 : f32 to vector<2x32xf32>
    %447 = arith.addf %446, %445 : vector<2x32xf32>
    %448 = arith.divf %446, %447 : vector<2x32xf32>
    %449 = arith.index_cast %423 : i32 to index
    %c0_231 = arith.constant 0 : index
    %450 = vector.load %arg12[%449, %c0_231] : memref<16x32xf32, #tpu.memory_space<vmem>>, vector<2x32xf32>
    %451 = arith.addf %429, %68 : vector<2x32xf32>
    %452 = arith.mulf %440, %451 : vector<2x32xf32>
    %453 = arith.addf %450, %452 : vector<2x32xf32>
    %454 = math.tanh %453 : vector<2x32xf32>
    %cst_232 = arith.constant 1.000000e+00 : f32
    %455 = vector.broadcast %cst_232 : f32 to vector<2x32xf32>
    %456 = arith.subf %455, %448 : vector<2x32xf32>
    %457 = arith.mulf %456, %454 : vector<2x32xf32>
    %458 = arith.mulf %448, %390 : vector<2x32xf32>
    %459 = arith.addf %457, %458 : vector<2x32xf32>
    %460 = arith.index_cast %426 : i32 to index
    %c0_233 = arith.constant 0 : index
    %461 = vector.load %arg13[%460, %c0_233] : memref<16x32xf32, #tpu.memory_space<vmem>>, vector<2x32xf32>
    %462 = arith.addf %461, %430 : vector<2x32xf32>
    %463 = arith.negf %462 : vector<2x32xf32>
    %464 = math.exp %463 : vector<2x32xf32>
    %cst_234 = arith.constant 1.000000e+00 : f32
    %465 = vector.broadcast %cst_234 : f32 to vector<2x32xf32>
    %466 = arith.addf %465, %464 : vector<2x32xf32>
    %467 = arith.divf %465, %466 : vector<2x32xf32>
    %468 = arith.index_cast %426 : i32 to index
    %c0_235 = arith.constant 0 : index
    %469 = vector.load %arg14[%468, %c0_235] : memref<16x32xf32, #tpu.memory_space<vmem>>, vector<2x32xf32>
    %470 = arith.addf %469, %431 : vector<2x32xf32>
    %471 = arith.negf %470 : vector<2x32xf32>
    %472 = math.exp %471 : vector<2x32xf32>
    %cst_236 = arith.constant 1.000000e+00 : f32
    %473 = vector.broadcast %cst_236 : f32 to vector<2x32xf32>
    %474 = arith.addf %473, %472 : vector<2x32xf32>
    %475 = arith.divf %473, %474 : vector<2x32xf32>
    %476 = arith.index_cast %426 : i32 to index
    %c0_237 = arith.constant 0 : index
    %477 = vector.load %arg15[%476, %c0_237] : memref<16x32xf32, #tpu.memory_space<vmem>>, vector<2x32xf32>
    %478 = arith.addf %432, %72 : vector<2x32xf32>
    %479 = arith.mulf %467, %478 : vector<2x32xf32>
    %480 = arith.addf %477, %479 : vector<2x32xf32>
    %481 = math.tanh %480 : vector<2x32xf32>
    %cst_238 = arith.constant 1.000000e+00 : f32
    %482 = vector.broadcast %cst_238 : f32 to vector<2x32xf32>
    %483 = arith.subf %482, %475 : vector<2x32xf32>
    %484 = arith.mulf %483, %481 : vector<2x32xf32>
    %485 = arith.mulf %475, %417 : vector<2x32xf32>
    %486 = arith.addf %484, %485 : vector<2x32xf32>
    %487 = arith.index_cast %423 : i32 to index
    %c0_239 = arith.constant 0 : index
    %488 = vector.load %arg7[%487, %c0_239] : memref<16x32xf32, #tpu.memory_space<vmem>>, vector<2x32xf32>
    tpu.vector_store %arg7[%487, %c0_239], %459 {strides = array<i32>} : memref<16x32xf32, #tpu.memory_space<vmem>>, vector<2x32xf32>,
    %489 = arith.index_cast %426 : i32 to index
    %c0_240 = arith.constant 0 : index
    %490 = vector.load %arg8[%489, %c0_240] : memref<16x32xf32, #tpu.memory_space<vmem>>, vector<2x32xf32>
    tpu.vector_store %arg8[%489, %c0_240], %486 {strides = array<i32>} : memref<16x32xf32, #tpu.memory_space<vmem>>, vector<2x32xf32>,
    %c6_i32 = arith.constant 6 : i32
    %c2_i32_241 = arith.constant 2 : i32
    %491 = arith.muli %c6_i32, %c2_i32_241 : i32
    %492 = tpu.assume_multiple %491, 2 : i32
    %c7_i32_242 = arith.constant 7 : i32
    %493 = arith.subi %c7_i32_242, %c6_i32 : i32
    %c2_i32_243 = arith.constant 2 : i32
    %494 = arith.muli %493, %c2_i32_243 : i32
    %495 = tpu.assume_multiple %494, 2 : i32
    %cst_244 = arith.constant dense<0.000000e+00> : vector<2x32xf32>
    %496 = tpu.matmul %459, %54, %cst_244 {dimension_numbers = #tpu.dot_dimension_numbers<[1], [0], [0], [1], [0, 0, 1, 1], [], []>} : vector<2x32xf32>, vector<32x32xf32>, vector<2x32xf32> -> vector<2x32xf32>
    %cst_245 = arith.constant dense<0.000000e+00> : vector<2x32xf32>
    %497 = tpu.matmul %459, %56, %cst_245 {dimension_numbers = #tpu.dot_dimension_numbers<[1], [0], [0], [1], [0, 0, 1, 1], [], []>} : vector<2x32xf32>, vector<32x32xf32>, vector<2x32xf32> -> vector<2x32xf32>
    %cst_246 = arith.constant dense<0.000000e+00> : vector<2x32xf32>
    %498 = tpu.matmul %459, %58, %cst_246 {dimension_numbers = #tpu.dot_dimension_numbers<[1], [0], [0], [1], [0, 0, 1, 1], [], []>} : vector<2x32xf32>, vector<32x32xf32>, vector<2x32xf32> -> vector<2x32xf32>
    %cst_247 = arith.constant dense<0.000000e+00> : vector<2x32xf32>
    %499 = tpu.matmul %486, %60, %cst_247 {dimension_numbers = #tpu.dot_dimension_numbers<[1], [0], [0], [1], [0, 0, 1, 1], [], []>} : vector<2x32xf32>, vector<32x32xf32>, vector<2x32xf32> -> vector<2x32xf32>
    %cst_248 = arith.constant dense<0.000000e+00> : vector<2x32xf32>
    %500 = tpu.matmul %486, %62, %cst_248 {dimension_numbers = #tpu.dot_dimension_numbers<[1], [0], [0], [1], [0, 0, 1, 1], [], []>} : vector<2x32xf32>, vector<32x32xf32>, vector<2x32xf32> -> vector<2x32xf32>
    %cst_249 = arith.constant dense<0.000000e+00> : vector<2x32xf32>
    %501 = tpu.matmul %486, %64, %cst_249 {dimension_numbers = #tpu.dot_dimension_numbers<[1], [0], [0], [1], [0, 0, 1, 1], [], []>} : vector<2x32xf32>, vector<32x32xf32>, vector<2x32xf32> -> vector<2x32xf32>
    %502 = arith.index_cast %492 : i32 to index
    %c0_250 = arith.constant 0 : index
    %503 = vector.load %arg10[%502, %c0_250] : memref<16x32xf32, #tpu.memory_space<vmem>>, vector<2x32xf32>
    %504 = arith.addf %503, %496 : vector<2x32xf32>
    %505 = arith.negf %504 : vector<2x32xf32>
    %506 = math.exp %505 : vector<2x32xf32>
    %cst_251 = arith.constant 1.000000e+00 : f32
    %507 = vector.broadcast %cst_251 : f32 to vector<2x32xf32>
    %508 = arith.addf %507, %506 : vector<2x32xf32>
    %509 = arith.divf %507, %508 : vector<2x32xf32>
    %510 = arith.index_cast %492 : i32 to index
    %c0_252 = arith.constant 0 : index
    %511 = vector.load %arg11[%510, %c0_252] : memref<16x32xf32, #tpu.memory_space<vmem>>, vector<2x32xf32>
    %512 = arith.addf %511, %497 : vector<2x32xf32>
    %513 = arith.negf %512 : vector<2x32xf32>
    %514 = math.exp %513 : vector<2x32xf32>
    %cst_253 = arith.constant 1.000000e+00 : f32
    %515 = vector.broadcast %cst_253 : f32 to vector<2x32xf32>
    %516 = arith.addf %515, %514 : vector<2x32xf32>
    %517 = arith.divf %515, %516 : vector<2x32xf32>
    %518 = arith.index_cast %492 : i32 to index
    %c0_254 = arith.constant 0 : index
    %519 = vector.load %arg12[%518, %c0_254] : memref<16x32xf32, #tpu.memory_space<vmem>>, vector<2x32xf32>
    %520 = arith.addf %498, %68 : vector<2x32xf32>
    %521 = arith.mulf %509, %520 : vector<2x32xf32>
    %522 = arith.addf %519, %521 : vector<2x32xf32>
    %523 = math.tanh %522 : vector<2x32xf32>
    %cst_255 = arith.constant 1.000000e+00 : f32
    %524 = vector.broadcast %cst_255 : f32 to vector<2x32xf32>
    %525 = arith.subf %524, %517 : vector<2x32xf32>
    %526 = arith.mulf %525, %523 : vector<2x32xf32>
    %527 = arith.mulf %517, %459 : vector<2x32xf32>
    %528 = arith.addf %526, %527 : vector<2x32xf32>
    %529 = arith.index_cast %495 : i32 to index
    %c0_256 = arith.constant 0 : index
    %530 = vector.load %arg13[%529, %c0_256] : memref<16x32xf32, #tpu.memory_space<vmem>>, vector<2x32xf32>
    %531 = arith.addf %530, %499 : vector<2x32xf32>
    %532 = arith.negf %531 : vector<2x32xf32>
    %533 = math.exp %532 : vector<2x32xf32>
    %cst_257 = arith.constant 1.000000e+00 : f32
    %534 = vector.broadcast %cst_257 : f32 to vector<2x32xf32>
    %535 = arith.addf %534, %533 : vector<2x32xf32>
    %536 = arith.divf %534, %535 : vector<2x32xf32>
    %537 = arith.index_cast %495 : i32 to index
    %c0_258 = arith.constant 0 : index
    %538 = vector.load %arg14[%537, %c0_258] : memref<16x32xf32, #tpu.memory_space<vmem>>, vector<2x32xf32>
    %539 = arith.addf %538, %500 : vector<2x32xf32>
    %540 = arith.negf %539 : vector<2x32xf32>
    %541 = math.exp %540 : vector<2x32xf32>
    %cst_259 = arith.constant 1.000000e+00 : f32
    %542 = vector.broadcast %cst_259 : f32 to vector<2x32xf32>
    %543 = arith.addf %542, %541 : vector<2x32xf32>
    %544 = arith.divf %542, %543 : vector<2x32xf32>
    %545 = arith.index_cast %495 : i32 to index
    %c0_260 = arith.constant 0 : index
    %546 = vector.load %arg15[%545, %c0_260] : memref<16x32xf32, #tpu.memory_space<vmem>>, vector<2x32xf32>
    %547 = arith.addf %501, %72 : vector<2x32xf32>
    %548 = arith.mulf %536, %547 : vector<2x32xf32>
    %549 = arith.addf %546, %548 : vector<2x32xf32>
    %550 = math.tanh %549 : vector<2x32xf32>
    %cst_261 = arith.constant 1.000000e+00 : f32
    %551 = vector.broadcast %cst_261 : f32 to vector<2x32xf32>
    %552 = arith.subf %551, %544 : vector<2x32xf32>
    %553 = arith.mulf %552, %550 : vector<2x32xf32>
    %554 = arith.mulf %544, %486 : vector<2x32xf32>
    %555 = arith.addf %553, %554 : vector<2x32xf32>
    %556 = arith.index_cast %492 : i32 to index
    %c0_262 = arith.constant 0 : index
    %557 = vector.load %arg7[%556, %c0_262] : memref<16x32xf32, #tpu.memory_space<vmem>>, vector<2x32xf32>
    tpu.vector_store %arg7[%556, %c0_262], %528 {strides = array<i32>} : memref<16x32xf32, #tpu.memory_space<vmem>>, vector<2x32xf32>,
    %558 = arith.index_cast %495 : i32 to index
    %c0_263 = arith.constant 0 : index
    %559 = vector.load %arg8[%558, %c0_263] : memref<16x32xf32, #tpu.memory_space<vmem>>, vector<2x32xf32>
    tpu.vector_store %arg8[%558, %c0_263], %555 {strides = array<i32>} : memref<16x32xf32, #tpu.memory_space<vmem>>, vector<2x32xf32>,
    %c7_i32_264 = arith.constant 7 : i32
    %c2_i32_265 = arith.constant 2 : i32
    %560 = arith.muli %c7_i32_264, %c2_i32_265 : i32
    %561 = tpu.assume_multiple %560, 2 : i32
    %c7_i32_266 = arith.constant 7 : i32
    %562 = arith.subi %c7_i32_266, %c7_i32_264 : i32
    %c2_i32_267 = arith.constant 2 : i32
    %563 = arith.muli %562, %c2_i32_267 : i32
    %564 = tpu.assume_multiple %563, 2 : i32
    %cst_268 = arith.constant dense<0.000000e+00> : vector<2x32xf32>
    %565 = tpu.matmul %528, %54, %cst_268 {dimension_numbers = #tpu.dot_dimension_numbers<[1], [0], [0], [1], [0, 0, 1, 1], [], []>} : vector<2x32xf32>, vector<32x32xf32>, vector<2x32xf32> -> vector<2x32xf32>
    %cst_269 = arith.constant dense<0.000000e+00> : vector<2x32xf32>
    %566 = tpu.matmul %528, %56, %cst_269 {dimension_numbers = #tpu.dot_dimension_numbers<[1], [0], [0], [1], [0, 0, 1, 1], [], []>} : vector<2x32xf32>, vector<32x32xf32>, vector<2x32xf32> -> vector<2x32xf32>
    %cst_270 = arith.constant dense<0.000000e+00> : vector<2x32xf32>
    %567 = tpu.matmul %528, %58, %cst_270 {dimension_numbers = #tpu.dot_dimension_numbers<[1], [0], [0], [1], [0, 0, 1, 1], [], []>} : vector<2x32xf32>, vector<32x32xf32>, vector<2x32xf32> -> vector<2x32xf32>
    %cst_271 = arith.constant dense<0.000000e+00> : vector<2x32xf32>
    %568 = tpu.matmul %555, %60, %cst_271 {dimension_numbers = #tpu.dot_dimension_numbers<[1], [0], [0], [1], [0, 0, 1, 1], [], []>} : vector<2x32xf32>, vector<32x32xf32>, vector<2x32xf32> -> vector<2x32xf32>
    %cst_272 = arith.constant dense<0.000000e+00> : vector<2x32xf32>
    %569 = tpu.matmul %555, %62, %cst_272 {dimension_numbers = #tpu.dot_dimension_numbers<[1], [0], [0], [1], [0, 0, 1, 1], [], []>} : vector<2x32xf32>, vector<32x32xf32>, vector<2x32xf32> -> vector<2x32xf32>
    %cst_273 = arith.constant dense<0.000000e+00> : vector<2x32xf32>
    %570 = tpu.matmul %555, %64, %cst_273 {dimension_numbers = #tpu.dot_dimension_numbers<[1], [0], [0], [1], [0, 0, 1, 1], [], []>} : vector<2x32xf32>, vector<32x32xf32>, vector<2x32xf32> -> vector<2x32xf32>
    %571 = arith.index_cast %561 : i32 to index
    %c0_274 = arith.constant 0 : index
    %572 = vector.load %arg10[%571, %c0_274] : memref<16x32xf32, #tpu.memory_space<vmem>>, vector<2x32xf32>
    %573 = arith.addf %572, %565 : vector<2x32xf32>
    %574 = arith.negf %573 : vector<2x32xf32>
    %575 = math.exp %574 : vector<2x32xf32>
    %cst_275 = arith.constant 1.000000e+00 : f32
    %576 = vector.broadcast %cst_275 : f32 to vector<2x32xf32>
    %577 = arith.addf %576, %575 : vector<2x32xf32>
    %578 = arith.divf %576, %577 : vector<2x32xf32>
    %579 = arith.index_cast %561 : i32 to index
    %c0_276 = arith.constant 0 : index
    %580 = vector.load %arg11[%579, %c0_276] : memref<16x32xf32, #tpu.memory_space<vmem>>, vector<2x32xf32>
    %581 = arith.addf %580, %566 : vector<2x32xf32>
    %582 = arith.negf %581 : vector<2x32xf32>
    %583 = math.exp %582 : vector<2x32xf32>
    %cst_277 = arith.constant 1.000000e+00 : f32
    %584 = vector.broadcast %cst_277 : f32 to vector<2x32xf32>
    %585 = arith.addf %584, %583 : vector<2x32xf32>
    %586 = arith.divf %584, %585 : vector<2x32xf32>
    %587 = arith.index_cast %561 : i32 to index
    %c0_278 = arith.constant 0 : index
    %588 = vector.load %arg12[%587, %c0_278] : memref<16x32xf32, #tpu.memory_space<vmem>>, vector<2x32xf32>
    %589 = arith.addf %567, %68 : vector<2x32xf32>
    %590 = arith.mulf %578, %589 : vector<2x32xf32>
    %591 = arith.addf %588, %590 : vector<2x32xf32>
    %592 = math.tanh %591 : vector<2x32xf32>
    %cst_279 = arith.constant 1.000000e+00 : f32
    %593 = vector.broadcast %cst_279 : f32 to vector<2x32xf32>
    %594 = arith.subf %593, %586 : vector<2x32xf32>
    %595 = arith.mulf %594, %592 : vector<2x32xf32>
    %596 = arith.mulf %586, %528 : vector<2x32xf32>
    %597 = arith.addf %595, %596 : vector<2x32xf32>
    %598 = arith.index_cast %564 : i32 to index
    %c0_280 = arith.constant 0 : index
    %599 = vector.load %arg13[%598, %c0_280] : memref<16x32xf32, #tpu.memory_space<vmem>>, vector<2x32xf32>
    %600 = arith.addf %599, %568 : vector<2x32xf32>
    %601 = arith.negf %600 : vector<2x32xf32>
    %602 = math.exp %601 : vector<2x32xf32>
    %cst_281 = arith.constant 1.000000e+00 : f32
    %603 = vector.broadcast %cst_281 : f32 to vector<2x32xf32>
    %604 = arith.addf %603, %602 : vector<2x32xf32>
    %605 = arith.divf %603, %604 : vector<2x32xf32>
    %606 = arith.index_cast %564 : i32 to index
    %c0_282 = arith.constant 0 : index
    %607 = vector.load %arg14[%606, %c0_282] : memref<16x32xf32, #tpu.memory_space<vmem>>, vector<2x32xf32>
    %608 = arith.addf %607, %569 : vector<2x32xf32>
    %609 = arith.negf %608 : vector<2x32xf32>
    %610 = math.exp %609 : vector<2x32xf32>
    %cst_283 = arith.constant 1.000000e+00 : f32
    %611 = vector.broadcast %cst_283 : f32 to vector<2x32xf32>
    %612 = arith.addf %611, %610 : vector<2x32xf32>
    %613 = arith.divf %611, %612 : vector<2x32xf32>
    %614 = arith.index_cast %564 : i32 to index
    %c0_284 = arith.constant 0 : index
    %615 = vector.load %arg15[%614, %c0_284] : memref<16x32xf32, #tpu.memory_space<vmem>>, vector<2x32xf32>
    %616 = arith.addf %570, %72 : vector<2x32xf32>
    %617 = arith.mulf %605, %616 : vector<2x32xf32>
    %618 = arith.addf %615, %617 : vector<2x32xf32>
    %619 = math.tanh %618 : vector<2x32xf32>
    %cst_285 = arith.constant 1.000000e+00 : f32
    %620 = vector.broadcast %cst_285 : f32 to vector<2x32xf32>
    %621 = arith.subf %620, %613 : vector<2x32xf32>
    %622 = arith.mulf %621, %619 : vector<2x32xf32>
    %623 = arith.mulf %613, %555 : vector<2x32xf32>
    %624 = arith.addf %622, %623 : vector<2x32xf32>
    %625 = arith.index_cast %561 : i32 to index
    %c0_286 = arith.constant 0 : index
    %626 = vector.load %arg7[%625, %c0_286] : memref<16x32xf32, #tpu.memory_space<vmem>>, vector<2x32xf32>
    tpu.vector_store %arg7[%625, %c0_286], %597 {strides = array<i32>} : memref<16x32xf32, #tpu.memory_space<vmem>>, vector<2x32xf32>,
    %627 = arith.index_cast %564 : i32 to index
    %c0_287 = arith.constant 0 : index
    %628 = vector.load %arg8[%627, %c0_287] : memref<16x32xf32, #tpu.memory_space<vmem>>, vector<2x32xf32>
    tpu.vector_store %arg8[%627, %c0_287], %624 {strides = array<i32>} : memref<16x32xf32, #tpu.memory_space<vmem>>, vector<2x32xf32>,
    %c8_i32 = arith.constant 8 : i32
    %c0_288 = arith.constant 0 : index
    %c0_289 = arith.constant 0 : index
    %c0_290 = arith.constant 0 : index
    %629 = vector.load %arg9[%c0_288, %c0_289, %c0_290] : memref<2x2x32xf32, #tpu.memory_space<vmem>>, vector<1x2x32xf32>
    %630 = vector.shape_cast %629 : vector<1x2x32xf32> to vector<2x32xf32>
    %631 = vector.shape_cast %597 : vector<2x32xf32> to vector<1x2x32xf32>
    tpu.vector_store %arg9[%c0_288, %c0_289, %c0_290], %631 {strides = array<i32>} : memref<2x2x32xf32, #tpu.memory_space<vmem>>, vector<1x2x32xf32>,
    %c1_291 = arith.constant 1 : index
    %c0_292 = arith.constant 0 : index
    %c0_293 = arith.constant 0 : index
    %632 = vector.load %arg9[%c1_291, %c0_292, %c0_293] : memref<2x2x32xf32, #tpu.memory_space<vmem>>, vector<1x2x32xf32>
    %633 = vector.shape_cast %632 : vector<1x2x32xf32> to vector<2x32xf32>
    %634 = vector.shape_cast %624 : vector<2x32xf32> to vector<1x2x32xf32>
    tpu.vector_store %arg9[%c1_291, %c0_292, %c0_293], %634 {strides = array<i32>} : memref<2x2x32xf32, #tpu.memory_space<vmem>>, vector<1x2x32xf32>,
    return
  }
  func.func @transform_0(%arg0: i32) -> (i32, i32) {
    %c0_i32 = arith.constant 0 : i32
    %c0_i32_0 = arith.constant 0 : i32
    return %arg0, %c0_i32 : i32, i32
  }
  func.func @transform_1(%arg0: i32) -> (i32, i32) {
    %c0_i32 = arith.constant 0 : i32
    %0 = arith.subi %c0_i32, %arg0 : i32
    %c0_i32_0 = arith.constant 0 : i32
    %c0_i32_1 = arith.constant 0 : i32
    return %0, %c0_i32_0 : i32, i32
  }
  func.func @transform_2(%arg0: i32) -> (i32, i32, i32, i32) {
    %c0_i32 = arith.constant 0 : i32
    %c0_i32_0 = arith.constant 0 : i32
    %c0_i32_1 = arith.constant 0 : i32
    %c0_i32_2 = arith.constant 0 : i32
    %c0_i32_3 = arith.constant 0 : i32
    return %c0_i32, %c0_i32_0, %c0_i32_1, %c0_i32_2 : i32, i32, i32, i32
  }
  func.func @transform_3(%arg0: i32) -> (i32, i32, i32, i32) {
    %c0_i32 = arith.constant 0 : i32
    %c0_i32_0 = arith.constant 0 : i32
    %c0_i32_1 = arith.constant 0 : i32
    %c0_i32_2 = arith.constant 0 : i32
    %c0_i32_3 = arith.constant 0 : i32
    return %c0_i32, %c0_i32_0, %c0_i32_1, %c0_i32_2 : i32, i32, i32, i32
  }
  func.func @transform_4(%arg0: i32) -> (i32, i32, i32, i32) {
    %c0_i32 = arith.constant 0 : i32
    %c0_i32_0 = arith.constant 0 : i32
    %c0_i32_1 = arith.constant 0 : i32
    %c0_i32_2 = arith.constant 0 : i32
    %c0_i32_3 = arith.constant 0 : i32
    return %c0_i32, %c0_i32_0, %c0_i32_1, %c0_i32_2 : i32, i32, i32, i32
  }
  func.func @transform_5(%arg0: i32) -> (i32, i32, i32) {
    %c0_i32 = arith.constant 0 : i32
    %c0_i32_0 = arith.constant 0 : i32
    %c0_i32_1 = arith.constant 0 : i32
    %c0_i32_2 = arith.constant 0 : i32
    return %c0_i32, %c0_i32_0, %c0_i32_1 : i32, i32, i32
  }
  func.func @transform_6(%arg0: i32) -> (i32, i32) {
    %c0_i32 = arith.constant 0 : i32
    %c0_i32_0 = arith.constant 0 : i32
    return %arg0, %c0_i32 : i32, i32
  }
  func.func @transform_7(%arg0: i32) -> (i32, i32) {
    %c0_i32 = arith.constant 0 : i32
    %0 = arith.subi %c0_i32, %arg0 : i32
    %c0_i32_0 = arith.constant 0 : i32
    %c0_i32_1 = arith.constant 0 : i32
    return %0, %c0_i32_0 : i32, i32
  }
}

</mosaic_0001>

<bundles_post_ra>
// kernel: tpu_custom_call.1
= control target key start
LH: loop header
LB: loop body
LE: loop exit
PB: predicated region body
PF: predicated region fallthrough
CT: control target
= control target key end

     0   :  { %13 = vsyncpa [#allocation10], 0  ;;  %s6850_s0 = inlined_call_operand.hbm [shape: f32[16,32], index: 0, kind: input, shape index: {}]   ;;  %s6851_s1 = inlined_call_operand.hbm [shape: f32[16,32], index: 1, kind: input, shape index: {}]   ;;  %s6852_s2 = inlined_call_operand.hbm [shape: f32[2,3,32,32], index: 2, kind: input, shape index: {}]   ;;  %s6853_s3 = inlined_call_operand.hbm [shape: f32[2,3,1,32], index: 3, kind: input, shape index: {}]   ;;  %s6854_s4 = inlined_call_operand.hbm [shape: f32[2,3,32,32], index: 4, kind: input, shape index: {}]   ;;  %s6855_s5 = inlined_call_operand.vmem [shape: f32[2,1,32], index: 5, kind: input, shape index: {}]   ;;  %s6856_s6 = inlined_call_operand.hbm [shape: f32[16,32], index: 6, kind: output, shape index: {0}]   ;;  %s6857_s7 = inlined_call_operand.hbm [shape: f32[16,32], index: 7, kind: output, shape index: {1}]  }
   0x1   :  { %14 = vsyncpa [#allocation13], 0 }
   0x2   :  { %15 = vsyncpa [#allocation16], 0 }
   0x3   :  { %16 = vsyncpa [#allocation11], 0 }
   0x4   :  { %17 = vsyncpa [#allocation20], 0  ;;  %s5942_s24 = smov [#allocation12]   ;;  %s5943_s26 = smov [#allocation15]  }
   0x5   :  { %s39_s25 = sshll.u32 %s5942_s24, 4  ;;  %s63_s27 = sshll.u32 %s5943_s26, 4  ;;  %s40_s25 = int_to_ptr.vmem [resolvable:$true] %s39_s25  ;;  %s64_s27 = int_to_ptr.vmem [resolvable:$true] %s63_s27 }
   0x6   :  { %s5800_s28 = scalar_lea.vmem %s40_s25, 256  ;;  %p5805_p1 = scmp.lt.s32.totalorder %s40_s25, %s40_s25 }
   0x7   :  { %p5801_p0 = scmp.ne.s32.totalorder %s40_s25, %s5800_s28  ;;  %p5806_p2 = scmp.lt.s32.totalorder %s5800_s28, %s5800_s28 }
   0x9   :  { %p5807_p3 = por %p5806_p2, %p5805_p1 }
   0xb   :  { %p5808_p4 = pnand %p5807_p3, %p5801_p0 }
   0xd   :  { %5811 = shalt.err (!%p5808_p4)
}
   0xe   :  { %s5944_s29 = smov 128   ;;  %s5945_s30 = smov 8  }
   0xf   :  { %45 = dma.hbm_to_vmem [thread:$0]  %s6851_s1, 256, %s40_s25, [#allocation13], %s5944_s29, %s5944_s29, %s5945_s30  }
  0x10   :  { %s5820_s10 = scalar_lea.vmem %s64_s27, 96  ;;  %p5825_p6 = scmp.lt.s32.totalorder %s64_s27, %s64_s27 }
  0x11   :  { %p5821_p5 = scmp.ne.s32.totalorder %s64_s27, %s5820_s10  ;;  %p5826_p7 = scmp.lt.s32.totalorder %s5820_s10, %s5820_s10 }
  0x13   :  { %p5827_p8 = por %p5826_p7, %p5825_p6 }
  0x15   :  { %p5828_p9 = pnand %p5827_p8, %p5821_p5 }
  0x17   :  { %5831 = shalt.err (!%p5828_p9)
}
  0x18   :  { %s5946_s11 = smov 16   ;;  %s5947_s12 = smov 1  }
  0x19   :  { %69 = dma.hbm_to_vmem [thread:$0]  %s6853_s3, 96, %s64_s27, [#allocation16], %s5946_s11, %s5946_s11, %s5947_s12  }
  0x1a   :  { %s5948_s15 = smov [#allocation9]   ;;  %s5949_s17 = smov [#allocation14]  }
  0x1b   :  { %s23_s16 = sshll.u32 %s5948_s15, 4  ;;  %s51_s18 = sshll.u32 %s5949_s17, 4  ;;  %s24_s16 = int_to_ptr.vmem [resolvable:$true] %s23_s16  ;;  %s52_s18 = int_to_ptr.vmem [resolvable:$true] %s51_s18 }
  0x1c   :  { %s5840_s1 = scalar_lea.vmem %s24_s16, 256  ;;  %p5845_p11 = scmp.lt.s32.totalorder %s24_s16, %s24_s16 }
  0x1d   :  { %p5841_p10 = scmp.ne.s32.totalorder %s24_s16, %s5840_s1  ;;  %p5846_p12 = scmp.lt.s32.totalorder %s5840_s1, %s5840_s1 }
  0x1f   :  { %p5847_p13 = por %p5846_p12, %p5845_p11 }
  0x21   :  { %p5848_p0 = pnand %p5847_p13, %p5841_p10 }
  0x23   :  { %5851 = shalt.err (!%p5848_p0)
}
  0x24   :  { %29 = dma.hbm_to_vmem [thread:$0]  %s6850_s0, 256, %s24_s16, [#allocation10], %s5944_s29, %s5944_s29, %s5945_s30  }
  0x25   :  { %s5860_s3 = scalar_lea.vmem %s52_s18, 3072  ;;  %p5865_p2 = scmp.lt.s32.totalorder %s52_s18, %s52_s18 }
  0x26   :  { %p5861_p1 = scmp.ne.s32.totalorder %s52_s18, %s5860_s3  ;;  %p5866_p3 = scmp.lt.s32.totalorder %s5860_s3, %s5860_s3 }
  0x28   :  { %p5867_p4 = por %p5866_p3, %p5865_p2 }
  0x2a   :  { %p5868_p5 = pnand %p5867_p4, %p5861_p1 }
  0x2c   :  { %5871 = shalt.err (!%p5868_p5)
}
  0x2d   :  { %57 = dma.hbm_to_vmem [thread:$0]  %s6852_s2, 3072, %s52_s18, [#allocation13], %s5944_s29, %s5944_s29, %s5945_s30  }
  0x2e   :  { %s5950_s23 = smov [#allocation17]  }
  0x2f   :  { %s75_s24 = sshll.u32 %s5950_s23, 4  ;;  %s76_s24 = int_to_ptr.vmem [resolvable:$true] %s75_s24 }
  0x30   :  { %s5880_s25 = scalar_lea.vmem %s76_s24, 3072  ;;  %p5885_p7 = scmp.lt.s32.totalorder %s76_s24, %s76_s24 }
  0x31   :  { %p5881_p6 = scmp.ne.s32.totalorder %s76_s24, %s5880_s25  ;;  %p5886_p8 = scmp.lt.s32.totalorder %s5880_s25, %s5880_s25 }
  0x33   :  { %p5887_p9 = por %p5886_p8, %p5885_p7 }
  0x35   :  { %p5888_p10 = pnand %p5887_p9, %p5881_p6 }
  0x37   :  { %5891 = shalt.err (!%p5888_p10)
}
  0x38   :  { %81 = dma.hbm_to_vmem [thread:$0]  %s6854_s4, 3072, %s76_s24, [#allocation16], %s5944_s29, %s5944_s29, %s5945_s30  }
  0x39   :  { %5932 = dma.done.wait [#allocation10], 256  }
  0x3a   :  { %5933 = vsyncadd [#allocation10], 4294967040 }
  0x3b   :  { %5934 = dma.done.wait [#allocation13], 3328  }
  0x3c   :  { %5935 = vsyncadd [#allocation13], 4294963968 }
  0x3d   :  { %5936 = dma.done.wait [#allocation16], 3168  }
  0x3e   :  { %5937 = vsyncadd [#allocation16], 4294964128  ;;  %vm107_vm0 = vcmask 254976   ;;  %v5951_v0 = vmov 0.0   ;;  %v117_v1 = vld [vmem:[#allocation14 + $0x18] sm:$0xff]  ;;  %v116_v3 = vld [vmem:[#allocation14 + $0x10] sm:$0xff] }
  0x3f   :  { %108 = vst.msk [vmem:[#allocation2] sm:$0x3] %vm107_vm0, %v5951_v0  ;;  %109 = vst.msk [vmem:[#allocation2 + $0x2] sm:$0x3] %vm107_vm0, %v5951_v0  ;;  %v213_v2 = vld [vmem:[#allocation14 + $0x38] sm:$0xff]  ;;  %4999 = vmatprep.subr.mxu0 %v117_v1  ;;  %v212_v4 = vld [vmem:[#allocation14 + $0x30] sm:$0xff] }
  0x40   :  { %5010 = vmatprep.subr.mxu1 %v213_v2  ;;  %5000 = vmatpush3.msra.mxu0 %v117_v1  ;;  %v115_v5 = vld [vmem:[#allocation14 + $0x8] sm:$0xff]  ;;  %v114_v7 = vld [vmem:[#allocation14] sm:$0xff]  ;;  %vm125_vm1 = vcmask 261120   ;;  %v303_v11 = vld [vmem:[#allocation14 + $0x58] sm:$0xff]  ;;  %vm5952_vm2 = vmmov 0  }
  0x41   :  { %5011 = vmatpush3.msra.mxu1 %v213_v2  ;;  %v211_v6 = vld [vmem:[#allocation14 + $0x28] sm:$0xff]  ;;  %5001 = vmatprep.subr.mxu0 %v116_v3  ;;  %v210_v8 = vld [vmem:[#allocation14 + $0x20] sm:$0xff]  ;;  %v393_v12 = vld [vmem:[#allocation14 + $0x78] sm:$0xff] }
  0x42   :  { %5012 = vmatprep.subr.mxu1 %v212_v4  ;;  %5002 = vmatpush3.msra.mxu0 %v116_v3  ;;  %v110_v9 = vld [vmem:[#allocation9] sm:$0xff]  ;;  %v111_v10 = vld [vmem:[#allocation9 + $0x8] sm:$0xff]  ;;  %v302_v13 = vld [vmem:[#allocation14 + $0x50] sm:$0xff] }
  0x43   :  { %5013 = vmatpush3.msra.mxu1 %v212_v4  ;;  %5003 = vmatprep.subr.mxu0 %v115_v5  ;;  %v392_v14 = vld [vmem:[#allocation14 + $0x70] sm:$0xff]  ;;  %v301_v15 = vld [vmem:[#allocation14 + $0x48] sm:$0xff]  ;;  %v300_v17 = vld [vmem:[#allocation14 + $0x40] sm:$0xff] }
  0x44   :  { %5014 = vmatprep.subr.mxu1 %v211_v6  ;;  %5004 = vmatpush3.msra.mxu0 %v115_v5  ;;  %v391_v16 = vld [vmem:[#allocation14 + $0x68] sm:$0xff]  ;;  %v390_v18 = vld [vmem:[#allocation14 + $0x60] sm:$0xff]  ;;  %v112_v19 = vld [vmem:[#allocation12] sm:$0xff] }
  0x45   :  { %5015 = vmatpush3.msra.mxu1 %v211_v6  ;;  %5005 = vmatprep.subr.mxu0 %v114_v7  ;;  %v489_v20 = vld [vmem:[#allocation14 + $0x98] sm:$0xff]  ;;  %v488_v23 = vld [vmem:[#allocation14 + $0x90] sm:$0xff]  ;;  %v487_v25 = vld [vmem:[#allocation14 + $0x88] sm:$0xff] }
  0x46   :  { %5016 = vmatprep.subr.mxu1 %v210_v8  ;;  %5006 = vmatpush3.msra.mxu0 %v114_v7  ;;  %v579_v21 = vld [vmem:[#allocation14 + $0xb8] sm:$0xff]  ;;  %v578_v24 = vld [vmem:[#allocation14 + $0xb0] sm:$0xff]  ;;  %v577_v26 = vld [vmem:[#allocation14 + $0xa8] sm:$0xff] }
  0x47   :  { %5007 = vmatprep.mubr.msk.f32.mxu0 %vm125_vm1, %v110_v9  ;;  %5017 = vmatpush3.msra.mxu1 %v210_v8  ;;  %v113_v22 = vld [vmem:[#allocation12 + $0x8] sm:$0xff]  ;;  %v486_v27 = vld [vmem:[#allocation14 + $0x80] sm:$0xff]  ;;  %v6052_v33 = vld [vmem:[#allocation17 + $0x8] sm:$0xff] }
  0x48   :  { %5008 = vmatmul.mubr.msk.f32.vlgmr.msra.gmra.mxu0 %vm125_vm1, %v111_v10  ;;  %5018 = vmatprep.mubr.msk.f32.mxu1 %vm125_vm1, %v110_v9  ;;  %v576_v28 = vld [vmem:[#allocation14 + $0xa0] sm:$0xff]  ;;  %v6044_v31 = vld [vmem:[#allocation17 + $0x10] sm:$0xff]  ;;  %v6054_v34 = vld [vmem:[#allocation17 + $0x28] sm:$0xff] }
  0x49   :  { %5021 = vmatprep.subr.mxu0 %v303_v11  ;;  %5032 = vmatprep.subr.mxu1 %v393_v12  ;;  %v6036_v29 = vld [vmem:[#allocation17 + $0x18] sm:$0xff]  ;;  %v6046_v32 = vld [vmem:[#allocation17 + $0x30] sm:$0xff]  ;;  %v6060_v35 = vld [vmem:[#allocation17] sm:$0xff] }
  0x4a   :  { %5019 = vmatmul.mubr.msk.f32.vlgmr.msra.gmra.mxu1 %vm125_vm1, %v111_v10  ;;  %5022 = vmatpush3.msra.mxu0 %v303_v11  ;;  %v6038_v30 = vld [vmem:[#allocation17 + $0x38] sm:$0xff]  ;;  %v6064_v36 = vld [vmem:[#allocation17 + $0x20] sm:$0xff]  ;;  %v6066_v37 = vld [vmem:[#allocation2] sm:$0x3] }
  0x4b   :  { %5033 = vmatpush3.msra.mxu1 %v393_v12  ;;  %5023 = vmatprep.subr.mxu0 %v302_v13  ;;  %v6076_v38 = vld [vmem:[#allocation17 + $0x78] sm:$0xff]  ;;  %v6086_v40 = vld [vmem:[#allocation17 + $0x70] sm:$0xff]  ;;  %v6094_v42 = vld [vmem:[#allocation17 + $0x68] sm:$0xff] }
  0x4c   :  { %5034 = vmatprep.subr.mxu1 %v392_v14  ;;  %5024 = vmatpush3.msra.mxu0 %v302_v13  ;;  %v6078_v39 = vld [vmem:[#allocation17 + $0x98] sm:$0xff]  ;;  %v6088_v41 = vld [vmem:[#allocation17 + $0x90] sm:$0xff]  ;;  %v6096_v43 = vld [vmem:[#allocation17 + $0x88] sm:$0xff] }
  0x4d   :  { %5035 = vmatpush3.msra.mxu1 %v392_v14  ;;  %5025 = vmatprep.subr.mxu0 %v301_v15  ;;  %v6102_v44 = vld [vmem:[#allocation17 + $0x60] sm:$0xff]  ;;  %v6110_v46 = vld [vmem:[#allocation2 + $0x2] sm:$0x3]  ;;  %v6127_v49 = vld [vmem:[#allocation17 + $0x50] sm:$0xff] }
  0x4e   :  { %5036 = vmatprep.subr.mxu1 %v391_v16  ;;  %5026 = vmatpush3.msra.mxu0 %v301_v15  ;;  %v6106_v45 = vld [vmem:[#allocation17 + $0x80] sm:$0xff]  ;;  %v6118_v47 = vld [vmem:[#allocation17 + $0x58] sm:$0xff]  ;;  %v6133_v50 = vld [vmem:[#allocation17 + $0xb0] sm:$0xff] }
  0x4f   :  { %5037 = vmatpush3.msra.mxu1 %v391_v16  ;;  %5027 = vmatprep.subr.mxu0 %v300_v17  ;;  %v6124_v48 = vld [vmem:[#allocation17 + $0xb8] sm:$0xff]  ;;  %v6136_v51 = vld [vmem:[#allocation17 + $0x48] sm:$0xff]  ;;  %v6144_v53 = vld [vmem:[#allocation17 + $0x40] sm:$0xff] }
  0x50   :  { %5038 = vmatprep.subr.mxu1 %v390_v18  ;;  %5028 = vmatpush3.msra.mxu0 %v300_v17  ;;  %v6141_v52 = vld [vmem:[#allocation17 + $0xa8] sm:$0xff]  ;;  %v6149_v54 = vld [vmem:[#allocation17 + $0xa0] sm:$0xff]  ;;  %v4622_v55 = vld [vmem:[#allocation15] ss:$0 sm:$0xff] }
  0x51   :  { %5029 = vmatprep.mubr.msk.f32.mxu0 %vm125_vm1, %v110_v9  ;;  %5039 = vmatpush3.msra.mxu1 %v390_v18  ;;  %v4625_v57 = vld [vmem:[#allocation15 + $0x1] ss:$0 sm:$0xff]  ;;  %v4628_v2 = vld [vmem:[#allocation15 + $0x2] ss:$0 sm:$0xff]  ;;  %v4631_v4 = vld [vmem:[#allocation15 + $0x3] ss:$0 sm:$0xff] }
  0x52   :  { %5030 = vmatmul.mubr.msk.f32.vlgmr.msra.gmra.mxu0 %vm125_vm1, %v111_v10  ;;  %5040 = vmatprep.mubr.msk.f32.mxu1 %vm125_vm1, %v112_v19  ;;  %v4634_v12 = vld [vmem:[#allocation15 + $0x4] ss:$0 sm:$0xff]  ;;  %v4637_v14 = vld [vmem:[#allocation15 + $0x5] ss:$0 sm:$0xff] }
  0x53   :  { %5043 = vmatprep.subr.mxu0 %v489_v20  ;;  %5054 = vmatprep.subr.mxu1 %v579_v21 }
  0x54   :  { %5041 = vmatmul.mubr.msk.f32.vlgmr.msra.gmra.mxu1 %vm125_vm1, %v113_v22  ;;  %5044 = vmatpush3.msra.mxu0 %v489_v20 }
  0x55   :  { %5055 = vmatpush3.msra.mxu1 %v579_v21  ;;  %5045 = vmatprep.subr.mxu0 %v488_v23 }
  0x56   :  { %5056 = vmatprep.subr.mxu1 %v578_v24  ;;  %5046 = vmatpush3.msra.mxu0 %v488_v23 }
  0x57   :  { %5057 = vmatpush3.msra.mxu1 %v578_v24  ;;  %5047 = vmatprep.subr.mxu0 %v487_v25 }
  0x58   :  { %5058 = vmatprep.subr.mxu1 %v577_v26  ;;  %5048 = vmatpush3.msra.mxu0 %v487_v25 }
  0x59   :  { %5059 = vmatpush3.msra.mxu1 %v577_v26  ;;  %5049 = vmatprep.subr.mxu0 %v486_v27 }
  0x5a   :  { %5060 = vmatprep.subr.mxu1 %v576_v28  ;;  %5050 = vmatpush3.msra.mxu0 %v486_v27 }
  0x5b   :  { %5051 = vmatprep.mubr.msk.f32.mxu0 %vm125_vm1, %v112_v19  ;;  %5061 = vmatpush3.msra.mxu1 %v576_v28 }
  0x5c   :  { %5052 = vmatmul.mubr.msk.f32.vlgmr.msra.gmra.mxu0 %vm125_vm1, %v113_v22  ;;  %5062 = vmatprep.mubr.msk.f32.mxu1 %vm125_vm1, %v112_v19 }
  0x5d   :  { %5065 = vmatprep.subr.mxu0 %v5951_v0  ;;  %5076 = vmatprep.subr.mxu1 %v5951_v0 }
  0x5e   :  { %5063 = vmatmul.mubr.msk.f32.vlgmr.msra.gmra.mxu1 %vm125_vm1, %v113_v22  ;;  %5066 = vmatpush3.msra.mxu0 %v6036_v29 }
  0x5f   :  { %5077 = vmatpush3.msra.mxu1 %v6038_v30  ;;  %5067 = vmatprep.subr.mxu0 %v5951_v0 }
  0x60   :  { %5078 = vmatprep.subr.mxu1 %v5951_v0  ;;  %5068 = vmatpush3.msra.mxu0 %v6044_v31 }
  0x61   :  { %5079 = vmatpush3.msra.mxu1 %v6046_v32  ;;  %5069 = vmatprep.subr.mxu0 %v5951_v0 }
  0x62   :  { %5080 = vmatprep.subr.mxu1 %v5951_v0  ;;  %5070 = vmatpush3.msra.mxu0 %v6052_v33 }
  0x63   :  { %5081 = vmatpush3.msra.mxu1 %v6054_v34  ;;  %5071 = vmatprep.subr.mxu0 %v5951_v0 }
  0x64   :  { %5082 = vmatprep.subr.mxu1 %v5951_v0  ;;  %5072 = vmatpush3.msra.mxu0 %v6060_v35 }
  0x65   :  { %5073 = vmatprep.mubr.msk.f32.mxu0 %vm5952_vm2, %v5951_v0  ;;  %5083 = vmatpush3.msra.mxu1 %v6064_v36 }
  0x66   :  { %5074 = vmatmul.mubr.msk.f32.vlgmr.msra.gmra.mxu0 %vm125_vm1, %v6066_v37  ;;  %5084 = vmatprep.mubr.msk.f32.mxu1 %vm5952_vm2, %v5951_v0 }
  0x67   :  { %5087 = vmatprep.subr.mxu0 %v5951_v0  ;;  %5098 = vmatprep.subr.mxu1 %v5951_v0 }
  0x68   :  { %5085 = vmatmul.mubr.msk.f32.vlgmr.msra.gmra.mxu1 %vm125_vm1, %v6066_v37  ;;  %5088 = vmatpush3.msra.mxu0 %v6076_v38 }
  0x69   :  { %5099 = vmatpush3.msra.mxu1 %v6078_v39  ;;  %5089 = vmatprep.subr.mxu0 %v5951_v0 }
  0x6a   :  { %5100 = vmatprep.subr.mxu1 %v5951_v0  ;;  %5090 = vmatpush3.msra.mxu0 %v6086_v40 }
  0x6b   :  { %5101 = vmatpush3.msra.mxu1 %v6088_v41  ;;  %5091 = vmatprep.subr.mxu0 %v5951_v0 }
  0x6c   :  { %5102 = vmatprep.subr.mxu1 %v5951_v0  ;;  %5092 = vmatpush3.msra.mxu0 %v6094_v42 }
  0x6d   :  { %5103 = vmatpush3.msra.mxu1 %v6096_v43  ;;  %5093 = vmatprep.subr.mxu0 %v5951_v0 }
  0x6e   :  { %5104 = vmatprep.subr.mxu1 %v5951_v0  ;;  %5094 = vmatpush3.msra.mxu0 %v6102_v44 }
  0x6f   :  { %5095 = vmatprep.mubr.msk.f32.mxu0 %vm5952_vm2, %v5951_v0  ;;  %5105 = vmatpush3.msra.mxu1 %v6106_v45 }
  0x70   :  { %5106 = vmatprep.mubr.msk.f32.mxu1 %vm5952_vm2, %v5951_v0  ;;  %5096 = vmatmul.mubr.msk.f32.vlgmr.msra.gmra.mxu0 %vm125_vm1, %v6110_v46 }
  0x71   :  { %5107 = vmatmul.mubr.msk.f32.vlgmr.msra.gmra.mxu1 %vm125_vm1, %v6110_v46  ;;  %5109 = vmatprep.subr.mxu0 %v5951_v0 }
  0x72   :  { %5117 = vmatprep.mubr.msk.f32.mxu0 %vm5952_vm2, %v5951_v0  ;;  %5110 = vmatpush3.msra.mxu0 %v6118_v47 }
  0x73   :  { %5120 = vmatprep.subr.mxu1 %v5951_v0  ;;  %5111 = vmatprep.subr.mxu0 %v5951_v0 }
  0x74   :  { %5121 = vmatpush3.msra.mxu1 %v6124_v48  ;;  %5112 = vmatpush3.msra.mxu0 %v6127_v49 }
  0x75   :  { %5122 = vmatprep.subr.mxu1 %v5951_v0  ;;  %5113 = vmatprep.subr.mxu0 %v5951_v0 }
  0x76   :  { %5123 = vmatpush3.msra.mxu1 %v6133_v50  ;;  %5114 = vmatpush3.msra.mxu0 %v6136_v51 }
  0x77   :  { %5124 = vmatprep.subr.mxu1 %v5951_v0  ;;  %5115 = vmatprep.subr.mxu0 %v5951_v0 }
  0x78   :  { %5125 = vmatpush3.msra.mxu1 %v6141_v52  ;;  %5116 = vmatpush3.msra.mxu0 %v6144_v53 }
  0x79   :  { %5126 = vmatprep.subr.mxu1 %v5951_v0  ;;  %5118 = vmatmul.mubr.msk.f32.vlgmr.msra.gmra.mxu0 %vm125_vm1, %v6066_v37 }
  0x7a   :  { %5127 = vmatpush3.msra.mxu1 %v6149_v54  ;;  %5128 = vmatprep.mubr.msk.f32.mxu1 %vm5952_vm2, %v5951_v0 }
  0x7b   :  { %5131 = vmatprep.subr.mxu0 %v5951_v0  ;;  %5129 = vmatmul.mubr.msk.f32.vlgmr.msra.gmra.mxu1 %vm125_vm1, %v6110_v46 }
  0x7c   :  { %5142 = vmatprep.subr.mxu1 %v5951_v0  ;;  %5132 = vmatpush3.msra.mxu0 %v6036_v29 }
  0x7d   :  { %5143 = vmatpush3.msra.mxu1 %v6038_v30  ;;  %5133 = vmatprep.subr.mxu0 %v5951_v0 }
  0x7e   :  { %5144 = vmatprep.subr.mxu1 %v5951_v0  ;;  %5134 = vmatpush3.msra.mxu0 %v6044_v31 }
  0x7f   :  { %5145 = vmatpush3.msra.mxu1 %v6046_v32  ;;  %5135 = vmatprep.subr.mxu0 %v5951_v0 }
  0x80   :  { %5146 = vmatprep.subr.mxu1 %v5951_v0  ;;  %5136 = vmatpush3.msra.mxu0 %v6052_v33 }
  0x81   :  { %5147 = vmatpush3.msra.mxu1 %v6054_v34  ;;  %5137 = vmatprep.subr.mxu0 %v5951_v0 }
  0x82   :  { %5148 = vmatprep.subr.mxu1 %v5951_v0  ;;  %5138 = vmatpush3.msra.mxu0 %v6060_v35 }
  0x83   :  { %5149 = vmatpush3.msra.mxu1 %v6064_v36  ;;  %5139 = vmatprep.mubr.msk.f32.mxu0 %vm5952_vm2, %v5951_v0 }
  0x84   :  { %5150 = vmatprep.mubr.msk.f32.mxu1 %vm5952_vm2, %v5951_v0  ;;  %5153 = vmatprep.subr.mxu0 %v5951_v0 }
  0x85   :  { %5164 = vmatprep.subr.mxu1 %v5951_v0 }
 0x108   :  { %v5009_v56 = vpop.f32.mrf.mxu0 }
 0x109   :  { %v204_v58 = vadd.f32 %v5009_v56, %v4622_v55 }
 0x10a   :  { %v198_v59 = vpop.f32.mrf.mxu0  ;;  %v5020_v60 = vpop.f32.mrf.mxu1 }
 0x10b   :  { %208 = vst.msk [vmem:[#allocation3 + $0x8] sm:$0xff] %vm125_vm1, %v204_v58  ;;  %v199_v61 = vadd.f32 %v4622_v55, %v198_v59  ;;  %v294_v62 = vadd.f32 %v5020_v60, %v4625_v57 }
 0x10c   :  { %v288_v63 = vpop.f32.mrf.mxu1 }
 0x10d   :  { %207 = vst.msk [vmem:[#allocation3] sm:$0xff] %vm125_vm1, %v199_v61  ;;  %298 = vst.msk [vmem:[#allocation4 + $0x8] sm:$0xff] %vm125_vm1, %v294_v62  ;;  %v289_v1 = vadd.f32 %v4625_v57, %v288_v63 }
 0x10f   :  { %297 = vst.msk [vmem:[#allocation4] sm:$0xff] %vm125_vm1, %v289_v1 }
 0x112   :  { %v5031_v3 = vpop.f32.mrf.mxu0 }
 0x113   :  { %v384_v5 = vadd.f32 %v5031_v3, %v4628_v2 }
 0x114   :  { %v378_v6 = vpop.f32.mrf.mxu0  ;;  %v5042_v7 = vpop.f32.mrf.mxu1  ;;  %v998_v23 = vld [vmem:[#allocation3] sm:$0x3] }
 0x115   :  { %388 = vst.msk [vmem:[#allocation5 + $0x8] sm:$0xff] %vm125_vm1, %v384_v5  ;;  %v379_v8 = vadd.f32 %v4628_v2, %v378_v6  ;;  %v480_v9 = vadd.f32 %v5042_v7, %v4631_v4 }
 0x116   :  { %v474_v10 = vpop.f32.mrf.mxu1  ;;  %v1006_v28 = vld [vmem:[#allocation4] sm:$0x3] }
 0x117   :  { %387 = vst.msk [vmem:[#allocation5] sm:$0xff] %vm125_vm1, %v379_v8  ;;  %484 = vst.msk [vmem:[#allocation6 + $0x8] sm:$0xff] %vm125_vm1, %v480_v9  ;;  %v475_v11 = vadd.f32 %v4631_v4, %v474_v10 }
 0x119   :  { %483 = vst.msk [vmem:[#allocation6] sm:$0xff] %vm125_vm1, %v475_v11 }
 0x11c   :  { %v5053_v13 = vpop.f32.mrf.mxu0 }
 0x11d   :  { %v570_v15 = vadd.f32 %v5053_v13, %v4634_v12 }
 0x11e   :  { %v564_v16 = vpop.f32.mrf.mxu0  ;;  %v5064_v17 = vpop.f32.mrf.mxu1  ;;  %v1093_v57 = vld [vmem:[#allocation6 + $0xe] sm:$0x3] }
 0x11f   :  { %574 = vst.msk [vmem:[#allocation7 + $0x8] sm:$0xff] %vm125_vm1, %v570_v15  ;;  %v565_v18 = vadd.f32 %v4634_v12, %v564_v16  ;;  %v660_v19 = vadd.f32 %v5064_v17, %v4637_v14  ;;  %v6199_v12 = vld [vmem:[%s6855_s5] ss:$0 sm:$0xff] }
 0x120   :  { %v654_v20 = vpop.f32.mrf.mxu1 }
 0x121   :  { %573 = vst.msk [vmem:[#allocation7] sm:$0xff] %vm125_vm1, %v565_v18  ;;  %664 = vst.msk [vmem:[#allocation8 + $0x8] sm:$0xff] %vm125_vm1, %v660_v19  ;;  %v655_v21 = vadd.f32 %v4637_v14, %v654_v20  ;;  %v1014_v19 = vld [vmem:[#allocation5] sm:$0x3] }
 0x123   :  { %663 = vst.msk [vmem:[#allocation8] sm:$0xff] %vm125_vm1, %v655_v21 }
 0x126   :  { %v781_v22 = vpop.f32.mrf.mxu0  ;;  %v1102_v2 = vld [vmem:[#allocation7 + $0xe] sm:$0x3] }
 0x127   :  { %v999_v24 = vadd.f32 %v998_v23, %v781_v22  ;;  %v6205_v22 = vld [vmem:[%s6855_s5 + $0x1] ss:$0 sm:$0xff] }
 0x128   :  { %v851_v25 = vpop.f32.mrf.mxu1  ;;  %v5075_v26 = vpop.f32.mrf.mxu0 }
 0x129   :  { %v4647_v27 = vmul.f32 -1.442695, %v999_v24  ;;  %v1007_v56 = vadd.f32 %v1006_v28, %v851_v25 }
 0x12a   :  { %v5086_v55 = vpop.f32.mrf.mxu1 }
 0x12b   :  { %5606 = vpow2.f32 %v4647_v27  ;;  %v4648_v58 = vmul.f32 -1.442695, %v1007_v56  ;;  %v1111_v27 = vld [vmem:[#allocation8 + $0xe] sm:$0x3] }
 0x12d   :  { %5608 = vpow2.f32 %v4648_v58 }
 0x130   :  { %v924_v59 = vpop.f32.mrf.mxu0 }
 0x131   :  { %v994_v60 = vpop.f32.mrf.mxu1  ;;  %v1094_v61 = vadd.f32 %v1093_v57, %v924_v59 }
 0x132   :  { %v5097_v62 = vpop.f32.mrf.mxu0  ;;  %v1103_v4 = vadd.f32 %v1102_v2, %v994_v60 }
 0x133   :  { %v5108_v63 = vpop.f32.mrf.mxu1  ;;  %v4650_v1 = vmul.f32 -1.442695, %v1094_v61 }
 0x134   :  { %v4651_v7 = vmul.f32 -1.442695, %v1103_v4 }
 0x135   :  { %5610 = vpow2.f32 %v4650_v1 }
 0x138   :  { %v5607_v3 = vpop.eup %5606 }
 0x139   :  { %v1003_v5 = vadd.f32 1.0, %v5607_v3  ;;  %v1081_v6 = vpop.f32.mrf.mxu0  ;;  %v1480_v3 = vld [vmem:[#allocation3 + $0x2] sm:$0x3] }
 0x13a   :  { %v5609_v11 = vpop.eup %5608  ;;  %v1082_v16 = vadd.f32 %v6199_v12, %v1081_v6 }
 0x13b   :  { %5612 = vrcp.f32 %v1003_v5  ;;  %v5119_v8 = vpop.f32.mrf.mxu0  ;;  %v1178_v9 = vpop.f32.mrf.mxu1  ;;  %v1011_v15 = vadd.f32 1.0, %v5609_v11 }
 0x13c   :  { %5614 = vpow2.f32 %v4651_v7  ;;  %v1179_v24 = vadd.f32 %v6205_v22, %v1178_v9  ;;  %v1489_v9 = vld [vmem:[#allocation4 + $0x2] sm:$0x3] }
 0x13d   :  { %v5130_v10 = vpop.f32.mrf.mxu1 }
 0x142   :  { %v5611_v13 = vpop.eup %5610 }
 0x143   :  { %v1098_v14 = vadd.f32 1.0, %v5611_v13 }
 0x145   :  { %5616 = vrcp.f32 %v1098_v14  ;;  %v1577_v14 = vld [vmem:[#allocation6 + $0xc] sm:$0x3] }
 0x146   :  { %5618 = vrcp.f32 %v1011_v15 }
 0x148   :  { %v5613_v17 = vpop.eup %5612 }
 0x149   :  { %v1085_v18 = vmul.f32 %v5613_v17, %v1082_v16  ;;  %v5615_v21 = vpop.eup %5614 }
 0x14a   :  { %v1107_v23 = vadd.f32 1.0, %v5615_v21 }
 0x14b   :  { %v1086_v20 = vadd.f32 %v1085_v18, %v1014_v19 }
 0x14d   :  { %5620 = vtanh.f32 %v1086_v20  ;;  %v1586_v20 = vld [vmem:[#allocation7 + $0xc] sm:$0x3] }
 0x14e   :  { %5622 = vrcp.f32 %v1107_v23 }
 0x152   :  { %v5617_v25 = vpop.eup %5616 }
 0x153   :  { %v1182_v26 = vmul.f32 %v5617_v25, %v1179_v24  ;;  %v5619_v28 = vpop.eup %5618 }
 0x154   :  { %v1088_v56 = vsub.f32 1.0, %v5619_v28  ;;  %v1090_v59 = vmul.f32 %v5619_v28, %v6066_v37 }
 0x155   :  { %v1183_v55 = vadd.f32 %v1182_v26, %v1111_v27 }
 0x157   :  { %5624 = vtanh.f32 %v1183_v55 }
 0x15a   :  { %v5621_v57 = vpop.eup %5620 }
 0x15b   :  { %v1089_v58 = vmul.f32 %v5621_v57, %v1088_v56  ;;  %v5623_v61 = vpop.eup %5622 }
 0x15c   :  { %v1185_v37 = vsub.f32 1.0, %v5623_v61  ;;  %v1187_v1 = vmul.f32 %v5623_v61, %v6110_v46 }
 0x15d   :  { %v6209_v60 = vadd.f32 %v1090_v59, %v1089_v58 }
 0x15f   :  { %5140 = vmatmul.mubr.msk.f32.vlgmr.msra.gmra.mxu0 %vm125_vm1, %v6209_v60  ;;  %1190 = vst.msk [vmem:[#allocation18] sm:$0x3] %vm107_vm0, %v6209_v60  ;;  %5151 = vmatmul.mubr.msk.f32.vlgmr.msra.gmra.mxu1 %vm125_vm1, %v6209_v60 }
 0x160   :  { %5154 = vmatpush3.msra.mxu0 %v6076_v38  ;;  %5165 = vmatpush3.msra.mxu1 %v6078_v39 }
 0x161   :  { %5155 = vmatprep.subr.mxu0 %v5951_v0  ;;  %5166 = vmatprep.subr.mxu1 %v5951_v0 }
 0x162   :  { %5156 = vmatpush3.msra.mxu0 %v6086_v40  ;;  %5167 = vmatpush3.msra.mxu1 %v6088_v41 }
 0x163   :  { %5157 = vmatprep.subr.mxu0 %v5951_v0  ;;  %5168 = vmatprep.subr.mxu1 %v5951_v0 }
 0x164   :  { %5158 = vmatpush3.msra.mxu0 %v6094_v42  ;;  %5169 = vmatpush3.msra.mxu1 %v6096_v43  ;;  %v5625_v62 = vpop.eup %5624 }
 0x165   :  { %5159 = vmatprep.subr.mxu0 %v5951_v0  ;;  %5170 = vmatprep.subr.mxu1 %v5951_v0  ;;  %v1186_v63 = vmul.f32 %v5625_v62, %v1185_v37 }
 0x166   :  { %5160 = vmatpush3.msra.mxu0 %v6102_v44  ;;  %5171 = vmatpush3.msra.mxu1 %v6106_v45 }
 0x167   :  { %5161 = vmatprep.mubr.msk.f32.mxu0 %vm5952_vm2, %v5951_v0  ;;  %5172 = vmatprep.mubr.msk.f32.mxu1 %vm5952_vm2, %v5951_v0  ;;  %v6238_v2 = vadd.f32 %v1187_v1, %v1186_v63  ;;  %v1498_v63 = vld [vmem:[#allocation5 + $0x2] sm:$0x3] }
 0x168   :  { %5175 = vmatprep.subr.mxu0 %v5951_v0  ;;  %5186 = vmatprep.subr.mxu1 %v5951_v0 }
 0x169   :  { %5162 = vmatmul.mubr.msk.f32.vlgmr.msra.gmra.mxu0 %vm125_vm1, %v6238_v2  ;;  %1192 = vst.msk [vmem:[#allocation19 + $0xe] sm:$0x3] %vm107_vm0, %v6238_v2  ;;  %5173 = vmatmul.mubr.msk.f32.vlgmr.msra.gmra.mxu1 %vm125_vm1, %v6238_v2 }
 0x16a   :  { %5176 = vmatpush3.msra.mxu0 %v6118_v47  ;;  %5187 = vmatpush3.msra.mxu1 %v6124_v48 }
 0x16b   :  { %5177 = vmatprep.subr.mxu0 %v5951_v0  ;;  %5188 = vmatprep.subr.mxu1 %v5951_v0 }
 0x16c   :  { %5178 = vmatpush3.msra.mxu0 %v6127_v49  ;;  %5189 = vmatpush3.msra.mxu1 %v6133_v50 }
 0x16d   :  { %5179 = vmatprep.subr.mxu0 %v5951_v0  ;;  %5190 = vmatprep.subr.mxu1 %v5951_v0 }
 0x16e   :  { %5180 = vmatpush3.msra.mxu0 %v6136_v51  ;;  %5191 = vmatpush3.msra.mxu1 %v6141_v52 }
 0x16f   :  { %5181 = vmatprep.subr.mxu0 %v5951_v0  ;;  %5192 = vmatprep.subr.mxu1 %v5951_v0 }
 0x170   :  { %5182 = vmatpush3.msra.mxu0 %v6144_v53  ;;  %5183 = vmatprep.mubr.msk.f32.mxu0 %vm5952_vm2, %v5951_v0 }
 0x171   :  { %5193 = vmatpush3.msra.mxu1 %v6149_v54  ;;  %5194 = vmatprep.mubr.msk.f32.mxu1 %vm5952_vm2, %v5951_v0 }
 0x172   :  { %5184 = vmatmul.mubr.msk.f32.vlgmr.msra.gmra.mxu0 %vm125_vm1, %v6209_v60  ;;  %5195 = vmatmul.mubr.msk.f32.vlgmr.msra.gmra.mxu1 %vm125_vm1, %v6238_v2 }
 0x173   :  { %5197 = vmatprep.subr.mxu0 %v5951_v0  ;;  %5208 = vmatprep.subr.mxu1 %v5951_v0 }
 0x174   :  { %5198 = vmatpush3.msra.mxu0 %v6036_v29  ;;  %5209 = vmatpush3.msra.mxu1 %v6038_v30 }
 0x175   :  { %5199 = vmatprep.subr.mxu0 %v5951_v0  ;;  %5210 = vmatprep.subr.mxu1 %v5951_v0 }
 0x176   :  { %5200 = vmatpush3.msra.mxu0 %v6044_v31  ;;  %5211 = vmatpush3.msra.mxu1 %v6046_v32 }
 0x177   :  { %5201 = vmatprep.subr.mxu0 %v5951_v0  ;;  %5212 = vmatprep.subr.mxu1 %v5951_v0 }
 0x178   :  { %5202 = vmatpush3.msra.mxu0 %v6052_v33  ;;  %5213 = vmatpush3.msra.mxu1 %v6054_v34 }
 0x179   :  { %5203 = vmatprep.subr.mxu0 %v5951_v0  ;;  %5214 = vmatprep.subr.mxu1 %v5951_v0 }
 0x17a   :  { %5204 = vmatpush3.msra.mxu0 %v6060_v35  ;;  %5215 = vmatpush3.msra.mxu1 %v6064_v36 }
 0x17b   :  { %5205 = vmatprep.mubr.msk.f32.mxu0 %vm5952_vm2, %v5951_v0  ;;  %5216 = vmatprep.mubr.msk.f32.mxu1 %vm5952_vm2, %v5951_v0 }
 0x17c   :  { %5219 = vmatprep.subr.mxu0 %v5951_v0  ;;  %5230 = vmatprep.subr.mxu1 %v5951_v0 }
 0x21f   :  { %v1262_v46 = vpop.f32.mrf.mxu0  ;;  %v1332_v4 = vpop.f32.mrf.mxu1 }
 0x220   :  { %v1481_v5 = vadd.f32 %v1480_v3, %v1262_v46  ;;  %v1490_v10 = vadd.f32 %v1489_v9, %v1332_v4 }
 0x221   :  { %v5141_v6 = vpop.f32.mrf.mxu0  ;;  %v5152_v7 = vpop.f32.mrf.mxu1 }
 0x222   :  { %v4657_v8 = vmul.f32 -1.442695, %v1481_v5  ;;  %v4658_v11 = vmul.f32 -1.442695, %v1490_v10  ;;  %v1595_v7 = vld [vmem:[#allocation8 + $0xc] sm:$0x3] }
 0x224   :  { %5626 = vpow2.f32 %v4657_v8 }
 0x225   :  { %5628 = vpow2.f32 %v4658_v11 }
 0x229   :  { %v1405_v13 = vpop.f32.mrf.mxu0  ;;  %v1475_v15 = vpop.f32.mrf.mxu1 }
 0x22a   :  { %v1578_v16 = vadd.f32 %v1577_v14, %v1405_v13  ;;  %v1587_v23 = vadd.f32 %v1586_v20, %v1475_v15 }
 0x22b   :  { %v5163_v17 = vpop.f32.mrf.mxu0  ;;  %v5174_v18 = vpop.f32.mrf.mxu1 }
 0x22c   :  { %v4660_v19 = vmul.f32 -1.442695, %v1578_v16  ;;  %v4661_v27 = vmul.f32 -1.442695, %v1587_v23 }
 0x22e   :  { %5630 = vpow2.f32 %v4660_v19 }
 0x231   :  { %v5627_v21 = vpop.eup %5626 }
 0x232   :  { %v1485_v24 = vadd.f32 1.0, %v5627_v21  ;;  %v1565_v25 = vpop.f32.mrf.mxu0  ;;  %v1662_v26 = vpop.f32.mrf.mxu1 }
 0x233   :  { %v5629_v56 = vpop.eup %5628  ;;  %v1566_v61 = vadd.f32 %v6199_v12, %v1565_v25  ;;  %v1663_v4 = vadd.f32 %v6205_v22, %v1662_v26  ;;  %v1973_v26 = vld [vmem:[#allocation4 + $0x4] sm:$0x3] }
 0x234   :  { %5632 = vrcp.f32 %v1485_v24  ;;  %v5185_v28 = vpop.f32.mrf.mxu0  ;;  %v5196_v55 = vpop.f32.mrf.mxu1  ;;  %v1494_v59 = vadd.f32 1.0, %v5629_v56  ;;  %v2061_v56 = vld [vmem:[#allocation6 + $0xa] sm:$0x3] }
 0x235   :  { %5634 = vpow2.f32 %v4661_v27 }
 0x23b   :  { %v5631_v57 = vpop.eup %5630 }
 0x23c   :  { %v1582_v58 = vadd.f32 1.0, %v5631_v57 }
 0x23e   :  { %5636 = vrcp.f32 %v1582_v58 }
 0x23f   :  { %5638 = vrcp.f32 %v1494_v59 }
 0x241   :  { %v5633_v37 = vpop.eup %5632 }
 0x242   :  { %v1569_v62 = vmul.f32 %v5633_v37, %v1566_v61  ;;  %v5635_v46 = vpop.eup %5634 }
 0x243   :  { %v1591_v3 = vadd.f32 1.0, %v5635_v46 }
 0x244   :  { %v1570_v1 = vadd.f32 %v1569_v62, %v1498_v63  ;;  %v2070_v62 = vld [vmem:[#allocation7 + $0xa] sm:$0x3] }
 0x246   :  { %5640 = vtanh.f32 %v1570_v1 }
 0x247   :  { %5642 = vrcp.f32 %v1591_v3 }
 0x24b   :  { %v5637_v5 = vpop.eup %5636 }
 0x24c   :  { %v1666_v6 = vmul.f32 %v5637_v5, %v1663_v4  ;;  %v5639_v8 = vpop.eup %5638 }
 0x24d   :  { %v1572_v10 = vsub.f32 1.0, %v5639_v8  ;;  %v1574_v14 = vmul.f32 %v5639_v8, %v6209_v60 }
 0x24e   :  { %v1667_v9 = vadd.f32 %v1666_v6, %v1595_v7 }
 0x250   :  { %5644 = vtanh.f32 %v1667_v9 }
 0x253   :  { %v5641_v11 = vpop.eup %5640 }
 0x254   :  { %v1573_v13 = vmul.f32 %v5641_v11, %v1572_v10  ;;  %v5643_v16 = vpop.eup %5642 }
 0x255   :  { %v1669_v60 = vsub.f32 1.0, %v5643_v16  ;;  %v1671_v19 = vmul.f32 %v5643_v16, %v6238_v2 }
 0x256   :  { %v6293_v15 = vadd.f32 %v1574_v14, %v1573_v13 }
 0x258   :  { %5206 = vmatmul.mubr.msk.f32.vlgmr.msra.gmra.mxu0 %vm125_vm1, %v6293_v15  ;;  %1674 = vst.msk [vmem:[#allocation18 + $0x2] sm:$0x3] %vm107_vm0, %v6293_v15  ;;  %5217 = vmatmul.mubr.msk.f32.vlgmr.msra.gmra.mxu1 %vm125_vm1, %v6293_v15 }
 0x259   :  { %5220 = vmatpush3.msra.mxu0 %v6076_v38  ;;  %5231 = vmatpush3.msra.mxu1 %v6078_v39 }
 0x25a   :  { %5221 = vmatprep.subr.mxu0 %v5951_v0  ;;  %5232 = vmatprep.subr.mxu1 %v5951_v0 }
 0x25b   :  { %5222 = vmatpush3.msra.mxu0 %v6086_v40  ;;  %5233 = vmatpush3.msra.mxu1 %v6088_v41 }
 0x25c   :  { %5223 = vmatprep.subr.mxu0 %v5951_v0  ;;  %5234 = vmatprep.subr.mxu1 %v5951_v0 }
 0x25d   :  { %5224 = vmatpush3.msra.mxu0 %v6094_v42  ;;  %5235 = vmatpush3.msra.mxu1 %v6096_v43  ;;  %v5645_v17 = vpop.eup %5644 }
 0x25e   :  { %5225 = vmatprep.subr.mxu0 %v5951_v0  ;;  %5236 = vmatprep.subr.mxu1 %v5951_v0  ;;  %v1670_v18 = vmul.f32 %v5645_v17, %v1669_v60  ;;  %v1982_v60 = vld [vmem:[#allocation5 + $0x4] sm:$0x3] }
 0x25f   :  { %5226 = vmatpush3.msra.mxu0 %v6102_v44  ;;  %5237 = vmatpush3.msra.mxu1 %v6106_v45 }
 0x260   :  { %5227 = vmatprep.mubr.msk.f32.mxu0 %vm5952_vm2, %v5951_v0  ;;  %5238 = vmatprep.mubr.msk.f32.mxu1 %vm5952_vm2, %v5951_v0  ;;  %v6322_v20 = vadd.f32 %v1671_v19, %v1670_v18 }
 0x261   :  { %5241 = vmatprep.subr.mxu0 %v5951_v0  ;;  %5252 = vmatprep.subr.mxu1 %v5951_v0 }
 0x262   :  { %5228 = vmatmul.mubr.msk.f32.vlgmr.msra.gmra.mxu0 %vm125_vm1, %v6322_v20  ;;  %1676 = vst.msk [vmem:[#allocation19 + $0xc] sm:$0x3] %vm107_vm0, %v6322_v20  ;;  %5239 = vmatmul.mubr.msk.f32.vlgmr.msra.gmra.mxu1 %vm125_vm1, %v6322_v20 }
 0x263   :  { %5242 = vmatpush3.msra.mxu0 %v6118_v47  ;;  %5253 = vmatpush3.msra.mxu1 %v6124_v48 }
 0x264   :  { %5243 = vmatprep.subr.mxu0 %v5951_v0  ;;  %5254 = vmatprep.subr.mxu1 %v5951_v0 }
 0x265   :  { %5244 = vmatpush3.msra.mxu0 %v6127_v49  ;;  %5255 = vmatpush3.msra.mxu1 %v6133_v50 }
 0x266   :  { %5245 = vmatprep.subr.mxu0 %v5951_v0  ;;  %5256 = vmatprep.subr.mxu1 %v5951_v0 }
 0x267   :  { %5246 = vmatpush3.msra.mxu0 %v6136_v51  ;;  %5257 = vmatpush3.msra.mxu1 %v6141_v52 }
 0x268   :  { %5247 = vmatprep.subr.mxu0 %v5951_v0  ;;  %5258 = vmatprep.subr.mxu1 %v5951_v0 }
 0x269   :  { %5248 = vmatpush3.msra.mxu0 %v6144_v53  ;;  %5249 = vmatprep.mubr.msk.f32.mxu0 %vm5952_vm2, %v5951_v0 }
 0x26a   :  { %5259 = vmatpush3.msra.mxu1 %v6149_v54  ;;  %5260 = vmatprep.mubr.msk.f32.mxu1 %vm5952_vm2, %v5951_v0 }
 0x26b   :  { %5250 = vmatmul.mubr.msk.f32.vlgmr.msra.gmra.mxu0 %vm125_vm1, %v6293_v15  ;;  %5261 = vmatmul.mubr.msk.f32.vlgmr.msra.gmra.mxu1 %vm125_vm1, %v6322_v20 }
 0x26c   :  { %5263 = vmatprep.subr.mxu0 %v5951_v0  ;;  %5274 = vmatprep.subr.mxu1 %v5951_v0 }
 0x26d   :  { %5264 = vmatpush3.msra.mxu0 %v6036_v29  ;;  %5275 = vmatpush3.msra.mxu1 %v6038_v30  ;;  %v1964_v30 = vld [vmem:[#allocation3 + $0x4] sm:$0x3] }
 0x26e   :  { %5265 = vmatprep.subr.mxu0 %v5951_v0  ;;  %5276 = vmatprep.subr.mxu1 %v5951_v0 }
 0x26f   :  { %5266 = vmatpush3.msra.mxu0 %v6044_v31  ;;  %5277 = vmatpush3.msra.mxu1 %v6046_v32 }
 0x270   :  { %5267 = vmatprep.subr.mxu0 %v5951_v0  ;;  %5278 = vmatprep.subr.mxu1 %v5951_v0 }
 0x271   :  { %5268 = vmatpush3.msra.mxu0 %v6052_v33  ;;  %5279 = vmatpush3.msra.mxu1 %v6054_v34 }
 0x272   :  { %5269 = vmatprep.subr.mxu0 %v5951_v0  ;;  %5280 = vmatprep.subr.mxu1 %v5951_v0 }
 0x273   :  { %5270 = vmatpush3.msra.mxu0 %v6060_v35  ;;  %5281 = vmatpush3.msra.mxu1 %v6064_v36 }
 0x274   :  { %5271 = vmatprep.mubr.msk.f32.mxu0 %vm5952_vm2, %v5951_v0  ;;  %5282 = vmatprep.mubr.msk.f32.mxu1 %vm5952_vm2, %v5951_v0 }
 0x275   :  { %5285 = vmatprep.subr.mxu0 %v5951_v0  ;;  %5296 = vmatprep.subr.mxu1 %v5951_v0 }
 0x318   :  { %v1746_v29 = vpop.f32.mrf.mxu0  ;;  %v1816_v2 = vpop.f32.mrf.mxu1 }
 0x319   :  { %v1965_v21 = vadd.f32 %v1964_v30, %v1746_v29  ;;  %v1974_v27 = vadd.f32 %v1973_v26, %v1816_v2 }
 0x31a   :  { %v5207_v23 = vpop.f32.mrf.mxu0  ;;  %v5218_v24 = vpop.f32.mrf.mxu1 }
 0x31b   :  { %v4667_v25 = vmul.f32 -1.442695, %v1965_v21  ;;  %v4668_v28 = vmul.f32 -1.442695, %v1974_v27  ;;  %v2079_v21 = vld [vmem:[#allocation8 + $0xa] sm:$0x3] }
 0x31d   :  { %5646 = vpow2.f32 %v4667_v25 }
 0x31e   :  { %5648 = vpow2.f32 %v4668_v28 }
 0x322   :  { %v1889_v55 = vpop.f32.mrf.mxu0  ;;  %v1959_v57 = vpop.f32.mrf.mxu1 }
 0x323   :  { %v2062_v58 = vadd.f32 %v2061_v56, %v1889_v55  ;;  %v2071_v1 = vadd.f32 %v2070_v62, %v1959_v57  ;;  %v2554_v57 = vld [vmem:[#allocation7 + $0x8] sm:$0x3] }
 0x324   :  { %v5229_v59 = vpop.f32.mrf.mxu0  ;;  %v5240_v61 = vpop.f32.mrf.mxu1 }
 0x325   :  { %v4670_v37 = vmul.f32 -1.442695, %v2062_v58  ;;  %v4671_v5 = vmul.f32 -1.442695, %v2071_v1 }
 0x327   :  { %5650 = vpow2.f32 %v4670_v37 }
 0x32a   :  { %v5647_v63 = vpop.eup %5646 }
 0x32b   :  { %v1969_v46 = vadd.f32 1.0, %v5647_v63  ;;  %v2049_v3 = vpop.f32.mrf.mxu0  ;;  %v2146_v4 = vpop.f32.mrf.mxu1 }
 0x32c   :  { %v5649_v8 = vpop.eup %5648  ;;  %v2050_v13 = vadd.f32 %v6199_v12, %v2049_v3  ;;  %v2147_v29 = vadd.f32 %v6205_v22, %v2146_v4 }
 0x32d   :  { %5652 = vrcp.f32 %v1969_v46  ;;  %v5251_v6 = vpop.f32.mrf.mxu0  ;;  %v5262_v7 = vpop.f32.mrf.mxu1  ;;  %v1978_v11 = vadd.f32 1.0, %v5649_v8 }
 0x32e   :  { %5654 = vpow2.f32 %v4671_v5 }
 0x334   :  { %v5651_v9 = vpop.eup %5650 }
 0x335   :  { %v2066_v10 = vadd.f32 1.0, %v5651_v9 }
 0x337   :  { %5656 = vrcp.f32 %v2066_v10  ;;  %v2466_v10 = vld [vmem:[#allocation5 + $0x6] sm:$0x3] }
 0x338   :  { %5658 = vrcp.f32 %v1978_v11 }
 0x33a   :  { %v5653_v14 = vpop.eup %5652 }
 0x33b   :  { %v2053_v16 = vmul.f32 %v5653_v14, %v2050_v13  ;;  %v5655_v18 = vpop.eup %5654 }
 0x33c   :  { %v2075_v19 = vadd.f32 1.0, %v5655_v18  ;;  %v2563_v18 = vld [vmem:[#allocation8 + $0x8] sm:$0x3] }
 0x33d   :  { %v2054_v17 = vadd.f32 %v2053_v16, %v1982_v60 }
 0x33f   :  { %5660 = vtanh.f32 %v2054_v17 }
 0x340   :  { %5662 = vrcp.f32 %v2075_v19 }
 0x344   :  { %v5657_v30 = vpop.eup %5656 }
 0x345   :  { %v2150_v2 = vmul.f32 %v5657_v30, %v2147_v29  ;;  %v5659_v23 = vpop.eup %5658 }
 0x346   :  { %v2056_v25 = vsub.f32 1.0, %v5659_v23  ;;  %v2058_v28 = vmul.f32 %v5659_v23, %v6293_v15 }
 0x347   :  { %v2151_v24 = vadd.f32 %v2150_v2, %v2079_v21 }
 0x349   :  { %5664 = vtanh.f32 %v2151_v24 }
 0x34c   :  { %v5661_v26 = vpop.eup %5660 }
 0x34d   :  { %v2057_v27 = vmul.f32 %v5661_v26, %v2056_v25  ;;  %v5663_v56 = vpop.eup %5662  ;;  %v6473_v25 = vld [vmem:[#allocation17 + $0x78] sm:$0xff] }
 0x34e   :  { %v6476_v26 = vld [vmem:[#allocation17 + $0x98] sm:$0xff] }
 0x34f   :  { %v6377_v55 = vadd.f32 %v2058_v28, %v2057_v27  ;;  %v6481_v28 = vld [vmem:[#allocation17 + $0x70] sm:$0xff] }
 0x351   :  { %5272 = vmatmul.mubr.msk.f32.vlgmr.msra.gmra.mxu0 %vm125_vm1, %v6377_v55  ;;  %2158 = vst.msk [vmem:[#allocation18 + $0x4] sm:$0x3] %vm107_vm0, %v6377_v55  ;;  %5283 = vmatmul.mubr.msk.f32.vlgmr.msra.gmra.mxu1 %vm125_vm1, %v6377_v55 }
 0x352   :  { %5286 = vmatpush3.msra.mxu0 %v6076_v38  ;;  %5297 = vmatpush3.msra.mxu1 %v6078_v39  ;;  %v2153_v38 = vsub.f32 1.0, %v5663_v56 }
 0x353   :  { %5287 = vmatprep.subr.mxu0 %v5951_v0  ;;  %5298 = vmatprep.subr.mxu1 %v5951_v0 }
 0x354   :  { %5288 = vmatpush3.msra.mxu0 %v6086_v40  ;;  %5299 = vmatpush3.msra.mxu1 %v6088_v41  ;;  %v2155_v40 = vmul.f32 %v5663_v56, %v6322_v20  ;;  %v6489_v56 = vld [vmem:[#allocation17 + $0x68] sm:$0xff] }
 0x355   :  { %5289 = vmatprep.subr.mxu0 %v5951_v0  ;;  %5300 = vmatprep.subr.mxu1 %v5951_v0 }
 0x356   :  { %5290 = vmatpush3.msra.mxu0 %v6094_v42  ;;  %5301 = vmatpush3.msra.mxu1 %v6096_v43  ;;  %v5665_v15 = vpop.eup %5664  ;;  %v6438_v42 = vld [vmem:[#allocation17 + $0x18] sm:$0xff] }
 0x357   :  { %5291 = vmatprep.subr.mxu0 %v5951_v0  ;;  %5302 = vmatprep.subr.mxu1 %v5951_v0  ;;  %v2154_v39 = vmul.f32 %v5665_v15, %v2153_v38  ;;  %v6441_v43 = vld [vmem:[#allocation17 + $0x38] sm:$0xff]  ;;  %v6492_v38 = vld [vmem:[#allocation17 + $0x88] sm:$0xff] }
 0x358   :  { %5292 = vmatpush3.msra.mxu0 %v6102_v44  ;;  %5303 = vmatpush3.msra.mxu1 %v6106_v45 }
 0x359   :  { %5293 = vmatprep.mubr.msk.f32.mxu0 %vm5952_vm2, %v5951_v0  ;;  %5304 = vmatprep.mubr.msk.f32.mxu1 %vm5952_vm2, %v5951_v0  ;;  %v6406_v41 = vadd.f32 %v2155_v40, %v2154_v39  ;;  %v6497_v40 = vld [vmem:[#allocation17 + $0x60] sm:$0xff] }
 0x35a   :  { %5307 = vmatprep.subr.mxu0 %v5951_v0  ;;  %5318 = vmatprep.subr.mxu1 %v5951_v0 }
 0x35b   :  { %5294 = vmatmul.mubr.msk.f32.vlgmr.msra.gmra.mxu0 %vm125_vm1, %v6406_v41  ;;  %2160 = vst.msk [vmem:[#allocation19 + $0xa] sm:$0x3] %vm107_vm0, %v6406_v41  ;;  %5305 = vmatmul.mubr.msk.f32.vlgmr.msra.gmra.mxu1 %vm125_vm1, %v6406_v41 }
 0x35c   :  { %5308 = vmatpush3.msra.mxu0 %v6118_v47  ;;  %5319 = vmatpush3.msra.mxu1 %v6124_v48 }
 0x35d   :  { %5309 = vmatprep.subr.mxu0 %v5951_v0  ;;  %5320 = vmatprep.subr.mxu1 %v5951_v0 }
 0x35e   :  { %5310 = vmatpush3.msra.mxu0 %v6127_v49  ;;  %5321 = vmatpush3.msra.mxu1 %v6133_v50  ;;  %v2545_v50 = vld [vmem:[#allocation6 + $0x8] sm:$0x3] }
 0x35f   :  { %5311 = vmatprep.subr.mxu0 %v5951_v0  ;;  %5322 = vmatprep.subr.mxu1 %v5951_v0 }
 0x360   :  { %5312 = vmatpush3.msra.mxu0 %v6136_v51  ;;  %5323 = vmatpush3.msra.mxu1 %v6141_v52 }
 0x361   :  { %5313 = vmatprep.subr.mxu0 %v5951_v0  ;;  %5324 = vmatprep.subr.mxu1 %v5951_v0 }
 0x362   :  { %5314 = vmatpush3.msra.mxu0 %v6144_v53  ;;  %5315 = vmatprep.mubr.msk.f32.mxu0 %vm5952_vm2, %v5951_v0 }
 0x363   :  { %5325 = vmatpush3.msra.mxu1 %v6149_v54  ;;  %5326 = vmatprep.mubr.msk.f32.mxu1 %vm5952_vm2, %v5951_v0 }
 0x364   :  { %5316 = vmatmul.mubr.msk.f32.vlgmr.msra.gmra.mxu0 %vm125_vm1, %v6377_v55  ;;  %5327 = vmatmul.mubr.msk.f32.vlgmr.msra.gmra.mxu1 %vm125_vm1, %v6406_v41 }
 0x365   :  { %5329 = vmatprep.subr.mxu0 %v5951_v0  ;;  %5340 = vmatprep.subr.mxu1 %v5951_v0 }
 0x366   :  { %5330 = vmatpush3.msra.mxu0 %v6438_v42  ;;  %5341 = vmatpush3.msra.mxu1 %v6441_v43 }
 0x367   :  { %5331 = vmatprep.subr.mxu0 %v5951_v0  ;;  %5342 = vmatprep.subr.mxu1 %v5951_v0 }
 0x368   :  { %5332 = vmatpush3.msra.mxu0 %v6044_v31  ;;  %5343 = vmatpush3.msra.mxu1 %v6046_v32  ;;  %v2448_v32 = vld [vmem:[#allocation3 + $0x6] sm:$0x3] }
 0x369   :  { %5333 = vmatprep.subr.mxu0 %v5951_v0  ;;  %5344 = vmatprep.subr.mxu1 %v5951_v0 }
 0x36a   :  { %5334 = vmatpush3.msra.mxu0 %v6052_v33  ;;  %5345 = vmatpush3.msra.mxu1 %v6054_v34 }
 0x36b   :  { %5335 = vmatprep.subr.mxu0 %v5951_v0  ;;  %5346 = vmatprep.subr.mxu1 %v5951_v0 }
 0x36c   :  { %5336 = vmatpush3.msra.mxu0 %v6060_v35  ;;  %5347 = vmatpush3.msra.mxu1 %v6064_v36  ;;  %v2457_v35 = vld [vmem:[#allocation4 + $0x6] sm:$0x3] }
 0x36d   :  { %5337 = vmatprep.mubr.msk.f32.mxu0 %vm5952_vm2, %v5951_v0  ;;  %5348 = vmatprep.mubr.msk.f32.mxu1 %vm5952_vm2, %v5951_v0 }
 0x36e   :  { %5351 = vmatprep.subr.mxu0 %v5951_v0  ;;  %5362 = vmatprep.subr.mxu1 %v5951_v0 }
 0x411   :  { %v2230_v31 = vpop.f32.mrf.mxu0  ;;  %v2300_v33 = vpop.f32.mrf.mxu1 }
 0x412   :  { %v2449_v34 = vadd.f32 %v2448_v32, %v2230_v31  ;;  %v2458_v36 = vadd.f32 %v2457_v35, %v2300_v33  ;;  %v6500_v31 = vld [vmem:[#allocation17 + $0x80] sm:$0xff]  ;;  %v6534_v35 = vld [vmem:[#allocation17 + $0x48] sm:$0xff] }
 0x413   :  { %v5273_v44 = vpop.f32.mrf.mxu0  ;;  %v5284_v45 = vpop.f32.mrf.mxu1 }
 0x414   :  { %v4677_v47 = vmul.f32 -1.442695, %v2449_v34  ;;  %v4678_v48 = vmul.f32 -1.442695, %v2458_v36  ;;  %v6521_v44 = vld [vmem:[#allocation17 + $0xb8] sm:$0xff]  ;;  %v6526_v45 = vld [vmem:[#allocation17 + $0x50] sm:$0xff] }
 0x415   :  { %v6537_v36 = vld [vmem:[#allocation17 + $0xa8] sm:$0xff] }
 0x416   :  { %5666 = vpow2.f32 %v4677_v47  ;;  %v6529_v47 = vld [vmem:[#allocation17 + $0xb0] sm:$0xff] }
 0x417   :  { %5668 = vpow2.f32 %v4678_v48  ;;  %v6542_v48 = vld [vmem:[#allocation17 + $0x40] sm:$0xff] }
 0x41b   :  { %v2373_v49 = vpop.f32.mrf.mxu0  ;;  %v2443_v51 = vpop.f32.mrf.mxu1 }
 0x41c   :  { %v2546_v52 = vadd.f32 %v2545_v50, %v2373_v49  ;;  %v2555_v59 = vadd.f32 %v2554_v57, %v2443_v51  ;;  %v6547_v49 = vld [vmem:[#allocation17 + $0xa0] sm:$0xff]  ;;  %v6562_v50 = vld [vmem:[#allocation17 + $0x10] sm:$0xff] }
 0x41d   :  { %v5295_v53 = vpop.f32.mrf.mxu0  ;;  %v5306_v54 = vpop.f32.mrf.mxu1  ;;  %v6565_v51 = vld [vmem:[#allocation17 + $0x30] sm:$0xff] }
 0x41e   :  { %v4680_v20 = vmul.f32 -1.442695, %v2546_v52  ;;  %v4681_v63 = vmul.f32 -1.442695, %v2555_v59  ;;  %v6570_v52 = vld [vmem:[#allocation17 + $0x8] sm:$0xff]  ;;  %v6578_v54 = vld [vmem:[#allocation17] sm:$0xff] }
 0x41f   :  { %v6573_v53 = vld [vmem:[#allocation17 + $0x28] sm:$0xff] }
 0x420   :  { %5670 = vpow2.f32 %v4680_v20  ;;  %v6581_v20 = vld [vmem:[#allocation17 + $0x20] sm:$0xff] }
 0x423   :  { %v5667_v58 = vpop.eup %5666 }
 0x424   :  { %v2453_v61 = vadd.f32 1.0, %v5667_v58  ;;  %v2533_v37 = vpop.f32.mrf.mxu0  ;;  %v2630_v62 = vpop.f32.mrf.mxu1  ;;  %v2932_v58 = vld [vmem:[#allocation3 + $0x8] sm:$0x3] }
 0x425   :  { %v5669_v3 = vpop.eup %5668  ;;  %v2534_v7 = vadd.f32 %v6199_v12, %v2533_v37  ;;  %v2631_v16 = vadd.f32 %v6205_v22, %v2630_v62 }
 0x426   :  { %5672 = vrcp.f32 %v2453_v61  ;;  %v5317_v1 = vpop.f32.mrf.mxu0  ;;  %v5328_v46 = vpop.f32.mrf.mxu1  ;;  %v2462_v6 = vadd.f32 1.0, %v5669_v3 }
 0x427   :  { %5674 = vpow2.f32 %v4681_v63  ;;  %v2941_v1 = vld [vmem:[#allocation4 + $0x8] sm:$0x3] }
 0x42d   :  { %v5671_v4 = vpop.eup %5670 }
 0x42e   :  { %v2550_v5 = vadd.f32 1.0, %v5671_v4 }
 0x430   :  { %5676 = vrcp.f32 %v2550_v5  ;;  %v3029_v5 = vld [vmem:[#allocation6 + $0x6] sm:$0x3] }
 0x431   :  { %5678 = vrcp.f32 %v2462_v6 }
 0x433   :  { %v5673_v8 = vpop.eup %5672 }
 0x434   :  { %v2537_v9 = vmul.f32 %v5673_v8, %v2534_v7  ;;  %v5675_v13 = vpop.eup %5674 }
 0x435   :  { %v2559_v14 = vadd.f32 1.0, %v5675_v13 }
 0x436   :  { %v2538_v11 = vadd.f32 %v2537_v9, %v2466_v10 }
 0x438   :  { %5680 = vtanh.f32 %v2538_v11  ;;  %v3038_v11 = vld [vmem:[#allocation7 + $0x6] sm:$0x3] }
 0x439   :  { %5682 = vrcp.f32 %v2559_v14 }
 0x43d   :  { %v5677_v60 = vpop.eup %5676 }
 0x43e   :  { %v2634_v17 = vmul.f32 %v5677_v60, %v2631_v16  ;;  %v5679_v19 = vpop.eup %5678 }
 0x43f   :  { %v2540_v30 = vsub.f32 1.0, %v5679_v19  ;;  %v2542_v23 = vmul.f32 %v5679_v19, %v6377_v55  ;;  %v6484_v55 = vld [vmem:[#allocation17 + $0x90] sm:$0xff] }
 0x440   :  { %v2635_v29 = vadd.f32 %v2634_v17, %v2563_v18 }
 0x442   :  { %5684 = vtanh.f32 %v2635_v29 }
 0x445   :  { %v5681_v2 = vpop.eup %5680 }
 0x446   :  { %v2541_v21 = vmul.f32 %v5681_v2, %v2540_v30  ;;  %v5683_v27 = vpop.eup %5682 }
 0x447   :  { %v2637_v15 = vsub.f32 1.0, %v5683_v27  ;;  %v2639_v33 = vmul.f32 %v5683_v27, %v6406_v41  ;;  %v6518_v41 = vld [vmem:[#allocation17 + $0x58] sm:$0xff] }
 0x448   :  { %v6465_v24 = vadd.f32 %v2542_v23, %v2541_v21 }
 0x44a   :  { %5338 = vmatmul.mubr.msk.f32.vlgmr.msra.gmra.mxu0 %vm125_vm1, %v6465_v24  ;;  %2642 = vst.msk [vmem:[#allocation18 + $0x6] sm:$0x3] %vm107_vm0, %v6465_v24  ;;  %5349 = vmatmul.mubr.msk.f32.vlgmr.msra.gmra.mxu1 %vm125_vm1, %v6465_v24 }
 0x44b   :  { %5352 = vmatpush3.msra.mxu0 %v6473_v25  ;;  %5363 = vmatpush3.msra.mxu1 %v6476_v26 }
 0x44c   :  { %5353 = vmatprep.subr.mxu0 %v5951_v0  ;;  %5364 = vmatprep.subr.mxu1 %v5951_v0 }
 0x44d   :  { %5354 = vmatpush3.msra.mxu0 %v6481_v28  ;;  %5365 = vmatpush3.msra.mxu1 %v6484_v55 }
 0x44e   :  { %5355 = vmatprep.subr.mxu0 %v5951_v0  ;;  %5366 = vmatprep.subr.mxu1 %v5951_v0 }
 0x44f   :  { %5356 = vmatpush3.msra.mxu0 %v6489_v56  ;;  %5367 = vmatpush3.msra.mxu1 %v6492_v38  ;;  %v5685_v39 = vpop.eup %5684 }
 0x450   :  { %5357 = vmatprep.subr.mxu0 %v5951_v0  ;;  %5368 = vmatprep.subr.mxu1 %v5951_v0  ;;  %v2638_v32 = vmul.f32 %v5685_v39, %v2637_v15 }
 0x451   :  { %5358 = vmatpush3.msra.mxu0 %v6497_v40  ;;  %5369 = vmatpush3.msra.mxu1 %v6500_v31 }
 0x452   :  { %5359 = vmatprep.mubr.msk.f32.mxu0 %vm5952_vm2, %v5951_v0  ;;  %5370 = vmatprep.mubr.msk.f32.mxu1 %vm5952_vm2, %v5951_v0  ;;  %v6510_v34 = vadd.f32 %v2639_v33, %v2638_v32  ;;  %v2950_v32 = vld [vmem:[#allocation5 + $0x8] sm:$0x3] }
 0x453   :  { %5373 = vmatprep.subr.mxu0 %v5951_v0  ;;  %5384 = vmatprep.subr.mxu1 %v5951_v0 }
 0x454   :  { %5360 = vmatmul.mubr.msk.f32.vlgmr.msra.gmra.mxu0 %vm125_vm1, %v6510_v34  ;;  %2644 = vst.msk [vmem:[#allocation19 + $0x8] sm:$0x3] %vm107_vm0, %v6510_v34  ;;  %5371 = vmatmul.mubr.msk.f32.vlgmr.msra.gmra.mxu1 %vm125_vm1, %v6510_v34 }
 0x455   :  { %5374 = vmatpush3.msra.mxu0 %v6518_v41  ;;  %5385 = vmatpush3.msra.mxu1 %v6521_v44 }
 0x456   :  { %5375 = vmatprep.subr.mxu0 %v5951_v0  ;;  %5386 = vmatprep.subr.mxu1 %v5951_v0 }
 0x457   :  { %5376 = vmatpush3.msra.mxu0 %v6526_v45  ;;  %5387 = vmatpush3.msra.mxu1 %v6529_v47 }
 0x458   :  { %5377 = vmatprep.subr.mxu0 %v5951_v0  ;;  %5388 = vmatprep.subr.mxu1 %v5951_v0 }
 0x459   :  { %5378 = vmatpush3.msra.mxu0 %v6534_v35  ;;  %5389 = vmatpush3.msra.mxu1 %v6537_v36 }
 0x45a   :  { %5379 = vmatprep.subr.mxu0 %v5951_v0  ;;  %5390 = vmatprep.subr.mxu1 %v5951_v0 }
 0x45b   :  { %5380 = vmatpush3.msra.mxu0 %v6542_v48  ;;  %5381 = vmatprep.mubr.msk.f32.mxu0 %vm5952_vm2, %v5951_v0 }
 0x45c   :  { %5391 = vmatpush3.msra.mxu1 %v6547_v49  ;;  %5392 = vmatprep.mubr.msk.f32.mxu1 %vm5952_vm2, %v5951_v0 }
 0x45d   :  { %5382 = vmatmul.mubr.msk.f32.vlgmr.msra.gmra.mxu0 %vm125_vm1, %v6465_v24  ;;  %5393 = vmatmul.mubr.msk.f32.vlgmr.msra.gmra.mxu1 %vm125_vm1, %v6510_v34 }
 0x45e   :  { %5395 = vmatprep.subr.mxu0 %v5951_v0  ;;  %5406 = vmatprep.subr.mxu1 %v5951_v0 }
 0x45f   :  { %5396 = vmatpush3.msra.mxu0 %v6438_v42  ;;  %5407 = vmatpush3.msra.mxu1 %v6441_v43 }
 0x460   :  { %5397 = vmatprep.subr.mxu0 %v5951_v0  ;;  %5408 = vmatprep.subr.mxu1 %v5951_v0 }
 0x461   :  { %5398 = vmatpush3.msra.mxu0 %v6562_v50  ;;  %5409 = vmatpush3.msra.mxu1 %v6565_v51 }
 0x462   :  { %5399 = vmatprep.subr.mxu0 %v5951_v0  ;;  %5410 = vmatprep.subr.mxu1 %v5951_v0 }
 0x463   :  { %5400 = vmatpush3.msra.mxu0 %v6570_v52  ;;  %5411 = vmatpush3.msra.mxu1 %v6573_v53 }
 0x464   :  { %5401 = vmatprep.subr.mxu0 %v5951_v0  ;;  %5412 = vmatprep.subr.mxu1 %v5951_v0 }
 0x465   :  { %5402 = vmatpush3.msra.mxu0 %v6578_v54  ;;  %5413 = vmatpush3.msra.mxu1 %v6581_v20 }
 0x466   :  { %5403 = vmatprep.mubr.msk.f32.mxu0 %vm5952_vm2, %v5951_v0  ;;  %5414 = vmatprep.mubr.msk.f32.mxu1 %vm5952_vm2, %v5951_v0 }
 0x467   :  { %5417 = vmatprep.subr.mxu0 %v5951_v0  ;;  %5428 = vmatprep.subr.mxu1 %v5951_v0 }
 0x50a   :  { %v2714_v57 = vpop.f32.mrf.mxu0  ;;  %v2784_v59 = vpop.f32.mrf.mxu1 }
 0x50b   :  { %v2933_v61 = vadd.f32 %v2932_v58, %v2714_v57  ;;  %v2942_v46 = vadd.f32 %v2941_v1, %v2784_v59 }
 0x50c   :  { %v5339_v37 = vpop.f32.mrf.mxu0  ;;  %v5350_v62 = vpop.f32.mrf.mxu1 }
 0x50d   :  { %v4687_v63 = vmul.f32 -1.442695, %v2933_v61  ;;  %v4688_v3 = vmul.f32 -1.442695, %v2942_v46  ;;  %v3047_v62 = vld [vmem:[#allocation8 + $0x6] sm:$0x3] }
 0x50f   :  { %5686 = vpow2.f32 %v4687_v63 }
 0x510   :  { %5688 = vpow2.f32 %v4688_v3 }
 0x514   :  { %v2857_v4 = vpop.f32.mrf.mxu0  ;;  %v2927_v6 = vpop.f32.mrf.mxu1 }
 0x515   :  { %v3030_v7 = vadd.f32 %v3029_v5, %v2857_v4  ;;  %v3039_v14 = vadd.f32 %v3038_v11, %v2927_v6 }
 0x516   :  { %v5361_v8 = vpop.f32.mrf.mxu0  ;;  %v5372_v9 = vpop.f32.mrf.mxu1 }
 0x517   :  { %v4690_v10 = vmul.f32 -1.442695, %v3030_v7  ;;  %v4691_v18 = vmul.f32 -1.442695, %v3039_v14 }
 0x519   :  { %5690 = vpow2.f32 %v4690_v10  ;;  %v3416_v10 = vld [vmem:[#allocation3 + $0xa] sm:$0x3] }
 0x51c   :  { %v5687_v13 = vpop.eup %5686 }
 0x51d   :  { %v2937_v16 = vadd.f32 1.0, %v5687_v13  ;;  %v3017_v60 = vpop.f32.mrf.mxu0  ;;  %v3114_v17 = vpop.f32.mrf.mxu1 }
 0x51e   :  { %v5689_v30 = vpop.eup %5688  ;;  %v3018_v27 = vadd.f32 %v6199_v12, %v3017_v60  ;;  %v3115_v59 = vadd.f32 %v6205_v22, %v3114_v17  ;;  %v3425_v17 = vld [vmem:[#allocation4 + $0xa] sm:$0x3] }
 0x51f   :  { %5692 = vrcp.f32 %v2937_v16  ;;  %v5383_v19 = vpop.f32.mrf.mxu0  ;;  %v5394_v29 = vpop.f32.mrf.mxu1  ;;  %v2946_v23 = vadd.f32 1.0, %v5689_v30  ;;  %v3513_v30 = vld [vmem:[#allocation6 + $0x4] sm:$0x3] }
 0x520   :  { %5694 = vpow2.f32 %v4691_v18 }
 0x526   :  { %v5691_v2 = vpop.eup %5690 }
 0x527   :  { %v3034_v21 = vadd.f32 1.0, %v5691_v2 }
 0x529   :  { %5696 = vrcp.f32 %v3034_v21 }
 0x52a   :  { %5698 = vrcp.f32 %v2946_v23 }
 0x52c   :  { %v5693_v15 = vpop.eup %5692 }
 0x52d   :  { %v3021_v39 = vmul.f32 %v5693_v15, %v3018_v27  ;;  %v5695_v57 = vpop.eup %5694 }
 0x52e   :  { %v3043_v58 = vadd.f32 1.0, %v5695_v57 }
 0x52f   :  { %v3022_v33 = vadd.f32 %v3021_v39, %v2950_v32  ;;  %v3522_v39 = vld [vmem:[#allocation7 + $0x4] sm:$0x3] }
 0x531   :  { %5700 = vtanh.f32 %v3022_v33 }
 0x532   :  { %5702 = vrcp.f32 %v3043_v58 }
 0x536   :  { %v5697_v61 = vpop.eup %5696 }
 0x537   :  { %v3118_v37 = vmul.f32 %v5697_v61, %v3115_v59  ;;  %v5699_v63 = vpop.eup %5698 }
 0x538   :  { %v3024_v46 = vsub.f32 1.0, %v5699_v63  ;;  %v3026_v4 = vmul.f32 %v5699_v63, %v6465_v24 }
 0x539   :  { %v3119_v1 = vadd.f32 %v3118_v37, %v3047_v62 }
 0x53b   :  { %5704 = vtanh.f32 %v3119_v1 }
 0x53e   :  { %v5701_v3 = vpop.eup %5700 }
 0x53f   :  { %v3025_v12 = vmul.f32 %v5701_v3, %v3024_v46  ;;  %v5703_v22 = vpop.eup %5702 }
 0x540   :  { %v3121_v24 = vsub.f32 1.0, %v5703_v22  ;;  %v3123_v8 = vmul.f32 %v5703_v22, %v6510_v34 }
 0x541   :  { %v6593_v5 = vadd.f32 %v3026_v4, %v3025_v12  ;;  %v6677_v12 = vld [vmem:[%s6855_s5] ss:$0 sm:$0xff] }
 0x543   :  { %5404 = vmatmul.mubr.msk.f32.vlgmr.msra.gmra.mxu0 %vm125_vm1, %v6593_v5  ;;  %3126 = vst.msk [vmem:[#allocation18 + $0x8] sm:$0x3] %vm107_vm0, %v6593_v5  ;;  %5415 = vmatmul.mubr.msk.f32.vlgmr.msra.gmra.mxu1 %vm125_vm1, %v6593_v5 }
 0x544   :  { %5418 = vmatpush3.msra.mxu0 %v6473_v25  ;;  %5429 = vmatpush3.msra.mxu1 %v6476_v26 }
 0x545   :  { %5419 = vmatprep.subr.mxu0 %v5951_v0  ;;  %5430 = vmatprep.subr.mxu1 %v5951_v0 }
 0x546   :  { %5420 = vmatpush3.msra.mxu0 %v6481_v28  ;;  %5431 = vmatpush3.msra.mxu1 %v6484_v55 }
 0x547   :  { %5421 = vmatprep.subr.mxu0 %v5951_v0  ;;  %5432 = vmatprep.subr.mxu1 %v5951_v0 }
 0x548   :  { %5422 = vmatpush3.msra.mxu0 %v6489_v56  ;;  %5433 = vmatpush3.msra.mxu1 %v6492_v38  ;;  %v5705_v6 = vpop.eup %5704 }
 0x549   :  { %5423 = vmatprep.subr.mxu0 %v5951_v0  ;;  %5434 = vmatprep.subr.mxu1 %v5951_v0  ;;  %v3122_v7 = vmul.f32 %v5705_v6, %v3121_v24  ;;  %v3434_v6 = vld [vmem:[#allocation5 + $0xa] sm:$0x3] }
 0x54a   :  { %5424 = vmatpush3.msra.mxu0 %v6497_v40  ;;  %5435 = vmatpush3.msra.mxu1 %v6500_v31 }
 0x54b   :  { %5425 = vmatprep.mubr.msk.f32.mxu0 %vm5952_vm2, %v5951_v0  ;;  %5436 = vmatprep.mubr.msk.f32.mxu1 %vm5952_vm2, %v5951_v0  ;;  %v6622_v9 = vadd.f32 %v3123_v8, %v3122_v7 }
 0x54c   :  { %5439 = vmatprep.subr.mxu0 %v5951_v0  ;;  %5450 = vmatprep.subr.mxu1 %v5951_v0 }
 0x54d   :  { %5426 = vmatmul.mubr.msk.f32.vlgmr.msra.gmra.mxu0 %vm125_vm1, %v6622_v9  ;;  %3128 = vst.msk [vmem:[#allocation19 + $0x6] sm:$0x3] %vm107_vm0, %v6622_v9  ;;  %5437 = vmatmul.mubr.msk.f32.vlgmr.msra.gmra.mxu1 %vm125_vm1, %v6622_v9 }
 0x54e   :  { %5440 = vmatpush3.msra.mxu0 %v6518_v41  ;;  %5451 = vmatpush3.msra.mxu1 %v6521_v44 }
 0x54f   :  { %5441 = vmatprep.subr.mxu0 %v5951_v0  ;;  %5452 = vmatprep.subr.mxu1 %v5951_v0 }
 0x550   :  { %5442 = vmatpush3.msra.mxu0 %v6526_v45  ;;  %5453 = vmatpush3.msra.mxu1 %v6529_v47 }
 0x551   :  { %5443 = vmatprep.subr.mxu0 %v5951_v0  ;;  %5454 = vmatprep.subr.mxu1 %v5951_v0 }
 0x552   :  { %5444 = vmatpush3.msra.mxu0 %v6534_v35  ;;  %5455 = vmatpush3.msra.mxu1 %v6537_v36 }
 0x553   :  { %5445 = vmatprep.subr.mxu0 %v5951_v0  ;;  %5456 = vmatprep.subr.mxu1 %v5951_v0 }
 0x554   :  { %5446 = vmatpush3.msra.mxu0 %v6542_v48  ;;  %5447 = vmatprep.mubr.msk.f32.mxu0 %vm5952_vm2, %v5951_v0 }
 0x555   :  { %5457 = vmatpush3.msra.mxu1 %v6547_v49  ;;  %5458 = vmatprep.mubr.msk.f32.mxu1 %vm5952_vm2, %v5951_v0 }
 0x556   :  { %5448 = vmatmul.mubr.msk.f32.vlgmr.msra.gmra.mxu0 %vm125_vm1, %v6593_v5  ;;  %5459 = vmatmul.mubr.msk.f32.vlgmr.msra.gmra.mxu1 %vm125_vm1, %v6622_v9 }
 0x557   :  { %5461 = vmatprep.subr.mxu0 %v5951_v0  ;;  %5472 = vmatprep.subr.mxu1 %v5951_v0 }
 0x558   :  { %5462 = vmatpush3.msra.mxu0 %v6438_v42  ;;  %5473 = vmatpush3.msra.mxu1 %v6441_v43 }
 0x559   :  { %5463 = vmatprep.subr.mxu0 %v5951_v0  ;;  %5474 = vmatprep.subr.mxu1 %v5951_v0 }
 0x55a   :  { %5464 = vmatpush3.msra.mxu0 %v6562_v50  ;;  %5475 = vmatpush3.msra.mxu1 %v6565_v51 }
 0x55b   :  { %5465 = vmatprep.subr.mxu0 %v5951_v0  ;;  %5476 = vmatprep.subr.mxu1 %v5951_v0 }
 0x55c   :  { %5466 = vmatpush3.msra.mxu0 %v6570_v52  ;;  %5477 = vmatpush3.msra.mxu1 %v6573_v53 }
 0x55d   :  { %5467 = vmatprep.subr.mxu0 %v5951_v0  ;;  %5478 = vmatprep.subr.mxu1 %v5951_v0 }
 0x55e   :  { %5468 = vmatpush3.msra.mxu0 %v6578_v54  ;;  %5479 = vmatpush3.msra.mxu1 %v6581_v20 }
 0x55f   :  { %5469 = vmatprep.mubr.msk.f32.mxu0 %vm5952_vm2, %v5951_v0  ;;  %5480 = vmatprep.mubr.msk.f32.mxu1 %vm5952_vm2, %v5951_v0 }
 0x560   :  { %5483 = vmatprep.subr.mxu0 %v5951_v0  ;;  %5494 = vmatprep.subr.mxu1 %v5951_v0 }
 0x603   :  { %v3198_v34 = vpop.f32.mrf.mxu0  ;;  %v3268_v11 = vpop.f32.mrf.mxu1 }
 0x604   :  { %v3417_v13 = vadd.f32 %v3416_v10, %v3198_v34  ;;  %v3426_v18 = vadd.f32 %v3425_v17, %v3268_v11  ;;  %v6683_v10 = vld [vmem:[%s6855_s5 + $0x1] ss:$0 sm:$0xff]  ;;  %s5953_s5 = smov [#allocation18]  }
 0x605   :  { %v5405_v14 = vpop.f32.mrf.mxu0  ;;  %v5416_v16 = vpop.f32.mrf.mxu1  ;;  %s4584_s12 = sshll.u32 %s5953_s5, 4  ;;  %s4585_s12 = int_to_ptr.vmem [resolvable:$true] %s4584_s12 }
 0x606   :  { %v4697_v60 = vmul.f32 -1.442695, %v3417_v13  ;;  %v4698_v19 = vmul.f32 -1.442695, %v3426_v18  ;;  %v3531_v16 = vld [vmem:[#allocation8 + $0x4] sm:$0x3]  ;;  %p5897_p12 = scmp.lt.s32.totalorder %s4585_s12, %s4585_s12 }
 0x607   :  { %s5892_s13 = scalar_lea.vmem %s4585_s12, 256 }
 0x608   :  { %5706 = vpow2.f32 %v4697_v60  ;;  %p5893_p11 = scmp.ne.s32.totalorder %s4585_s12, %s5892_s13  ;;  %p5898_p13 = scmp.lt.s32.totalorder %s5892_s13, %s5892_s13 }
 0x609   :  { %5708 = vpow2.f32 %v4698_v19 }
 0x60a   :  { %p5899_p0 = por %p5898_p13, %p5897_p12 }
 0x60c   :  { %p5900_p1 = pnand %p5899_p0, %p5893_p11 }
 0x60d   :  { %v3341_v29 = vpop.f32.mrf.mxu0  ;;  %v3411_v2 = vpop.f32.mrf.mxu1 }
 0x60e   :  { %v3514_v21 = vadd.f32 %v3513_v30, %v3341_v29  ;;  %v3523_v33 = vadd.f32 %v3522_v39, %v3411_v2 }
 0x60f   :  { %v5427_v23 = vpop.f32.mrf.mxu0  ;;  %v5438_v27 = vpop.f32.mrf.mxu1 }
 0x610   :  { %v4700_v15 = vmul.f32 -1.442695, %v3514_v21  ;;  %v4701_v61 = vmul.f32 -1.442695, %v3523_v33 }
 0x612   :  { %5710 = vpow2.f32 %v4700_v15 }
 0x615   :  { %v5707_v32 = vpop.eup %5706 }
 0x616   :  { %v3421_v57 = vadd.f32 1.0, %v5707_v32  ;;  %v3501_v58 = vpop.f32.mrf.mxu0  ;;  %v3598_v59 = vpop.f32.mrf.mxu1 }
 0x617   :  { %v5709_v63 = vpop.eup %5708  ;;  %v3502_v4 = vadd.f32 %v6677_v12, %v3501_v58  ;;  %v3599_v11 = vadd.f32 %v6683_v10, %v3598_v59 }
 0x618   :  { %5712 = vrcp.f32 %v3421_v57  ;;  %v5449_v37 = vpop.f32.mrf.mxu0  ;;  %v5460_v62 = vpop.f32.mrf.mxu1  ;;  %v3430_v3 = vadd.f32 1.0, %v5709_v63  ;;  %v3997_v57 = vld [vmem:[#allocation6 + $0x2] sm:$0x3]  ;;  %v4006_v63 = vld [vmem:[#allocation7 + $0x2] sm:$0x3] }
 0x619   :  { %5714 = vpow2.f32 %v4701_v61 }
 0x61f   :  { %v5711_v1 = vpop.eup %5710 }
 0x620   :  { %v3518_v46 = vadd.f32 1.0, %v5711_v1 }
 0x622   :  { %5716 = vrcp.f32 %v3518_v46 }
 0x623   :  { %5718 = vrcp.f32 %v3430_v3 }
 0x625   :  { %v5713_v22 = vpop.eup %5712 }
 0x626   :  { %v3505_v24 = vmul.f32 %v5713_v22, %v3502_v4  ;;  %v5715_v8 = vpop.eup %5714 }
 0x627   :  { %v3527_v34 = vadd.f32 1.0, %v5715_v8 }
 0x628   :  { %v3506_v7 = vadd.f32 %v3505_v24, %v3434_v6 }
 0x62a   :  { %5720 = vtanh.f32 %v3506_v7 }
 0x62b   :  { %5722 = vrcp.f32 %v3527_v34 }
 0x62f   :  { %v5717_v13 = vpop.eup %5716 }
 0x630   :  { %v3602_v14 = vmul.f32 %v5717_v13, %v3599_v11  ;;  %v5719_v60 = vpop.eup %5718 }
 0x631   :  { %v3508_v18 = vsub.f32 1.0, %v5719_v60  ;;  %v3510_v30 = vmul.f32 %v5719_v60, %v6593_v5 }
 0x632   :  { %v3603_v17 = vadd.f32 %v3602_v14, %v3531_v16 }
 0x634   :  { %5724 = vtanh.f32 %v3603_v17  ;;  %v3918_v17 = vld [vmem:[#allocation5 + $0xc] sm:$0x3] }
 0x637   :  { %v5721_v19 = vpop.eup %5720 }
 0x638   :  { %v3509_v29 = vmul.f32 %v5721_v19, %v3508_v18  ;;  %v5723_v21 = vpop.eup %5722 }
 0x639   :  { %v3605_v5 = vsub.f32 1.0, %v5723_v21  ;;  %v3607_v15 = vmul.f32 %v5723_v21, %v6622_v9 }
 0x63a   :  { %v6687_v2 = vadd.f32 %v3510_v30, %v3509_v29 }
 0x63c   :  { %5470 = vmatmul.mubr.msk.f32.vlgmr.msra.gmra.mxu0 %vm125_vm1, %v6687_v2  ;;  %3610 = vst.msk [vmem:[#allocation18 + $0xa] sm:$0x3] %vm107_vm0, %v6687_v2  ;;  %5481 = vmatmul.mubr.msk.f32.vlgmr.msra.gmra.mxu1 %vm125_vm1, %v6687_v2 }
 0x63d   :  { %5484 = vmatpush3.msra.mxu0 %v6473_v25  ;;  %5495 = vmatpush3.msra.mxu1 %v6476_v26 }
 0x63e   :  { %5485 = vmatprep.subr.mxu0 %v5951_v0  ;;  %5496 = vmatprep.subr.mxu1 %v5951_v0 }
 0x63f   :  { %5486 = vmatpush3.msra.mxu0 %v6481_v28  ;;  %5497 = vmatpush3.msra.mxu1 %v6484_v55 }
 0x640   :  { %5487 = vmatprep.subr.mxu0 %v5951_v0  ;;  %5498 = vmatprep.subr.mxu1 %v5951_v0 }
 0x641   :  { %5488 = vmatpush3.msra.mxu0 %v6489_v56  ;;  %5499 = vmatpush3.msra.mxu1 %v6492_v38  ;;  %v5725_v23 = vpop.eup %5724 }
 0x642   :  { %5489 = vmatprep.subr.mxu0 %v5951_v0  ;;  %5500 = vmatprep.subr.mxu1 %v5951_v0  ;;  %v3606_v27 = vmul.f32 %v5725_v23, %v3605_v5  ;;  %v4015_v23 = vld [vmem:[#allocation8 + $0x2] sm:$0x3] }
 0x643   :  { %5490 = vmatpush3.msra.mxu0 %v6497_v40  ;;  %5501 = vmatpush3.msra.mxu1 %v6500_v31 }
 0x644   :  { %5491 = vmatprep.mubr.msk.f32.mxu0 %vm5952_vm2, %v5951_v0  ;;  %5502 = vmatprep.mubr.msk.f32.mxu1 %vm5952_vm2, %v5951_v0  ;;  %v6716_v39 = vadd.f32 %v3607_v15, %v3606_v27 }
 0x645   :  { %5505 = vmatprep.subr.mxu0 %v5951_v0  ;;  %5516 = vmatprep.subr.mxu1 %v5951_v0 }
 0x646   :  { %5492 = vmatmul.mubr.msk.f32.vlgmr.msra.gmra.mxu0 %vm125_vm1, %v6716_v39  ;;  %3612 = vst.msk [vmem:[#allocation19 + $0x4] sm:$0x3] %vm107_vm0, %v6716_v39  ;;  %5503 = vmatmul.mubr.msk.f32.vlgmr.msra.gmra.mxu1 %vm125_vm1, %v6716_v39 }
 0x647   :  { %5506 = vmatpush3.msra.mxu0 %v6518_v41  ;;  %5517 = vmatpush3.msra.mxu1 %v6521_v44 }
 0x648   :  { %5507 = vmatprep.subr.mxu0 %v5951_v0  ;;  %5518 = vmatprep.subr.mxu1 %v5951_v0 }
 0x649   :  { %5508 = vmatpush3.msra.mxu0 %v6526_v45  ;;  %5519 = vmatpush3.msra.mxu1 %v6529_v47 }
 0x64a   :  { %5509 = vmatprep.subr.mxu0 %v5951_v0  ;;  %5520 = vmatprep.subr.mxu1 %v5951_v0 }
 0x64b   :  { %5510 = vmatpush3.msra.mxu0 %v6534_v35  ;;  %5521 = vmatpush3.msra.mxu1 %v6537_v36 }
 0x64c   :  { %5511 = vmatprep.subr.mxu0 %v5951_v0  ;;  %5522 = vmatprep.subr.mxu1 %v5951_v0 }
 0x64d   :  { %5512 = vmatpush3.msra.mxu0 %v6542_v48  ;;  %5513 = vmatprep.mubr.msk.f32.mxu0 %vm5952_vm2, %v5951_v0 }
 0x64e   :  { %5523 = vmatpush3.msra.mxu1 %v6547_v49  ;;  %5524 = vmatprep.mubr.msk.f32.mxu1 %vm5952_vm2, %v5951_v0 }
 0x64f   :  { %5514 = vmatmul.mubr.msk.f32.vlgmr.msra.gmra.mxu0 %vm125_vm1, %v6687_v2  ;;  %5525 = vmatmul.mubr.msk.f32.vlgmr.msra.gmra.mxu1 %vm125_vm1, %v6716_v39 }
 0x650   :  { %5527 = vmatprep.subr.mxu0 %v5951_v0  ;;  %5538 = vmatprep.subr.mxu1 %v5951_v0 }
 0x651   :  { %5528 = vmatpush3.msra.mxu0 %v6438_v42  ;;  %5539 = vmatpush3.msra.mxu1 %v6441_v43  ;;  %v3900_v43 = vld [vmem:[#allocation3 + $0xc] sm:$0x3] }
 0x652   :  { %5529 = vmatprep.subr.mxu0 %v5951_v0  ;;  %5540 = vmatprep.subr.mxu1 %v5951_v0 }
 0x653   :  { %5530 = vmatpush3.msra.mxu0 %v6562_v50  ;;  %5541 = vmatpush3.msra.mxu1 %v6565_v51 }
 0x654   :  { %5531 = vmatprep.subr.mxu0 %v5951_v0  ;;  %5542 = vmatprep.subr.mxu1 %v5951_v0 }
 0x655   :  { %5532 = vmatpush3.msra.mxu0 %v6570_v52  ;;  %5543 = vmatpush3.msra.mxu1 %v6573_v53 }
 0x656   :  { %5533 = vmatprep.subr.mxu0 %v5951_v0  ;;  %5544 = vmatprep.subr.mxu1 %v5951_v0 }
 0x657   :  { %5534 = vmatpush3.msra.mxu0 %v6578_v54  ;;  %5545 = vmatpush3.msra.mxu1 %v6581_v20  ;;  %v3909_v54 = vld [vmem:[#allocation4 + $0xc] sm:$0x3] }
 0x658   :  { %5535 = vmatprep.mubr.msk.f32.mxu0 %vm5952_vm2, %v5951_v0  ;;  %5546 = vmatprep.mubr.msk.f32.mxu1 %vm5952_vm2, %v5951_v0 }
 0x659   :  { %5549 = vmatprep.subr.mxu0 %v5951_v0  ;;  %5560 = vmatprep.subr.mxu1 %v5951_v0 }
 0x6fc   :  { %v3682_v42 = vpop.f32.mrf.mxu0  ;;  %v3752_v50 = vpop.f32.mrf.mxu1 }
 0x6fd   :  { %v3901_v51 = vadd.f32 %v3900_v43, %v3682_v42  ;;  %v3910_v20 = vadd.f32 %v3909_v54, %v3752_v50 }
 0x6fe   :  { %v5471_v52 = vpop.f32.mrf.mxu0  ;;  %v5482_v53 = vpop.f32.mrf.mxu1 }
 0x6ff   :  { %v4707_v9 = vmul.f32 -1.442695, %v3901_v51  ;;  %v4708_v32 = vmul.f32 -1.442695, %v3910_v20 }
 0x701   :  { %5726 = vpow2.f32 %v4707_v9 }
 0x702   :  { %5728 = vpow2.f32 %v4708_v32  ;;  %v4488_v32 = vld [vmem:[#allocation7] sm:$0x3] }
 0x706   :  { %v3825_v33 = vpop.f32.mrf.mxu0  ;;  %v3895_v58 = vpop.f32.mrf.mxu1 }
 0x707   :  { %v3998_v59 = vadd.f32 %v3997_v57, %v3825_v33  ;;  %v4007_v46 = vadd.f32 %v4006_v63, %v3895_v58 }
 0x708   :  { %v5493_v61 = vpop.f32.mrf.mxu0  ;;  %v5504_v37 = vpop.f32.mrf.mxu1 }
 0x709   :  { %v4710_v62 = vmul.f32 -1.442695, %v3998_v59  ;;  %v4711_v24 = vmul.f32 -1.442695, %v4007_v46 }
 0x70b   :  { %5730 = vpow2.f32 %v4710_v62 }
 0x70e   :  { %v5727_v1 = vpop.eup %5726 }
 0x70f   :  { %v3905_v3 = vadd.f32 1.0, %v5727_v1  ;;  %v3985_v4 = vpop.f32.mrf.mxu0  ;;  %v4082_v22 = vpop.f32.mrf.mxu1 }
 0x710   :  { %v5729_v8 = vpop.eup %5728  ;;  %v3986_v14 = vadd.f32 %v6677_v12, %v3985_v4  ;;  %v4083_v30 = vadd.f32 %v6683_v10, %v4082_v22 }
 0x711   :  { %5732 = vrcp.f32 %v3905_v3  ;;  %v5515_v6 = vpop.f32.mrf.mxu0  ;;  %v5526_v7 = vpop.f32.mrf.mxu1  ;;  %v3914_v13 = vadd.f32 1.0, %v5729_v8 }
 0x712   :  { %5734 = vpow2.f32 %v4711_v24  ;;  %v4402_v7 = vld [vmem:[#allocation5 + $0xe] sm:$0x3] }
 0x718   :  { %v5731_v34 = vpop.eup %5730 }
 0x719   :  { %v4002_v11 = vadd.f32 1.0, %v5731_v34 }
 0x71b   :  { %5736 = vrcp.f32 %v4002_v11 }
 0x71c   :  { %5738 = vrcp.f32 %v3914_v13 }
 0x71e   :  { %v5733_v16 = vpop.eup %5732 }
 0x71f   :  { %v3989_v60 = vmul.f32 %v5733_v16, %v3986_v14  ;;  %v5735_v19 = vpop.eup %5734 }
 0x720   :  { %v4011_v29 = vadd.f32 1.0, %v5735_v19 }
 0x721   :  { %v3990_v18 = vadd.f32 %v3989_v60, %v3918_v17  ;;  %v4496_v60 = vld [vmem:[#allocation8] sm:$0x3] }
 0x723   :  { %5740 = vtanh.f32 %v3990_v18 }
 0x724   :  { %5742 = vrcp.f32 %v4011_v29 }
 0x728   :  { %v5737_v21 = vpop.eup %5736 }
 0x729   :  { %v4086_v5 = vmul.f32 %v5737_v21, %v4083_v30  ;;  %v5739_v27 = vpop.eup %5738 }
 0x72a   :  { %v3992_v42 = vsub.f32 1.0, %v5739_v27  ;;  %v3994_v51 = vmul.f32 %v5739_v27, %v6687_v2 }
 0x72b   :  { %v4087_v15 = vadd.f32 %v4086_v5, %v4015_v23 }
 0x72d   :  { %5744 = vtanh.f32 %v4087_v15 }
 0x730   :  { %v5741_v43 = vpop.eup %5740 }
 0x731   :  { %v3993_v50 = vmul.f32 %v5741_v43, %v3992_v42  ;;  %v5743_v53 = vpop.eup %5742 }
 0x733   :  { %v6771_v52 = vadd.f32 %v3994_v51, %v3993_v50 }
 0x735   :  { %5536 = vmatmul.mubr.msk.f32.vlgmr.msra.gmra.mxu0 %vm125_vm1, %v6771_v52  ;;  %4094 = vst.msk [vmem:[#allocation18 + $0xc] sm:$0x3] %vm107_vm0, %v6771_v52  ;;  %5547 = vmatmul.mubr.msk.f32.vlgmr.msra.gmra.mxu1 %vm125_vm1, %v6771_v52 }
 0x736   :  { %5550 = vmatpush3.msra.mxu0 %v6473_v25  ;;  %5561 = vmatpush3.msra.mxu1 %v6476_v26  ;;  %v4089_v25 = vsub.f32 1.0, %v5743_v53 }
 0x737   :  { %5551 = vmatprep.subr.mxu0 %v5951_v0  ;;  %5562 = vmatprep.subr.mxu1 %v5951_v0 }
 0x738   :  { %5552 = vmatpush3.msra.mxu0 %v6481_v28  ;;  %5563 = vmatpush3.msra.mxu1 %v6484_v55  ;;  %v4091_v28 = vmul.f32 %v5743_v53, %v6716_v39 }
 0x739   :  { %5553 = vmatprep.subr.mxu0 %v5951_v0  ;;  %5564 = vmatprep.subr.mxu1 %v5951_v0 }
 0x73a   :  { %5554 = vmatpush3.msra.mxu0 %v6489_v56  ;;  %5565 = vmatpush3.msra.mxu1 %v6492_v38  ;;  %v5745_v2 = vpop.eup %5744  ;;  %v4384_v38 = vld [vmem:[#allocation3 + $0xe] sm:$0x3] }
 0x73b   :  { %5555 = vmatprep.subr.mxu0 %v5951_v0  ;;  %5566 = vmatprep.subr.mxu1 %v5951_v0  ;;  %v4090_v26 = vmul.f32 %v5745_v2, %v4089_v25 }
 0x73c   :  { %5556 = vmatpush3.msra.mxu0 %v6497_v40  ;;  %5567 = vmatpush3.msra.mxu1 %v6500_v31 }
 0x73d   :  { %5557 = vmatprep.mubr.msk.f32.mxu0 %vm5952_vm2, %v5951_v0  ;;  %5568 = vmatprep.mubr.msk.f32.mxu1 %vm5952_vm2, %v5951_v0  ;;  %v6800_v55 = vadd.f32 %v4091_v28, %v4090_v26 }
 0x73e   :  { %5571 = vmatprep.subr.mxu0 %v5951_v0  ;;  %5582 = vmatprep.subr.mxu1 %v5951_v0 }
 0x73f   :  { %5558 = vmatmul.mubr.msk.f32.vlgmr.msra.gmra.mxu0 %vm125_vm1, %v6800_v55  ;;  %4096 = vst.msk [vmem:[#allocation19 + $0x2] sm:$0x3] %vm107_vm0, %v6800_v55  ;;  %5569 = vmatmul.mubr.msk.f32.vlgmr.msra.gmra.mxu1 %vm125_vm1, %v6800_v55 }
 0x740   :  { %5572 = vmatpush3.msra.mxu0 %v6518_v41  ;;  %5583 = vmatpush3.msra.mxu1 %v6521_v44 }
 0x741   :  { %5573 = vmatprep.subr.mxu0 %v5951_v0  ;;  %5584 = vmatprep.subr.mxu1 %v5951_v0 }
 0x742   :  { %5574 = vmatpush3.msra.mxu0 %v6526_v45  ;;  %5585 = vmatpush3.msra.mxu1 %v6529_v47  ;;  %v4393_v47 = vld [vmem:[#allocation4 + $0xe] sm:$0x3] }
 0x743   :  { %5575 = vmatprep.subr.mxu0 %v5951_v0  ;;  %5586 = vmatprep.subr.mxu1 %v5951_v0 }
 0x744   :  { %5576 = vmatpush3.msra.mxu0 %v6534_v35  ;;  %5587 = vmatpush3.msra.mxu1 %v6537_v36 }
 0x745   :  { %5577 = vmatprep.subr.mxu0 %v5951_v0  ;;  %5588 = vmatprep.subr.mxu1 %v5951_v0 }
 0x746   :  { %5578 = vmatpush3.msra.mxu0 %v6542_v48  ;;  %5579 = vmatprep.mubr.msk.f32.mxu0 %vm5952_vm2, %v5951_v0 }
 0x747   :  { %5589 = vmatpush3.msra.mxu1 %v6547_v49  ;;  %5590 = vmatprep.mubr.msk.f32.mxu1 %vm5952_vm2, %v5951_v0  ;;  %v4480_v49 = vld [vmem:[#allocation6] sm:$0x3] }
 0x748   :  { %5580 = vmatmul.mubr.msk.f32.vlgmr.msra.gmra.mxu0 %vm125_vm1, %v6771_v52  ;;  %5591 = vmatmul.mubr.msk.f32.vlgmr.msra.gmra.mxu1 %vm125_vm1, %v6800_v55 }
 0x7f5   :  { %v4166_v56 = vpop.f32.mrf.mxu0  ;;  %v4236_v40 = vpop.f32.mrf.mxu1 }
 0x7f6   :  { %v4385_v31 = vadd.f32 %v4384_v38, %v4166_v56  ;;  %v4394_v35 = vadd.f32 %v4393_v47, %v4236_v40 }
 0x7f7   :  { %v5537_v41 = vpop.f32.mrf.mxu0  ;;  %v5548_v44 = vpop.f32.mrf.mxu1 }
 0x7f8   :  { %v4717_v45 = vmul.f32 -1.442695, %v4385_v31  ;;  %v4718_v36 = vmul.f32 -1.442695, %v4394_v35 }
 0x7fa   :  { %5746 = vpow2.f32 %v4717_v45 }
 0x7fb   :  { %5748 = vpow2.f32 %v4718_v36 }
 0x7ff   :  { %v4309_v48 = vpop.f32.mrf.mxu0  ;;  %v4379_v0 = vpop.f32.mrf.mxu1 }
 0x800   :  { %v4481_v39 = vadd.f32 %v4480_v49, %v4309_v48  ;;  %v4489_v57 = vadd.f32 %v4488_v32, %v4379_v0 }
 0x801   :  { %v5559_v9 = vpop.f32.mrf.mxu0  ;;  %v5570_v54 = vpop.f32.mrf.mxu1 }
 0x802   :  { %v4720_v20 = vmul.f32 -1.442695, %v4481_v39  ;;  %v4721_v37 = vmul.f32 -1.442695, %v4489_v57 }
 0x804   :  { %5750 = vpow2.f32 %v4720_v20 }
 0x807   :  { %v5747_v33 = vpop.eup %5746 }
 0x808   :  { %v4389_v58 = vadd.f32 1.0, %v5747_v33  ;;  %v4469_v59 = vpop.f32.mrf.mxu0  ;;  %v4563_v61 = vpop.f32.mrf.mxu1 }
 0x809   :  { %v5749_v1 = vpop.eup %5748  ;;  %v4470_v22 = vadd.f32 %v6677_v12, %v4469_v59  ;;  %v4564_v13 = vadd.f32 %v6683_v10, %v4563_v61 }
 0x80a   :  { %5752 = vrcp.f32 %v4389_v58  ;;  %v5581_v62 = vpop.f32.mrf.mxu0  ;;  %v5592_v63 = vpop.f32.mrf.mxu1  ;;  %v4398_v4 = vadd.f32 1.0, %v5749_v1 }
 0x80b   :  { %5754 = vpow2.f32 %v4721_v37 }
 0x811   :  { %v5751_v46 = vpop.eup %5750 }
 0x812   :  { %v4485_v3 = vadd.f32 1.0, %v5751_v46 }
 0x814   :  { %5756 = vrcp.f32 %v4485_v3 }
 0x815   :  { %5758 = vrcp.f32 %v4398_v4 }
 0x817   :  { %v5753_v24 = vpop.eup %5752 }
 0x818   :  { %v4473_v6 = vmul.f32 %v5753_v24, %v4470_v22  ;;  %v5755_v34 = vpop.eup %5754 }
 0x819   :  { %v4493_v11 = vadd.f32 1.0, %v5755_v34 }
 0x81a   :  { %v4474_v8 = vadd.f32 %v4473_v6, %v4402_v7 }
 0x81c   :  { %5760 = vtanh.f32 %v4474_v8 }
 0x81d   :  { %5762 = vrcp.f32 %v4493_v11 }
 0x821   :  { %v5757_v14 = vpop.eup %5756 }
 0x822   :  { %v4567_v16 = vmul.f32 %v5757_v14, %v4564_v13  ;;  %v5759_v17 = vpop.eup %5758 }
 0x823   :  { %v4476_v19 = vsub.f32 1.0, %v5759_v17  ;;  %v4478_v12 = vmul.f32 %v5759_v17, %v6771_v52 }
 0x824   :  { %v4568_v18 = vadd.f32 %v4567_v16, %v4496_v60 }
 0x826   :  { %5764 = vtanh.f32 %v4568_v18 }
 0x829   :  { %v5761_v29 = vpop.eup %5760 }
 0x82a   :  { %v4477_v30 = vmul.f32 %v5761_v29, %v4476_v19 }
 0x82c   :  { %v4479_v21 = vadd.f32 %v4478_v12, %v4477_v30 }
 0x82e   :  { %4577 = vst.msk [vmem:[#allocation2] sm:$0x3] %vm107_vm0, %v4479_v21  ;;  %4575 = vst.msk [vmem:[#allocation18 + $0xe] sm:$0x3] %vm107_vm0, %v4479_v21 }
 0x82f   :  { %5903 = shalt.err (!%p5900_p1)
}
 0x830   :  { %4590 = dma.vmem_to_hbm [thread:$0]  %s4585_s12, 256, %s6856_s6, [#allocation11], %s5944_s29, %s5944_s29, %s5945_s30   ;;  %v5763_v10 = vpop.eup %5762 }
 0x831   :  { %v4570_v5 = vsub.f32 1.0, %v5763_v10  ;;  %s5954_s16 = smov [#allocation19]   ;;  %v4572_v27 = vmul.f32 %v5763_v10, %v6800_v55 }
 0x832   :  { %s4600_s17 = sshll.u32 %s5954_s16, 4  ;;  %s4601_s17 = int_to_ptr.vmem [resolvable:$true] %s4600_s17 }
 0x833   :  { %v5765_v23 = vpop.eup %5764  ;;  %s5912_s18 = scalar_lea.vmem %s4601_s17, 256  ;;  %p5917_p3 = scmp.lt.s32.totalorder %s4601_s17, %s4601_s17 }
 0x834   :  { %v4571_v15 = vmul.f32 %v5765_v23, %v4570_v5  ;;  %p5913_p2 = scmp.ne.s32.totalorder %s4601_s17, %s5912_s18  ;;  %p5918_p4 = scmp.lt.s32.totalorder %s5912_s18, %s5912_s18 }
 0x836   :  { %v4573_v42 = vadd.f32 %v4572_v27, %v4571_v15  ;;  %p5919_p5 = por %p5918_p4, %p5917_p3 }
 0x838   :  { %4578 = vst.msk [vmem:[#allocation2 + $0x2] sm:$0x3] %vm107_vm0, %v4573_v42  ;;  %4576 = vst.msk [vmem:[#allocation19] sm:$0x3] %vm107_vm0, %v4573_v42  ;;  %p5920_p6 = pnand %p5919_p5, %p5913_p2 }
 0x83a   :  { %5923 = shalt.err (!%p5920_p6)
}
 0x83b   :  { %4606 = dma.vmem_to_hbm [thread:$0]  %s4601_s17, 256, %s6857_s7, [#allocation20], %s5944_s29, %s5944_s29, %s5945_s30  }
 0x83c   :  { %5938 = dma.done.wait [#allocation11], 256  }
 0x83d   :  { %5939 = vsyncadd [#allocation11], 4294967040 }
 0x83e   :  { %5940 = dma.done.wait [#allocation20], 256  }
 0x83f   :  { %5941 = vsyncadd [#allocation20], 4294967040 }
 0x840   :  { %4613 = vsyncpa [#allocation10], 1 }
 0x841   :  { %4614 = vsyncpa [#allocation13], 1 }
 0x842   :  { %4615 = vsyncpa [#allocation16], 1 }
 0x843   :  { %4616 = vsyncpa [#allocation11], 1 }
 0x844   :  { %4617 = vsyncpa [#allocation20], 1 }

</bundles_post_ra>
